<compile_context>
chip_gen: v7x
topology: tpu7x:2x2x1
jax: 0.10.0
libtpu: 0.0.40
codegen_flags: <defaults>
</compile_context>

<pallas_src>
import math

import jax
import jax.numpy as jnp
from jax.experimental import pallas as pl
from jax.experimental.pallas import tpu as pltpu

# ---- small, deterministic ViT config (stand-in for vit-base-patch16-224) ----
BATCH, SEQ = 2, 3
C, H, W = 3, 16, 16
PATCH = 8
NUM_PATCHES = (H // PATCH) * (W // PATCH)      # 4
TOKENS = NUM_PATCHES + 1                       # 5 real tokens (CLS + patches)
T_PAD = 8                                      # tokens padded to sublane multiple
HIDDEN = 32                                    # stands in for 768
HEADS = 4
HEAD_DIM = HIDDEN // HEADS
INTER = 64                                     # stands in for 3072
LAYERS = 2                                     # stands in for 12
NUM_CLASSES = 5
LN_EPS = 1e-12                                 # HF ViT layer_norm_eps
NEG_INF = -1e30

N_FRAMES = BATCH * SEQ                         # frames pushed through the ViT
# One frame block: weights stream from HBM once (v5e/v6e).  For v7x use
# FRAMES_PER_BLOCK = N_FRAMES // 2 to occupy both TensorCores.
FRAMES_PER_BLOCK = N_FRAMES
N_BLOCKS = N_FRAMES // FRAMES_PER_BLOCK
ROWS_PER_BLOCK = FRAMES_PER_BLOCK * T_PAD      # padded token rows per grid step
PATCH_ROWS_PER_BLOCK = FRAMES_PER_BLOCK * NUM_PATCHES
PATCH_K = C * PATCH * PATCH                    # im2col K dim (192)


# ------------------------------ kernel helpers -------------------------------

def _ln(x, g, b):
    mu = jnp.mean(x, axis=-1, keepdims=True)
    xc = x - mu
    var = jnp.mean(xc * xc, axis=-1, keepdims=True)
    return xc * jax.lax.rsqrt(var + LN_EPS) * g + b


# ----------------------------- Pallas kernels --------------------------------

def _embed_kernel(patch_ref, w_ref, b_ref, cls_ref, pos_ref, out_ref):
    # patch_ref: (1, F*NP, C*P*P) f32; w_ref bf16 -> out_ref: (1, F*T_PAD, D) f32
    emb = (jnp.dot(patch_ref[0].astype(jnp.bfloat16), w_ref[...],
                   preferred_element_type=jnp.float32)
           + b_ref[...])                                       # (F*NP, D) f32
    pos = pos_ref[...]                                         # (TOKENS, D)
    cls_row = cls_ref[...] + pos[0:1, :]                       # (1, D)
    patch_tok = emb.reshape(FRAMES_PER_BLOCK, NUM_PATCHES, HIDDEN) + pos[1:TOKENS, :][None]
    cls_tok = jnp.broadcast_to(cls_row[None], (FRAMES_PER_BLOCK, 1, HIDDEN))
    pad_tok = jnp.zeros((FRAMES_PER_BLOCK, T_PAD - TOKENS, HIDDEN), jnp.float32)
    tokens = jnp.concatenate([cls_tok, patch_tok, pad_tok], axis=1)   # (F, T_PAD, D)
    out_ref[0] = tokens.reshape(ROWS_PER_BLOCK, HIDDEN).astype(out_ref.dtype)


def _encoder_kernel(hid_ref,
                    ln1_g_ref, ln1_b_ref, wqkv_ref, bqkv_ref,
                    wo_ref, bo_ref, ln2_g_ref, ln2_b_ref,
                    w1_ref, b1_ref, w2_ref, b2_ref,
                    fin_g_ref, fin_b_ref, fc_w_ref, fc_b_ref,
                    out_ref,
                    h_scratch):
    """One fused transformer layer per grid step; hidden state stays in VMEM."""
    layer = pl.program_id(1)

    @pl.when(layer == 0)
    def _():
        h_scratch[...] = hid_ref[0]                            # (ROWS, D) f32

    hs = h_scratch[...]                                        # (ROWS, D) f32

    # --- attention: LN1 -> fused QKV (bf16 MXU) -> per-head SDPA batched over
    #     frames -> out-proj + fused residual
    x_ln = _ln(hs, ln1_g_ref[0], ln1_b_ref[0])
    qkv = (jnp.dot(x_ln.astype(jnp.bfloat16), wqkv_ref[0],
                   preferred_element_type=jnp.float32)
           + bqkv_ref[0])                                      # (ROWS, 3D) f32
    q = qkv[:, :HIDDEN].reshape(FRAMES_PER_BLOCK, T_PAD, HIDDEN)
    k = qkv[:, HIDDEN:2 * HIDDEN].reshape(FRAMES_PER_BLOCK, T_PAD, HIDDEN)
    v = qkv[:, 2 * HIDDEN:].reshape(FRAMES_PER_BLOCK, T_PAD, HIDDEN)

    # mask padded key columns (tokens >= TOKENS) out of the softmax
    key_pos = jax.lax.broadcasted_iota(jnp.int32, (1, T_PAD), 1)
    key_mask = jnp.where(key_pos < TOKENS, 0.0, NEG_INF).astype(jnp.float32)

    scale = 1.0 / math.sqrt(HEAD_DIM)
    head_ctx = []
    for hh in range(HEADS):                                    # short static unroll
        c0 = hh * HEAD_DIM
        qh = q[:, :, c0:c0 + HEAD_DIM].astype(jnp.bfloat16)
        kh = k[:, :, c0:c0 + HEAD_DIM].astype(jnp.bfloat16)
        vh = v[:, :, c0:c0 + HEAD_DIM].astype(jnp.bfloat16)
        s = jnp.einsum('fqd,fkd->fqk', qh, kh,
                       preferred_element_type=jnp.float32) * scale
        s = s + key_mask
        s = s - jnp.max(s, axis=-1, keepdims=True)
        p = jnp.exp(s)
        p = p / jnp.sum(p, axis=-1, keepdims=True)             # exact softmax
        head_ctx.append(jnp.einsum('fqk,fkd->fqd', p.astype(jnp.bfloat16), vh,
                                   preferred_element_type=jnp.float32))
    ctx = jnp.concatenate(head_ctx, axis=-1).reshape(ROWS_PER_BLOCK, HIDDEN)
    hs = (jnp.dot(ctx.astype(jnp.bfloat16), wo_ref[0],
                  preferred_element_type=jnp.float32)
          + bo_ref[0] + hs)                                    # fused residual

    # --- MLP: LN2 -> linear + GELU -> linear + fused residual
    # TODO(synk): HF ViT uses exact (erf) GELU; tanh approximation used here
    # for guaranteed Mosaic lowering (EUP tanh).
    x_ln2 = _ln(hs, ln2_g_ref[0], ln2_b_ref[0])
    mid = jax.nn.gelu(
        jnp.dot(x_ln2.astype(jnp.bfloat16), w1_ref[0],
                preferred_element_type=jnp.float32) + b1_ref[0],
        approximate=True)
    hs = (jnp.dot(mid.astype(jnp.bfloat16), w2_ref[0],
                  preferred_element_type=jnp.float32)
          + b2_ref[0] + hs)

    h_scratch[...] = hs

    # --- last-layer epilogue: strided CLS extraction -> final LN -> fc head
    @pl.when(layer == pl.num_programs(1) - 1)
    def _():
        cls = h_scratch[pl.ds(0, FRAMES_PER_BLOCK, stride=T_PAD), :]   # (F, D)
        cls_ln = _ln(cls, fin_g_ref[...], fin_b_ref[...])
        logits = (jnp.dot(cls_ln.astype(jnp.bfloat16), fc_w_ref[...],
                          preferred_element_type=jnp.float32)
                  + fc_b_ref[...])                                      # (F, NC)
        out_ref[0] = logits.astype(out_ref.dtype)


# ------------------------------ pallas wrappers -------------------------------

def embed(patches, p):
    grid_spec = pltpu.PrefetchScalarGridSpec(
        num_scalar_prefetch=0,
        grid=(N_BLOCKS,),
        in_specs=[
            pl.BlockSpec((1, PATCH_ROWS_PER_BLOCK, PATCH_K), lambda nb: (nb, 0, 0)),
            pl.BlockSpec((PATCH_K, HIDDEN), lambda nb: (0, 0)),
            pl.BlockSpec((1, HIDDEN), lambda nb: (0, 0)),
            pl.BlockSpec((1, HIDDEN), lambda nb: (0, 0)),
            pl.BlockSpec((TOKENS, HIDDEN), lambda nb: (0, 0)),
        ],
        out_specs=pl.BlockSpec((1, ROWS_PER_BLOCK, HIDDEN), lambda nb: (nb, 0, 0)),
    )
    return pl.pallas_call(
        _embed_kernel,
        out_shape=jax.ShapeDtypeStruct((N_BLOCKS, ROWS_PER_BLOCK, HIDDEN), jnp.float32),
        grid_spec=grid_spec,
        compiler_params=pltpu.CompilerParams(dimension_semantics=("parallel",)),
    )(patches, p['patch_w'], p['patch_b'], p['cls_token'], p['pos_embed'])


def _layer_spec(*dims):
    return pl.BlockSpec((1,) + dims, lambda nb, l: (l, 0, 0))


_FLOPS_PER_LAYER_FRAME = (
    2 * T_PAD * HIDDEN * 3 * HIDDEN                       # fused QKV
    + HEADS * 2 * (2 * T_PAD * T_PAD * HEAD_DIM)          # scores + context
    + 2 * T_PAD * HIDDEN * HIDDEN                         # out-proj
    + 2 * T_PAD * HIDDEN * INTER                          # MLP up
    + 2 * T_PAD * INTER * HIDDEN)                         # MLP down
_ENC_COST = pl.CostEstimate(
    flops=_FLOPS_PER_LAYER_FRAME * N_FRAMES * LAYERS,
    transcendentals=(HEADS * T_PAD * T_PAD + T_PAD * INTER) * N_FRAMES * LAYERS,
    bytes_accessed=(4 * N_FRAMES * T_PAD * HIDDEN                          # hidden in
                    + 4 * N_FRAMES * NUM_CLASSES                           # logits out
                    + N_BLOCKS * LAYERS * (2 * (4 * HIDDEN * HIDDEN        # bf16 wqkv+wo
                                                + 2 * HIDDEN * INTER)      # bf16 w1+w2
                                           + 4 * (10 * HIDDEN + INTER))),  # f32 bias/LN
)


def encoder(hidden0, p):
    grid_spec = pltpu.PrefetchScalarGridSpec(
        num_scalar_prefetch=0,
        grid=(N_BLOCKS, LAYERS),
        in_specs=[
            pl.BlockSpec((1, ROWS_PER_BLOCK, HIDDEN), lambda nb, l: (nb, 0, 0)),
            _layer_spec(1, HIDDEN),            # ln1_g
            _layer_spec(1, HIDDEN),            # ln1_b
            _layer_spec(HIDDEN, 3 * HIDDEN),   # wqkv (bf16, fused q|k|v)
            _layer_spec(1, 3 * HIDDEN),        # bqkv
            _layer_spec(HIDDEN, HIDDEN),       # wo (bf16)
            _layer_spec(1, HIDDEN),            # bo
            _layer_spec(1, HIDDEN),            # ln2_g
            _layer_spec(1, HIDDEN),            # ln2_b
            _layer_spec(HIDDEN, INTER),        # w1 (bf16)
            _layer_spec(1, INTER),             # b1
            _layer_spec(INTER, HIDDEN),        # w2 (bf16)
            _layer_spec(1, HIDDEN),            # b2
            pl.BlockSpec((1, HIDDEN), lambda nb, l: (0, 0)),            # final_ln_g
            pl.BlockSpec((1, HIDDEN), lambda nb, l: (0, 0)),            # final_ln_b
            pl.BlockSpec((HIDDEN, NUM_CLASSES), lambda nb, l: (0, 0)),  # fc_w (bf16)
            pl.BlockSpec((1, NUM_CLASSES), lambda nb, l: (0, 0)),       # fc_b
        ],
        out_specs=pl.BlockSpec((1, FRAMES_PER_BLOCK, NUM_CLASSES),
                               lambda nb, l: (nb, 0, 0)),
        scratch_shapes=[pltpu.VMEM((ROWS_PER_BLOCK, HIDDEN), jnp.float32)],
    )
    return pl.pallas_call(
        _encoder_kernel,
        out_shape=jax.ShapeDtypeStruct((N_BLOCKS, FRAMES_PER_BLOCK, NUM_CLASSES),
                                       jnp.float32),
        grid_spec=grid_spec,
        compiler_params=pltpu.CompilerParams(
            dimension_semantics=("parallel", "arbitrary"),
            vmem_limit_bytes=32 * 1024 * 1024),
        cost_estimate=_ENC_COST,
    )(hidden0,
      p['ln1_g'], p['ln1_b'], p['wqkv'], p['bqkv'],
      p['wo'], p['bo'], p['ln2_g'], p['ln2_b'],
      p['w1'], p['b1'], p['w2'], p['b2'],
      p['final_ln_g'], p['final_ln_b'], p['fc_w'], p['fc_b'])


# ------------------------------ parameters -----------------------------------

def init_params(key):
    keys = iter(jax.random.split(key, 16))

    def nrm(shape, dtype=jnp.float32, std=0.02):
        return (std * jax.random.normal(next(keys), shape)).astype(dtype)

    def zeros(shape, dtype=jnp.float32):
        return jnp.zeros(shape, dtype)

    def ones(shape, dtype=jnp.float32):
        return jnp.ones(shape, dtype)

    bf16 = jnp.bfloat16
    return {
        # Conv2d(C, HIDDEN, kernel=PATCH, stride=PATCH) expressed as matmul
        'patch_w': nrm((PATCH_K, HIDDEN), bf16),
        'patch_b': zeros((1, HIDDEN)),
        'cls_token': nrm((1, HIDDEN)),
        'pos_embed': nrm((TOKENS, HIDDEN)),
        # per-layer weights stacked along a leading LAYERS axis (grid-indexed)
        'ln1_g': ones((LAYERS, 1, HIDDEN)), 'ln1_b': zeros((LAYERS, 1, HIDDEN)),
        'wqkv': nrm((LAYERS, HIDDEN, 3 * HIDDEN), bf16),
        'bqkv': zeros((LAYERS, 1, 3 * HIDDEN)),
        'wo': nrm((LAYERS, HIDDEN, HIDDEN), bf16), 'bo': zeros((LAYERS, 1, HIDDEN)),
        'ln2_g': ones((LAYERS, 1, HIDDEN)), 'ln2_b': zeros((LAYERS, 1, HIDDEN)),
        'w1': nrm((LAYERS, HIDDEN, INTER), bf16), 'b1': zeros((LAYERS, 1, INTER)),
        'w2': nrm((LAYERS, INTER, HIDDEN), bf16), 'b2': zeros((LAYERS, 1, HIDDEN)),
        'final_ln_g': ones((1, HIDDEN)), 'final_ln_b': zeros((1, HIDDEN)),
        'fc_w': nrm((HIDDEN, NUM_CLASSES), bf16),   # nn.Linear(768, num_classes)
        'fc_b': zeros((1, NUM_CLASSES)),
    }


# ------------------------------- forward -------------------------------------

def vit_stylegan_forward(x, params):
    """x: (batch, seq, C, H, W) float32 -> (batch, num_classes) float32."""
    B, S, c, h, w = x.shape
    N = B * S
    xf = x.reshape(N, c, h, w)                              # view(B*S, C, H, W)

    # --- ViT patch embedding: Conv2d(k=s=PATCH) == im2col (JAX) + fused kernel
    nh, nw = h // PATCH, w // PATCH
    patches = xf.reshape(N, c, nh, PATCH, nw, PATCH)
    patches = patches.transpose(0, 2, 4, 1, 3, 5)           # (N, nh, nw, c, p, p)
    patches = patches.reshape(N_BLOCKS, PATCH_ROWS_PER_BLOCK, PATCH_K)
    hidden0 = embed(patches, params)                        # (N_BLOCKS, F*T_PAD, D)
    # TODO(synk): dropout layers are omitted (inference / eval semantics).

    # --- fused encoder + final LN + CLS extraction + fc head (one call)
    logits = encoder(hidden0, params)                       # (N_BLOCKS, F, NC)
    logits = logits.reshape(B, S, NUM_CLASSES)              # per-frame logits
    return logits[:, -1, :]                                 # fc(features[:, -1, :])


# --------------------------------- main ---------------------------------------

if __name__ == "__main__":
    key = jax.random.PRNGKey(0)
    pkey, xkey = jax.random.split(key)
    params = init_params(pkey)
    x = jax.random.normal(xkey, (BATCH, SEQ, C, H, W), dtype=jnp.float32)

    fwd = jax.jit(lambda xx: vit_stylegan_forward(xx, params))
    out = jax.block_until_ready(fwd(x))
    assert out.shape == (BATCH, NUM_CLASSES) and out.dtype == jnp.float32
    assert bool(jnp.all(jnp.isfinite(out)))
    print("KERNEL_OK")
</pallas_src>

<mosaic_0001>
module attributes {stable_mosaic.version = 11 : i64} {
  func.func @_embed_kernel(%arg0: i32, %arg1: memref<1x24x192xf32, #tpu.memory_space<vmem>>, %arg2: memref<192x32xbf16, #tpu.memory_space<vmem>>, %arg3: memref<1x32xf32, #tpu.memory_space<vmem>>, %arg4: memref<1x32xf32, #tpu.memory_space<vmem>>, %arg5: memref<5x32xf32, #tpu.memory_space<vmem>>, %arg6: memref<1x48x32xf32, #tpu.memory_space<vmem>>) attributes {dimension_semantics = [#tpu.dimension_semantics<parallel>], iteration_bounds = array<i64: 1>, scalar_prefetch = 0 : i64, scratch_operands = 0 : i64, tpu.core_type = #tpu.core_type<tc>, window_params = [{transform_indices = @transform_0, window_bounds = array<i64: 1, 24, 192>}, {pipeline_mode = #tpu.pipeline_mode<synchronous>, transform_indices = @transform_1, window_bounds = array<i64: 192, 32>}, {pipeline_mode = #tpu.pipeline_mode<synchronous>, transform_indices = @transform_2, window_bounds = array<i64: 1, 32>}, {pipeline_mode = #tpu.pipeline_mode<synchronous>, transform_indices = @transform_3, window_bounds = array<i64: 1, 32>}, {pipeline_mode = #tpu.pipeline_mode<synchronous>, transform_indices = @transform_4, window_bounds = array<i64: 5, 32>}, {transform_indices = @transform_5, window_bounds = array<i64: 1, 48, 32>}]} {
    %c0 = arith.constant 0 : index
    %c0_0 = arith.constant 0 : index
    %c0_1 = arith.constant 0 : index
    %0 = vector.load %arg1[%c0, %c0_0, %c0_1] : memref<1x24x192xf32, #tpu.memory_space<vmem>>, vector<1x24x192xf32>
    %1 = vector.shape_cast %0 : vector<1x24x192xf32> to vector<24x192xf32>
    %2 = arith.truncf %1 : vector<24x192xf32> to vector<24x192xbf16>
    %c0_2 = arith.constant 0 : index
    %c0_3 = arith.constant 0 : index
    %3 = vector.load %arg2[%c0_2, %c0_3] : memref<192x32xbf16, #tpu.memory_space<vmem>>, vector<192x32xbf16>
    %cst = arith.constant dense<0.000000e+00> : vector<24x32xf32>
    %4 = tpu.matmul %2, %3, %cst {dimension_numbers = #tpu.dot_dimension_numbers<[1], [0], [0], [1], [0, 0, 1, 1], [], []>} : vector<24x192xbf16>, vector<192x32xbf16>, vector<24x32xf32> -> vector<24x32xf32>
    %c0_4 = arith.constant 0 : index
    %c0_5 = arith.constant 0 : index
    %5 = vector.load %arg3[%c0_4, %c0_5] : memref<1x32xf32, #tpu.memory_space<vmem>>, vector<1x32xf32>
    %6 = vector.broadcast %5 : vector<1x32xf32> to vector<24x32xf32>
    %7 = arith.addf %4, %6 : vector<24x32xf32>
    %c0_6 = arith.constant 0 : index
    %c0_7 = arith.constant 0 : index
    %8 = vector.load %arg5[%c0_6, %c0_7] : memref<5x32xf32, #tpu.memory_space<vmem>>, vector<5x32xf32>
    %c0_8 = arith.constant 0 : index
    %c0_9 = arith.constant 0 : index
    %9 = vector.load %arg4[%c0_8, %c0_9] : memref<1x32xf32, #tpu.memory_space<vmem>>, vector<1x32xf32>
    %10 = vector.extract_strided_slice %8 {offsets = [0, 0], sizes = [1, 32], strides = [1, 1]} : vector<5x32xf32> to vector<1x32xf32>
    %11 = arith.addf %9, %10 : vector<1x32xf32>
    %12 = vector.shape_cast %7 : vector<24x32xf32> to vector<6x4x32xf32>
    %13 = vector.extract_strided_slice %8 {offsets = [1, 0], sizes = [4, 32], strides = [1, 1]} : vector<5x32xf32> to vector<4x32xf32>
    %14 = vector.shape_cast %13 : vector<4x32xf32> to vector<1x4x32xf32>
    %15 = vector.broadcast %14 : vector<1x4x32xf32> to vector<6x4x32xf32>
    %16 = arith.addf %12, %15 : vector<6x4x32xf32>
    %17 = vector.shape_cast %11 : vector<1x32xf32> to vector<1x1x32xf32>
    %18 = vector.shape_cast %17 : vector<1x1x32xf32> to vector<1x1x32xf32>
    %19 = vector.broadcast %18 : vector<1x1x32xf32> to vector<6x1x32xf32>
    %cst_10 = arith.constant 0.000000e+00 : f32
    %20 = vector.broadcast %cst_10 : f32 to vector<6x3x32xf32>
    %21 = tpu.concatenate %19, %16, %20 in 1 : vector<6x1x32xf32>, vector<6x4x32xf32>, vector<6x3x32xf32> -> vector<6x8x32xf32>
    %22 = vector.shape_cast %21 : vector<6x8x32xf32> to vector<48x32xf32>
    %c0_11 = arith.constant 0 : index
    %c0_12 = arith.constant 0 : index
    %c0_13 = arith.constant 0 : index
    %23 = vector.load %arg6[%c0_11, %c0_12, %c0_13] : memref<1x48x32xf32, #tpu.memory_space<vmem>>, vector<1x48x32xf32>
    %24 = vector.shape_cast %23 : vector<1x48x32xf32> to vector<48x32xf32>
    %25 = vector.shape_cast %22 : vector<48x32xf32> to vector<1x48x32xf32>
    tpu.vector_store %arg6[%c0_11, %c0_12, %c0_13], %25 {strides = array<i32>} : memref<1x48x32xf32, #tpu.memory_space<vmem>>, vector<1x48x32xf32>,
    return
  }
  func.func @transform_0(%arg0: i32) -> (i32, i32, i32) {
    %c0_i32 = arith.constant 0 : i32
    %c0_i32_0 = arith.constant 0 : i32
    %c0_i32_1 = arith.constant 0 : i32
    return %arg0, %c0_i32, %c0_i32_0 : i32, i32, i32
  }
  func.func @transform_1(%arg0: i32) -> (i32, i32) {
    %c0_i32 = arith.constant 0 : i32
    %c0_i32_0 = arith.constant 0 : i32
    %c0_i32_1 = arith.constant 0 : i32
    return %c0_i32, %c0_i32_0 : i32, i32
  }
  func.func @transform_2(%arg0: i32) -> (i32, i32) {
    %c0_i32 = arith.constant 0 : i32
    %c0_i32_0 = arith.constant 0 : i32
    %c0_i32_1 = arith.constant 0 : i32
    return %c0_i32, %c0_i32_0 : i32, i32
  }
  func.func @transform_3(%arg0: i32) -> (i32, i32) {
    %c0_i32 = arith.constant 0 : i32
    %c0_i32_0 = arith.constant 0 : i32
    %c0_i32_1 = arith.constant 0 : i32
    return %c0_i32, %c0_i32_0 : i32, i32
  }
  func.func @transform_4(%arg0: i32) -> (i32, i32) {
    %c0_i32 = arith.constant 0 : i32
    %c0_i32_0 = arith.constant 0 : i32
    %c0_i32_1 = arith.constant 0 : i32
    return %c0_i32, %c0_i32_0 : i32, i32
  }
  func.func @transform_5(%arg0: i32) -> (i32, i32, i32) {
    %c0_i32 = arith.constant 0 : i32
    %c0_i32_0 = arith.constant 0 : i32
    %c0_i32_1 = arith.constant 0 : i32
    return %arg0, %c0_i32, %c0_i32_0 : i32, i32, i32
  }
}

module attributes {stable_mosaic.version = 11 : i64} {
  func.func @_encoder_kernel(%arg0: i32, %arg1: i32, %arg2: memref<1x48x32xf32, #tpu.memory_space<vmem>>, %arg3: memref<1x1x32xf32, #tpu.memory_space<vmem>>, %arg4: memref<1x1x32xf32, #tpu.memory_space<vmem>>, %arg5: memref<1x32x96xbf16, #tpu.memory_space<vmem>>, %arg6: memref<1x1x96xf32, #tpu.memory_space<vmem>>, %arg7: memref<1x32x32xbf16, #tpu.memory_space<vmem>>, %arg8: memref<1x1x32xf32, #tpu.memory_space<vmem>>, %arg9: memref<1x1x32xf32, #tpu.memory_space<vmem>>, %arg10: memref<1x1x32xf32, #tpu.memory_space<vmem>>, %arg11: memref<1x32x64xbf16, #tpu.memory_space<vmem>>, %arg12: memref<1x1x64xf32, #tpu.memory_space<vmem>>, %arg13: memref<1x64x32xbf16, #tpu.memory_space<vmem>>, %arg14: memref<1x1x32xf32, #tpu.memory_space<vmem>>, %arg15: memref<1x32xf32, #tpu.memory_space<vmem>>, %arg16: memref<1x32xf32, #tpu.memory_space<vmem>>, %arg17: memref<32x5xbf16, #tpu.memory_space<vmem>>, %arg18: memref<1x5xf32, #tpu.memory_space<vmem>>, %arg19: memref<1x6x5xf32, #tpu.memory_space<vmem>>, %arg20: memref<48x32xf32, #tpu.memory_space<vmem>>) attributes {dimension_semantics = [#tpu.dimension_semantics<parallel>, #tpu.dimension_semantics<arbitrary>], iteration_bounds = array<i64: 1, 2>, scalar_prefetch = 0 : i64, scratch_operands = 1 : i64, tpu.core_type = #tpu.core_type<tc>, window_params = [{transform_indices = @transform_0, window_bounds = array<i64: 1, 48, 32>}, {transform_indices = @transform_1, window_bounds = array<i64: 1, 1, 32>}, {transform_indices = @transform_2, window_bounds = array<i64: 1, 1, 32>}, {transform_indices = @transform_3, window_bounds = array<i64: 1, 32, 96>}, {transform_indices = @transform_4, window_bounds = array<i64: 1, 1, 96>}, {transform_indices = @transform_5, window_bounds = array<i64: 1, 32, 32>}, {transform_indices = @transform_6, window_bounds = array<i64: 1, 1, 32>}, {transform_indices = @transform_7, window_bounds = array<i64: 1, 1, 32>}, {transform_indices = @transform_8, window_bounds = array<i64: 1, 1, 32>}, {transform_indices = @transform_9, window_bounds = array<i64: 1, 32, 64>}, {transform_indices = @transform_10, window_bounds = array<i64: 1, 1, 64>}, {transform_indices = @transform_11, window_bounds = array<i64: 1, 64, 32>}, {transform_indices = @transform_12, window_bounds = array<i64: 1, 1, 32>}, {pipeline_mode = #tpu.pipeline_mode<synchronous>, transform_indices = @transform_13, window_bounds = array<i64: 1, 32>}, {pipeline_mode = #tpu.pipeline_mode<synchronous>, transform_indices = @transform_14, window_bounds = array<i64: 1, 32>}, {pipeline_mode = #tpu.pipeline_mode<synchronous>, transform_indices = @transform_15, window_bounds = array<i64: 32, 5>}, {pipeline_mode = #tpu.pipeline_mode<synchronous>, transform_indices = @transform_16, window_bounds = array<i64: 1, 5>}, {transform_indices = @transform_17, window_bounds = array<i64: 1, 6, 5>}]} {
    %c0_i32 = arith.constant 0 : i32
    %0 = arith.cmpi eq, %arg1, %c0_i32 : i32
    %1 = arith.extui %0 : i1 to i32
    %c0_i32_0 = arith.constant 0 : i32
    %2 = arith.cmpi ne, %1, %c0_i32_0 : i32
    scf.if %2 {
      %c0_80 = arith.constant 0 : index
      %c0_81 = arith.constant 0 : index
      %c0_82 = arith.constant 0 : index
      %209 = vector.load %arg2[%c0_80, %c0_81, %c0_82] : memref<1x48x32xf32, #tpu.memory_space<vmem>>, vector<1x48x32xf32>
      %210 = vector.shape_cast %209 : vector<1x48x32xf32> to vector<48x32xf32>
      %c0_83 = arith.constant 0 : index
      %c0_84 = arith.constant 0 : index
      %211 = vector.load %arg20[%c0_83, %c0_84] : memref<48x32xf32, #tpu.memory_space<vmem>>, vector<48x32xf32>
      tpu.vector_store %arg20[%c0_83, %c0_84], %210 {strides = array<i32>} : memref<48x32xf32, #tpu.memory_space<vmem>>, vector<48x32xf32>,
    } else {
    }
    %c0 = arith.constant 0 : index
    %c0_1 = arith.constant 0 : index
    %3 = vector.load %arg20[%c0, %c0_1] : memref<48x32xf32, #tpu.memory_space<vmem>>, vector<48x32xf32>
    %c0_2 = arith.constant 0 : index
    %c0_3 = arith.constant 0 : index
    %c0_4 = arith.constant 0 : index
    %4 = vector.load %arg3[%c0_2, %c0_3, %c0_4] : memref<1x1x32xf32, #tpu.memory_space<vmem>>, vector<1x1x32xf32>
    %5 = vector.shape_cast %4 : vector<1x1x32xf32> to vector<1x32xf32>
    %c0_5 = arith.constant 0 : index
    %c0_6 = arith.constant 0 : index
    %c0_7 = arith.constant 0 : index
    %6 = vector.load %arg4[%c0_5, %c0_6, %c0_7] : memref<1x1x32xf32, #tpu.memory_space<vmem>>, vector<1x1x32xf32>
    %7 = vector.shape_cast %6 : vector<1x1x32xf32> to vector<1x32xf32>
    %cst = arith.constant dense<0.000000e+00> : vector<48xf32>
    %8 = vector.multi_reduction <add>, %3, %cst [1] : vector<48x32xf32> to vector<48xf32>
    %9 = vector.shape_cast %8 : vector<48xf32> to vector<48x1xf32>
    %cst_8 = arith.constant 3.200000e+01 : f32
    %10 = vector.broadcast %cst_8 : f32 to vector<48x1xf32>
    %11 = arith.divf %9, %10 : vector<48x1xf32>
    %12 = vector.broadcast %11 : vector<48x1xf32> to vector<48x32xf32>
    %13 = arith.subf %3, %12 : vector<48x32xf32>
    %14 = arith.mulf %13, %13 : vector<48x32xf32>
    %cst_9 = arith.constant dense<0.000000e+00> : vector<48xf32>
    %15 = vector.multi_reduction <add>, %14, %cst_9 [1] : vector<48x32xf32> to vector<48xf32>
    %16 = vector.shape_cast %15 : vector<48xf32> to vector<48x1xf32>
    %cst_10 = arith.constant 3.200000e+01 : f32
    %17 = vector.broadcast %cst_10 : f32 to vector<48x1xf32>
    %18 = arith.divf %16, %17 : vector<48x1xf32>
    %cst_11 = arith.constant 9.99999996E-13 : f32
    %19 = vector.broadcast %cst_11 : f32 to vector<48x1xf32>
    %20 = arith.addf %18, %19 : vector<48x1xf32>
    %21 = math.rsqrt %20 : vector<48x1xf32>
    %22 = vector.broadcast %21 : vector<48x1xf32> to vector<48x32xf32>
    %23 = arith.mulf %13, %22 : vector<48x32xf32>
    %24 = vector.broadcast %5 : vector<1x32xf32> to vector<48x32xf32>
    %25 = arith.mulf %23, %24 : vector<48x32xf32>
    %26 = vector.broadcast %7 : vector<1x32xf32> to vector<48x32xf32>
    %27 = arith.addf %25, %26 : vector<48x32xf32>
    %28 = arith.truncf %27 : vector<48x32xf32> to vector<48x32xbf16>
    %c0_12 = arith.constant 0 : index
    %c0_13 = arith.constant 0 : index
    %c0_14 = arith.constant 0 : index
    %29 = vector.load %arg5[%c0_12, %c0_13, %c0_14] : memref<1x32x96xbf16, #tpu.memory_space<vmem>>, vector<1x32x96xbf16>
    %30 = vector.shape_cast %29 : vector<1x32x96xbf16> to vector<32x96xbf16>
    %cst_15 = arith.constant dense<0.000000e+00> : vector<48x96xf32>
    %31 = tpu.matmul %28, %30, %cst_15 {dimension_numbers = #tpu.dot_dimension_numbers<[1], [0], [0], [1], [0, 0, 1, 1], [], []>} : vector<48x32xbf16>, vector<32x96xbf16>, vector<48x96xf32> -> vector<48x96xf32>
    %c0_16 = arith.constant 0 : index
    %c0_17 = arith.constant 0 : index
    %c0_18 = arith.constant 0 : index
    %32 = vector.load %arg6[%c0_16, %c0_17, %c0_18] : memref<1x1x96xf32, #tpu.memory_space<vmem>>, vector<1x1x96xf32>
    %33 = vector.shape_cast %32 : vector<1x1x96xf32> to vector<1x96xf32>
    %34 = vector.broadcast %33 : vector<1x96xf32> to vector<48x96xf32>
    %35 = arith.addf %31, %34 : vector<48x96xf32>
    %36 = vector.extract_strided_slice %35 {offsets = [0, 0], sizes = [48, 32], strides = [1, 1]} : vector<48x96xf32> to vector<48x32xf32>
    %37 = vector.shape_cast %36 : vector<48x32xf32> to vector<6x8x32xf32>
    %38 = vector.extract_strided_slice %35 {offsets = [0, 32], sizes = [48, 32], strides = [1, 1]} : vector<48x96xf32> to vector<48x32xf32>
    %39 = vector.shape_cast %38 : vector<48x32xf32> to vector<6x8x32xf32>
    %40 = vector.extract_strided_slice %35 {offsets = [0, 64], sizes = [48, 32], strides = [1, 1]} : vector<48x96xf32> to vector<48x32xf32>
    %41 = vector.shape_cast %40 : vector<48x32xf32> to vector<6x8x32xf32>
    %42 = tpu.iota {dimensions = array<i32: 1>} : vector<1x8xi32>
    %c5_i32 = arith.constant 5 : i32
    %43 = vector.broadcast %c5_i32 : i32 to vector<1x8xi32>
    %44 = arith.cmpi slt, %42, %43 : vector<1x8xi32>
    %cst_19 = arith.constant 0.000000e+00 : f32
    %cst_20 = arith.constant -1.000000e+30 : f32
    %45 = vector.broadcast %cst_19 : f32 to vector<1x8xf32>
    %46 = vector.broadcast %cst_20 : f32 to vector<1x8xf32>
    %47 = arith.select %44, %45, %46 : vector<1x8xi1>, vector<1x8xf32>
    %48 = vector.extract_strided_slice %37 {offsets = [0, 0, 0], sizes = [6, 8, 8], strides = [1, 1, 1]} : vector<6x8x32xf32> to vector<6x8x8xf32>
    %49 = arith.truncf %48 : vector<6x8x8xf32> to vector<6x8x8xbf16>
    %50 = vector.extract_strided_slice %39 {offsets = [0, 0, 0], sizes = [6, 8, 8], strides = [1, 1, 1]} : vector<6x8x32xf32> to vector<6x8x8xf32>
    %51 = arith.truncf %50 : vector<6x8x8xf32> to vector<6x8x8xbf16>
    %52 = vector.extract_strided_slice %41 {offsets = [0, 0, 0], sizes = [6, 8, 8], strides = [1, 1, 1]} : vector<6x8x32xf32> to vector<6x8x8xf32>
    %53 = arith.truncf %52 : vector<6x8x8xf32> to vector<6x8x8xbf16>
    "tpu.trace_start"() <{level = 10 : i32, message = "fqd,fkd->fqk"}> : () -> ()
    %cst_21 = arith.constant dense<0.000000e+00> : vector<6x8x8xf32>
    %54 = tpu.matmul %49, %51, %cst_21 {dimension_numbers = #tpu.dot_dimension_numbers<[2], [2], [1], [1], [0, 0, 0, 1, 1, 1], [0], [0]>} : vector<6x8x8xbf16>, vector<6x8x8xbf16>, vector<6x8x8xf32> -> vector<6x8x8xf32>
    "tpu.trace_stop"() : () -> ()
    %cst_22 = arith.constant 0.353553385 : f32
    %55 = vector.broadcast %cst_22 : f32 to vector<6x8x8xf32>
    %56 = arith.mulf %54, %55 : vector<6x8x8xf32>
    %57 = vector.shape_cast %47 : vector<1x8xf32> to vector<1x1x8xf32>
    %58 = vector.broadcast %57 : vector<1x1x8xf32> to vector<6x8x8xf32>
    %59 = arith.addf %56, %58 : vector<6x8x8xf32>
    %cst_23 = arith.constant dense<0xFF800000> : vector<6x8xf32>
    %60 = vector.multi_reduction <maximumf>, %59, %cst_23 [2] : vector<6x8x8xf32> to vector<6x8xf32>
    %61 = vector.shape_cast %60 : vector<6x8xf32> to vector<6x8x1xf32>
    %62 = vector.broadcast %61 : vector<6x8x1xf32> to vector<6x8x8xf32>
    %63 = arith.subf %59, %62 : vector<6x8x8xf32>
    %64 = math.exp %63 : vector<6x8x8xf32>
    %cst_24 = arith.constant dense<0.000000e+00> : vector<6x8xf32>
    %65 = vector.multi_reduction <add>, %64, %cst_24 [2] : vector<6x8x8xf32> to vector<6x8xf32>
    %66 = vector.shape_cast %65 : vector<6x8xf32> to vector<6x8x1xf32>
    %67 = vector.broadcast %66 : vector<6x8x1xf32> to vector<6x8x8xf32>
    %68 = arith.divf %64, %67 : vector<6x8x8xf32>
    %69 = arith.truncf %68 : vector<6x8x8xf32> to vector<6x8x8xbf16>
    "tpu.trace_start"() <{level = 10 : i32, message = "fqk,fkd->fqd"}> : () -> ()
    %cst_25 = arith.constant dense<0.000000e+00> : vector<6x8x8xf32>
    %70 = tpu.matmul %69, %53, %cst_25 {dimension_numbers = #tpu.dot_dimension_numbers<[2], [1], [1], [2], [0, 0, 0, 1, 1, 2], [0], [0]>} : vector<6x8x8xbf16>, vector<6x8x8xbf16>, vector<6x8x8xf32> -> vector<6x8x8xf32>
    "tpu.trace_stop"() : () -> ()
    %71 = vector.extract_strided_slice %37 {offsets = [0, 0, 8], sizes = [6, 8, 8], strides = [1, 1, 1]} : vector<6x8x32xf32> to vector<6x8x8xf32>
    %72 = arith.truncf %71 : vector<6x8x8xf32> to vector<6x8x8xbf16>
    %73 = vector.extract_strided_slice %39 {offsets = [0, 0, 8], sizes = [6, 8, 8], strides = [1, 1, 1]} : vector<6x8x32xf32> to vector<6x8x8xf32>
    %74 = arith.truncf %73 : vector<6x8x8xf32> to vector<6x8x8xbf16>
    %75 = vector.extract_strided_slice %41 {offsets = [0, 0, 8], sizes = [6, 8, 8], strides = [1, 1, 1]} : vector<6x8x32xf32> to vector<6x8x8xf32>
    %76 = arith.truncf %75 : vector<6x8x8xf32> to vector<6x8x8xbf16>
    "tpu.trace_start"() <{level = 10 : i32, message = "fqd,fkd->fqk"}> : () -> ()
    %cst_26 = arith.constant dense<0.000000e+00> : vector<6x8x8xf32>
    %77 = tpu.matmul %72, %74, %cst_26 {dimension_numbers = #tpu.dot_dimension_numbers<[2], [2], [1], [1], [0, 0, 0, 1, 1, 1], [0], [0]>} : vector<6x8x8xbf16>, vector<6x8x8xbf16>, vector<6x8x8xf32> -> vector<6x8x8xf32>
    "tpu.trace_stop"() : () -> ()
    %cst_27 = arith.constant 0.353553385 : f32
    %78 = vector.broadcast %cst_27 : f32 to vector<6x8x8xf32>
    %79 = arith.mulf %77, %78 : vector<6x8x8xf32>
    %80 = vector.shape_cast %47 : vector<1x8xf32> to vector<1x1x8xf32>
    %81 = vector.broadcast %80 : vector<1x1x8xf32> to vector<6x8x8xf32>
    %82 = arith.addf %79, %81 : vector<6x8x8xf32>
    %cst_28 = arith.constant dense<0xFF800000> : vector<6x8xf32>
    %83 = vector.multi_reduction <maximumf>, %82, %cst_28 [2] : vector<6x8x8xf32> to vector<6x8xf32>
    %84 = vector.shape_cast %83 : vector<6x8xf32> to vector<6x8x1xf32>
    %85 = vector.broadcast %84 : vector<6x8x1xf32> to vector<6x8x8xf32>
    %86 = arith.subf %82, %85 : vector<6x8x8xf32>
    %87 = math.exp %86 : vector<6x8x8xf32>
    %cst_29 = arith.constant dense<0.000000e+00> : vector<6x8xf32>
    %88 = vector.multi_reduction <add>, %87, %cst_29 [2] : vector<6x8x8xf32> to vector<6x8xf32>
    %89 = vector.shape_cast %88 : vector<6x8xf32> to vector<6x8x1xf32>
    %90 = vector.broadcast %89 : vector<6x8x1xf32> to vector<6x8x8xf32>
    %91 = arith.divf %87, %90 : vector<6x8x8xf32>
    %92 = arith.truncf %91 : vector<6x8x8xf32> to vector<6x8x8xbf16>
    "tpu.trace_start"() <{level = 10 : i32, message = "fqk,fkd->fqd"}> : () -> ()
    %cst_30 = arith.constant dense<0.000000e+00> : vector<6x8x8xf32>
    %93 = tpu.matmul %92, %76, %cst_30 {dimension_numbers = #tpu.dot_dimension_numbers<[2], [1], [1], [2], [0, 0, 0, 1, 1, 2], [0], [0]>} : vector<6x8x8xbf16>, vector<6x8x8xbf16>, vector<6x8x8xf32> -> vector<6x8x8xf32>
    "tpu.trace_stop"() : () -> ()
    %94 = vector.extract_strided_slice %37 {offsets = [0, 0, 16], sizes = [6, 8, 8], strides = [1, 1, 1]} : vector<6x8x32xf32> to vector<6x8x8xf32>
    %95 = arith.truncf %94 : vector<6x8x8xf32> to vector<6x8x8xbf16>
    %96 = vector.extract_strided_slice %39 {offsets = [0, 0, 16], sizes = [6, 8, 8], strides = [1, 1, 1]} : vector<6x8x32xf32> to vector<6x8x8xf32>
    %97 = arith.truncf %96 : vector<6x8x8xf32> to vector<6x8x8xbf16>
    %98 = vector.extract_strided_slice %41 {offsets = [0, 0, 16], sizes = [6, 8, 8], strides = [1, 1, 1]} : vector<6x8x32xf32> to vector<6x8x8xf32>
    %99 = arith.truncf %98 : vector<6x8x8xf32> to vector<6x8x8xbf16>
    "tpu.trace_start"() <{level = 10 : i32, message = "fqd,fkd->fqk"}> : () -> ()
    %cst_31 = arith.constant dense<0.000000e+00> : vector<6x8x8xf32>
    %100 = tpu.matmul %95, %97, %cst_31 {dimension_numbers = #tpu.dot_dimension_numbers<[2], [2], [1], [1], [0, 0, 0, 1, 1, 1], [0], [0]>} : vector<6x8x8xbf16>, vector<6x8x8xbf16>, vector<6x8x8xf32> -> vector<6x8x8xf32>
    "tpu.trace_stop"() : () -> ()
    %cst_32 = arith.constant 0.353553385 : f32
    %101 = vector.broadcast %cst_32 : f32 to vector<6x8x8xf32>
    %102 = arith.mulf %100, %101 : vector<6x8x8xf32>
    %103 = vector.shape_cast %47 : vector<1x8xf32> to vector<1x1x8xf32>
    %104 = vector.broadcast %103 : vector<1x1x8xf32> to vector<6x8x8xf32>
    %105 = arith.addf %102, %104 : vector<6x8x8xf32>
    %cst_33 = arith.constant dense<0xFF800000> : vector<6x8xf32>
    %106 = vector.multi_reduction <maximumf>, %105, %cst_33 [2] : vector<6x8x8xf32> to vector<6x8xf32>
    %107 = vector.shape_cast %106 : vector<6x8xf32> to vector<6x8x1xf32>
    %108 = vector.broadcast %107 : vector<6x8x1xf32> to vector<6x8x8xf32>
    %109 = arith.subf %105, %108 : vector<6x8x8xf32>
    %110 = math.exp %109 : vector<6x8x8xf32>
    %cst_34 = arith.constant dense<0.000000e+00> : vector<6x8xf32>
    %111 = vector.multi_reduction <add>, %110, %cst_34 [2] : vector<6x8x8xf32> to vector<6x8xf32>
    %112 = vector.shape_cast %111 : vector<6x8xf32> to vector<6x8x1xf32>
    %113 = vector.broadcast %112 : vector<6x8x1xf32> to vector<6x8x8xf32>
    %114 = arith.divf %110, %113 : vector<6x8x8xf32>
    %115 = arith.truncf %114 : vector<6x8x8xf32> to vector<6x8x8xbf16>
    "tpu.trace_start"() <{level = 10 : i32, message = "fqk,fkd->fqd"}> : () -> ()
    %cst_35 = arith.constant dense<0.000000e+00> : vector<6x8x8xf32>
    %116 = tpu.matmul %115, %99, %cst_35 {dimension_numbers = #tpu.dot_dimension_numbers<[2], [1], [1], [2], [0, 0, 0, 1, 1, 2], [0], [0]>} : vector<6x8x8xbf16>, vector<6x8x8xbf16>, vector<6x8x8xf32> -> vector<6x8x8xf32>
    "tpu.trace_stop"() : () -> ()
    %117 = vector.extract_strided_slice %37 {offsets = [0, 0, 24], sizes = [6, 8, 8], strides = [1, 1, 1]} : vector<6x8x32xf32> to vector<6x8x8xf32>
    %118 = arith.truncf %117 : vector<6x8x8xf32> to vector<6x8x8xbf16>
    %119 = vector.extract_strided_slice %39 {offsets = [0, 0, 24], sizes = [6, 8, 8], strides = [1, 1, 1]} : vector<6x8x32xf32> to vector<6x8x8xf32>
    %120 = arith.truncf %119 : vector<6x8x8xf32> to vector<6x8x8xbf16>
    %121 = vector.extract_strided_slice %41 {offsets = [0, 0, 24], sizes = [6, 8, 8], strides = [1, 1, 1]} : vector<6x8x32xf32> to vector<6x8x8xf32>
    %122 = arith.truncf %121 : vector<6x8x8xf32> to vector<6x8x8xbf16>
    "tpu.trace_start"() <{level = 10 : i32, message = "fqd,fkd->fqk"}> : () -> ()
    %cst_36 = arith.constant dense<0.000000e+00> : vector<6x8x8xf32>
    %123 = tpu.matmul %118, %120, %cst_36 {dimension_numbers = #tpu.dot_dimension_numbers<[2], [2], [1], [1], [0, 0, 0, 1, 1, 1], [0], [0]>} : vector<6x8x8xbf16>, vector<6x8x8xbf16>, vector<6x8x8xf32> -> vector<6x8x8xf32>
    "tpu.trace_stop"() : () -> ()
    %cst_37 = arith.constant 0.353553385 : f32
    %124 = vector.broadcast %cst_37 : f32 to vector<6x8x8xf32>
    %125 = arith.mulf %123, %124 : vector<6x8x8xf32>
    %126 = vector.shape_cast %47 : vector<1x8xf32> to vector<1x1x8xf32>
    %127 = vector.broadcast %126 : vector<1x1x8xf32> to vector<6x8x8xf32>
    %128 = arith.addf %125, %127 : vector<6x8x8xf32>
    %cst_38 = arith.constant dense<0xFF800000> : vector<6x8xf32>
    %129 = vector.multi_reduction <maximumf>, %128, %cst_38 [2] : vector<6x8x8xf32> to vector<6x8xf32>
    %130 = vector.shape_cast %129 : vector<6x8xf32> to vector<6x8x1xf32>
    %131 = vector.broadcast %130 : vector<6x8x1xf32> to vector<6x8x8xf32>
    %132 = arith.subf %128, %131 : vector<6x8x8xf32>
    %133 = math.exp %132 : vector<6x8x8xf32>
    %cst_39 = arith.constant dense<0.000000e+00> : vector<6x8xf32>
    %134 = vector.multi_reduction <add>, %133, %cst_39 [2] : vector<6x8x8xf32> to vector<6x8xf32>
    %135 = vector.shape_cast %134 : vector<6x8xf32> to vector<6x8x1xf32>
    %136 = vector.broadcast %135 : vector<6x8x1xf32> to vector<6x8x8xf32>
    %137 = arith.divf %133, %136 : vector<6x8x8xf32>
    %138 = arith.truncf %137 : vector<6x8x8xf32> to vector<6x8x8xbf16>
    "tpu.trace_start"() <{level = 10 : i32, message = "fqk,fkd->fqd"}> : () -> ()
    %cst_40 = arith.constant dense<0.000000e+00> : vector<6x8x8xf32>
    %139 = tpu.matmul %138, %122, %cst_40 {dimension_numbers = #tpu.dot_dimension_numbers<[2], [1], [1], [2], [0, 0, 0, 1, 1, 2], [0], [0]>} : vector<6x8x8xbf16>, vector<6x8x8xbf16>, vector<6x8x8xf32> -> vector<6x8x8xf32>
    "tpu.trace_stop"() : () -> ()
    %140 = tpu.concatenate %70, %93, %116, %139 in 2 : vector<6x8x8xf32>, vector<6x8x8xf32>, vector<6x8x8xf32>, vector<6x8x8xf32> -> vector<6x8x32xf32>
    %141 = vector.shape_cast %140 : vector<6x8x32xf32> to vector<48x32xf32>
    %142 = arith.truncf %141 : vector<48x32xf32> to vector<48x32xbf16>
    %c0_41 = arith.constant 0 : index
    %c0_42 = arith.constant 0 : index
    %c0_43 = arith.constant 0 : index
    %143 = vector.load %arg7[%c0_41, %c0_42, %c0_43] : memref<1x32x32xbf16, #tpu.memory_space<vmem>>, vector<1x32x32xbf16>
    %144 = vector.shape_cast %143 : vector<1x32x32xbf16> to vector<32x32xbf16>
    %cst_44 = arith.constant dense<0.000000e+00> : vector<48x32xf32>
    %145 = tpu.matmul %142, %144, %cst_44 {dimension_numbers = #tpu.dot_dimension_numbers<[1], [0], [0], [1], [0, 0, 1, 1], [], []>} : vector<48x32xbf16>, vector<32x32xbf16>, vector<48x32xf32> -> vector<48x32xf32>
    %c0_45 = arith.constant 0 : index
    %c0_46 = arith.constant 0 : index
    %c0_47 = arith.constant 0 : index
    %146 = vector.load %arg8[%c0_45, %c0_46, %c0_47] : memref<1x1x32xf32, #tpu.memory_space<vmem>>, vector<1x1x32xf32>
    %147 = vector.shape_cast %146 : vector<1x1x32xf32> to vector<1x32xf32>
    %148 = vector.broadcast %147 : vector<1x32xf32> to vector<48x32xf32>
    %149 = arith.addf %145, %148 : vector<48x32xf32>
    %150 = arith.addf %149, %3 : vector<48x32xf32>
    %c0_48 = arith.constant 0 : index
    %c0_49 = arith.constant 0 : index
    %c0_50 = arith.constant 0 : index
    %151 = vector.load %arg9[%c0_48, %c0_49, %c0_50] : memref<1x1x32xf32, #tpu.memory_space<vmem>>, vector<1x1x32xf32>
    %152 = vector.shape_cast %151 : vector<1x1x32xf32> to vector<1x32xf32>
    %c0_51 = arith.constant 0 : index
    %c0_52 = arith.constant 0 : index
    %c0_53 = arith.constant 0 : index
    %153 = vector.load %arg10[%c0_51, %c0_52, %c0_53] : memref<1x1x32xf32, #tpu.memory_space<vmem>>, vector<1x1x32xf32>
    %154 = vector.shape_cast %153 : vector<1x1x32xf32> to vector<1x32xf32>
    %cst_54 = arith.constant dense<0.000000e+00> : vector<48xf32>
    %155 = vector.multi_reduction <add>, %150, %cst_54 [1] : vector<48x32xf32> to vector<48xf32>
    %156 = vector.shape_cast %155 : vector<48xf32> to vector<48x1xf32>
    %cst_55 = arith.constant 3.200000e+01 : f32
    %157 = vector.broadcast %cst_55 : f32 to vector<48x1xf32>
    %158 = arith.divf %156, %157 : vector<48x1xf32>
    %159 = vector.broadcast %158 : vector<48x1xf32> to vector<48x32xf32>
    %160 = arith.subf %150, %159 : vector<48x32xf32>
    %161 = arith.mulf %160, %160 : vector<48x32xf32>
    %cst_56 = arith.constant dense<0.000000e+00> : vector<48xf32>
    %162 = vector.multi_reduction <add>, %161, %cst_56 [1] : vector<48x32xf32> to vector<48xf32>
    %163 = vector.shape_cast %162 : vector<48xf32> to vector<48x1xf32>
    %cst_57 = arith.constant 3.200000e+01 : f32
    %164 = vector.broadcast %cst_57 : f32 to vector<48x1xf32>
    %165 = arith.divf %163, %164 : vector<48x1xf32>
    %cst_58 = arith.constant 9.99999996E-13 : f32
    %166 = vector.broadcast %cst_58 : f32 to vector<48x1xf32>
    %167 = arith.addf %165, %166 : vector<48x1xf32>
    %168 = math.rsqrt %167 : vector<48x1xf32>
    %169 = vector.broadcast %168 : vector<48x1xf32> to vector<48x32xf32>
    %170 = arith.mulf %160, %169 : vector<48x32xf32>
    %171 = vector.broadcast %152 : vector<1x32xf32> to vector<48x32xf32>
    %172 = arith.mulf %170, %171 : vector<48x32xf32>
    %173 = vector.broadcast %154 : vector<1x32xf32> to vector<48x32xf32>
    %174 = arith.addf %172, %173 : vector<48x32xf32>
    %175 = arith.truncf %174 : vector<48x32xf32> to vector<48x32xbf16>
    %c0_59 = arith.constant 0 : index
    %c0_60 = arith.constant 0 : index
    %c0_61 = arith.constant 0 : index
    %176 = vector.load %arg11[%c0_59, %c0_60, %c0_61] : memref<1x32x64xbf16, #tpu.memory_space<vmem>>, vector<1x32x64xbf16>
    %177 = vector.shape_cast %176 : vector<1x32x64xbf16> to vector<32x64xbf16>
    %cst_62 = arith.constant dense<0.000000e+00> : vector<48x64xf32>
    %178 = tpu.matmul %175, %177, %cst_62 {dimension_numbers = #tpu.dot_dimension_numbers<[1], [0], [0], [1], [0, 0, 1, 1], [], []>} : vector<48x32xbf16>, vector<32x64xbf16>, vector<48x64xf32> -> vector<48x64xf32>
    %c0_63 = arith.constant 0 : index
    %c0_64 = arith.constant 0 : index
    %c0_65 = arith.constant 0 : index
    %179 = vector.load %arg12[%c0_63, %c0_64, %c0_65] : memref<1x1x64xf32, #tpu.memory_space<vmem>>, vector<1x1x64xf32>
    %180 = vector.shape_cast %179 : vector<1x1x64xf32> to vector<1x64xf32>
    %181 = vector.broadcast %180 : vector<1x64xf32> to vector<48x64xf32>
    %182 = arith.addf %178, %181 : vector<48x64xf32>
    %183 = arith.mulf %182, %182 : vector<48x64xf32>
    %184 = arith.mulf %182, %183 : vector<48x64xf32>
    %cst_66 = arith.constant 4.471500e-02 : f32
    %185 = vector.broadcast %cst_66 : f32 to vector<48x64xf32>
    %186 = arith.mulf %185, %184 : vector<48x64xf32>
    %187 = arith.addf %182, %186 : vector<48x64xf32>
    %cst_67 = arith.constant 0.797884583 : f32
    %188 = vector.broadcast %cst_67 : f32 to vector<48x64xf32>
    %189 = arith.mulf %188, %187 : vector<48x64xf32>
    %190 = math.tanh %189 : vector<48x64xf32>
    %cst_68 = arith.constant 1.000000e+00 : f32
    %191 = vector.broadcast %cst_68 : f32 to vector<48x64xf32>
    %192 = arith.addf %191, %190 : vector<48x64xf32>
    %cst_69 = arith.constant 5.000000e-01 : f32
    %193 = vector.broadcast %cst_69 : f32 to vector<48x64xf32>
    %194 = arith.mulf %193, %192 : vector<48x64xf32>
    %195 = arith.mulf %182, %194 : vector<48x64xf32>
    %196 = arith.truncf %195 : vector<48x64xf32> to vector<48x64xbf16>
    %c0_70 = arith.constant 0 : index
    %c0_71 = arith.constant 0 : index
    %c0_72 = arith.constant 0 : index
    %197 = vector.load %arg13[%c0_70, %c0_71, %c0_72] : memref<1x64x32xbf16, #tpu.memory_space<vmem>>, vector<1x64x32xbf16>
    %198 = vector.shape_cast %197 : vector<1x64x32xbf16> to vector<64x32xbf16>
    %cst_73 = arith.constant dense<0.000000e+00> : vector<48x32xf32>
    %199 = tpu.matmul %196, %198, %cst_73 {dimension_numbers = #tpu.dot_dimension_numbers<[1], [0], [0], [1], [0, 0, 1, 1], [], []>} : vector<48x64xbf16>, vector<64x32xbf16>, vector<48x32xf32> -> vector<48x32xf32>
    %c0_74 = arith.constant 0 : index
    %c0_75 = arith.constant 0 : index
    %c0_76 = arith.constant 0 : index
    %200 = vector.load %arg14[%c0_74, %c0_75, %c0_76] : memref<1x1x32xf32, #tpu.memory_space<vmem>>, vector<1x1x32xf32>
    %201 = vector.shape_cast %200 : vector<1x1x32xf32> to vector<1x32xf32>
    %202 = vector.broadcast %201 : vector<1x32xf32> to vector<48x32xf32>
    %203 = arith.addf %199, %202 : vector<48x32xf32>
    %204 = arith.addf %203, %150 : vector<48x32xf32>
    %c0_77 = arith.constant 0 : index
    %c0_78 = arith.constant 0 : index
    %205 = vector.load %arg20[%c0_77, %c0_78] : memref<48x32xf32, #tpu.memory_space<vmem>>, vector<48x32xf32>
    tpu.vector_store %arg20[%c0_77, %c0_78], %204 {strides = array<i32>} : memref<48x32xf32, #tpu.memory_space<vmem>>, vector<48x32xf32>,
    %c1_i32 = arith.constant 1 : i32
    %206 = arith.cmpi eq, %arg1, %c1_i32 : i32
    %207 = arith.extui %206 : i1 to i32
    %c0_i32_79 = arith.constant 0 : i32
    %208 = arith.cmpi ne, %207, %c0_i32_79 : i32
    scf.if %208 {
      %c0_80 = arith.constant 0 : index
      %c0_81 = arith.constant 0 : index
      %209 = tpu.strided_load %arg20[%c0_80, %c0_81] {strides = array<i32: 8, 1>} : memref<48x32xf32, #tpu.memory_space<vmem>>, vector<6x32xf32>
      %c0_82 = arith.constant 0 : index
      %c0_83 = arith.constant 0 : index
      %210 = vector.load %arg15[%c0_82, %c0_83] : memref<1x32xf32, #tpu.memory_space<vmem>>, vector<1x32xf32>
      %c0_84 = arith.constant 0 : index
      %c0_85 = arith.constant 0 : index
      %211 = vector.load %arg16[%c0_84, %c0_85] : memref<1x32xf32, #tpu.memory_space<vmem>>, vector<1x32xf32>
      %cst_86 = arith.constant dense<0.000000e+00> : vector<6xf32>
      %212 = vector.multi_reduction <add>, %209, %cst_86 [1] : vector<6x32xf32> to vector<6xf32>
      %213 = vector.shape_cast %212 : vector<6xf32> to vector<6x1xf32>
      %cst_87 = arith.constant 3.200000e+01 : f32
      %214 = vector.broadcast %cst_87 : f32 to vector<6x1xf32>
      %215 = arith.divf %213, %214 : vector<6x1xf32>
      %216 = vector.broadcast %215 : vector<6x1xf32> to vector<6x32xf32>
      %217 = arith.subf %209, %216 : vector<6x32xf32>
      %218 = arith.mulf %217, %217 : vector<6x32xf32>
      %cst_88 = arith.constant dense<0.000000e+00> : vector<6xf32>
      %219 = vector.multi_reduction <add>, %218, %cst_88 [1] : vector<6x32xf32> to vector<6xf32>
      %220 = vector.shape_cast %219 : vector<6xf32> to vector<6x1xf32>
      %cst_89 = arith.constant 3.200000e+01 : f32
      %221 = vector.broadcast %cst_89 : f32 to vector<6x1xf32>
      %222 = arith.divf %220, %221 : vector<6x1xf32>
      %cst_90 = arith.constant 9.99999996E-13 : f32
      %223 = vector.broadcast %cst_90 : f32 to vector<6x1xf32>
      %224 = arith.addf %222, %223 : vector<6x1xf32>
      %225 = math.rsqrt %224 : vector<6x1xf32>
      %226 = vector.broadcast %225 : vector<6x1xf32> to vector<6x32xf32>
      %227 = arith.mulf %217, %226 : vector<6x32xf32>
      %228 = vector.broadcast %210 : vector<1x32xf32> to vector<6x32xf32>
      %229 = arith.mulf %227, %228 : vector<6x32xf32>
      %230 = vector.broadcast %211 : vector<1x32xf32> to vector<6x32xf32>
      %231 = arith.addf %229, %230 : vector<6x32xf32>
      %232 = arith.truncf %231 : vector<6x32xf32> to vector<6x32xbf16>
      %c0_91 = arith.constant 0 : index
      %c0_92 = arith.constant 0 : index
      %233 = vector.load %arg17[%c0_91, %c0_92] : memref<32x5xbf16, #tpu.memory_space<vmem>>, vector<32x5xbf16>
      %cst_93 = arith.constant dense<0.000000e+00> : vector<6x5xf32>
      %234 = tpu.matmul %232, %233, %cst_93 {dimension_numbers = #tpu.dot_dimension_numbers<[1], [0], [0], [1], [0, 0, 1, 1], [], []>} : vector<6x32xbf16>, vector<32x5xbf16>, vector<6x5xf32> -> vector<6x5xf32>
      %c0_94 = arith.constant 0 : index
      %c0_95 = arith.constant 0 : index
      %235 = vector.load %arg18[%c0_94, %c0_95] : memref<1x5xf32, #tpu.memory_space<vmem>>, vector<1x5xf32>
      %236 = vector.broadcast %235 : vector<1x5xf32> to vector<6x5xf32>
      %237 = arith.addf %234, %236 : vector<6x5xf32>
      %c0_96 = arith.constant 0 : index
      %c0_97 = arith.constant 0 : index
      %c0_98 = arith.constant 0 : index
      %238 = vector.load %arg19[%c0_96, %c0_97, %c0_98] : memref<1x6x5xf32, #tpu.memory_space<vmem>>, vector<1x6x5xf32>
      %239 = vector.shape_cast %238 : vector<1x6x5xf32> to vector<6x5xf32>
      %240 = vector.shape_cast %237 : vector<6x5xf32> to vector<1x6x5xf32>
      tpu.vector_store %arg19[%c0_96, %c0_97, %c0_98], %240 {strides = array<i32>} : memref<1x6x5xf32, #tpu.memory_space<vmem>>, vector<1x6x5xf32>,
    } else {
    }
    return
  }
  func.func @transform_0(%arg0: i32, %arg1: i32) -> (i32, i32, i32) {
    %c0_i32 = arith.constant 0 : i32
    %c0_i32_0 = arith.constant 0 : i32
    %c0_i32_1 = arith.constant 0 : i32
    return %arg0, %c0_i32, %c0_i32_0 : i32, i32, i32
  }
  func.func @transform_1(%arg0: i32, %arg1: i32) -> (i32, i32, i32) {
    %c0_i32 = arith.constant 0 : i32
    %c0_i32_0 = arith.constant 0 : i32
    %c0_i32_1 = arith.constant 0 : i32
    return %arg1, %c0_i32, %c0_i32_0 : i32, i32, i32
  }
  func.func @transform_2(%arg0: i32, %arg1: i32) -> (i32, i32, i32) {
    %c0_i32 = arith.constant 0 : i32
    %c0_i32_0 = arith.constant 0 : i32
    %c0_i32_1 = arith.constant 0 : i32
    return %arg1, %c0_i32, %c0_i32_0 : i32, i32, i32
  }
  func.func @transform_3(%arg0: i32, %arg1: i32) -> (i32, i32, i32) {
    %c0_i32 = arith.constant 0 : i32
    %c0_i32_0 = arith.constant 0 : i32
    %c0_i32_1 = arith.constant 0 : i32
    return %arg1, %c0_i32, %c0_i32_0 : i32, i32, i32
  }
  func.func @transform_4(%arg0: i32, %arg1: i32) -> (i32, i32, i32) {
    %c0_i32 = arith.constant 0 : i32
    %c0_i32_0 = arith.constant 0 : i32
    %c0_i32_1 = arith.constant 0 : i32
    return %arg1, %c0_i32, %c0_i32_0 : i32, i32, i32
  }
  func.func @transform_5(%arg0: i32, %arg1: i32) -> (i32, i32, i32) {
    %c0_i32 = arith.constant 0 : i32
    %c0_i32_0 = arith.constant 0 : i32
    %c0_i32_1 = arith.constant 0 : i32
    return %arg1, %c0_i32, %c0_i32_0 : i32, i32, i32
  }
  func.func @transform_6(%arg0: i32, %arg1: i32) -> (i32, i32, i32) {
    %c0_i32 = arith.constant 0 : i32
    %c0_i32_0 = arith.constant 0 : i32
    %c0_i32_1 = arith.constant 0 : i32
    return %arg1, %c0_i32, %c0_i32_0 : i32, i32, i32
  }
  func.func @transform_7(%arg0: i32, %arg1: i32) -> (i32, i32, i32) {
    %c0_i32 = arith.constant 0 : i32
    %c0_i32_0 = arith.constant 0 : i32
    %c0_i32_1 = arith.constant 0 : i32
    return %arg1, %c0_i32, %c0_i32_0 : i32, i32, i32
  }
  func.func @transform_8(%arg0: i32, %arg1: i32) -> (i32, i32, i32) {
    %c0_i32 = arith.constant 0 : i32
    %c0_i32_0 = arith.constant 0 : i32
    %c0_i32_1 = arith.constant 0 : i32
    return %arg1, %c0_i32, %c0_i32_0 : i32, i32, i32
  }
  func.func @transform_9(%arg0: i32, %arg1: i32) -> (i32, i32, i32) {
    %c0_i32 = arith.constant 0 : i32
    %c0_i32_0 = arith.constant 0 : i32
    %c0_i32_1 = arith.constant 0 : i32
    return %arg1, %c0_i32, %c0_i32_0 : i32, i32, i32
  }
  func.func @transform_10(%arg0: i32, %arg1: i32) -> (i32, i32, i32) {
    %c0_i32 = arith.constant 0 : i32
    %c0_i32_0 = arith.constant 0 : i32
    %c0_i32_1 = arith.constant 0 : i32
    return %arg1, %c0_i32, %c0_i32_0 : i32, i32, i32
  }
  func.func @transform_11(%arg0: i32, %arg1: i32) -> (i32, i32, i32) {
    %c0_i32 = arith.constant 0 : i32
    %c0_i32_0 = arith.constant 0 : i32
    %c0_i32_1 = arith.constant 0 : i32
    return %arg1, %c0_i32, %c0_i32_0 : i32, i32, i32
  }
  func.func @transform_12(%arg0: i32, %arg1: i32) -> (i32, i32, i32) {
    %c0_i32 = arith.constant 0 : i32
    %c0_i32_0 = arith.constant 0 : i32
    %c0_i32_1 = arith.constant 0 : i32
    return %arg1, %c0_i32, %c0_i32_0 : i32, i32, i32
  }
  func.func @transform_13(%arg0: i32, %arg1: i32) -> (i32, i32) {
    %c0_i32 = arith.constant 0 : i32
    %c0_i32_0 = arith.constant 0 : i32
    %c0_i32_1 = arith.constant 0 : i32
    return %c0_i32, %c0_i32_0 : i32, i32
  }
  func.func @transform_14(%arg0: i32, %arg1: i32) -> (i32, i32) {
    %c0_i32 = arith.constant 0 : i32
    %c0_i32_0 = arith.constant 0 : i32
    %c0_i32_1 = arith.constant 0 : i32
    return %c0_i32, %c0_i32_0 : i32, i32
  }
  func.func @transform_15(%arg0: i32, %arg1: i32) -> (i32, i32) {
    %c0_i32 = arith.constant 0 : i32
    %c0_i32_0 = arith.constant 0 : i32
    %c0_i32_1 = arith.constant 0 : i32
    return %c0_i32, %c0_i32_0 : i32, i32
  }
  func.func @transform_16(%arg0: i32, %arg1: i32) -> (i32, i32) {
    %c0_i32 = arith.constant 0 : i32
    %c0_i32_0 = arith.constant 0 : i32
    %c0_i32_1 = arith.constant 0 : i32
    return %c0_i32, %c0_i32_0 : i32, i32
  }
  func.func @transform_17(%arg0: i32, %arg1: i32) -> (i32, i32, i32) {
    %c0_i32 = arith.constant 0 : i32
    %c0_i32_0 = arith.constant 0 : i32
    %c0_i32_1 = arith.constant 0 : i32
    return %arg0, %c0_i32, %c0_i32_0 : i32, i32, i32
  }
}

</mosaic_0001>

<bundles_post_ra>
// kernel: _lambda_.2
= control target key start
LH: loop header
LB: loop body
LE: loop exit
PB: predicated region body
PF: predicated region fallthrough
CT: control target
= control target key end

     0   :  { %v314_v0 = vmov 0   ;;  %vm134_vm0 = vcmask 523264   ;;  %vm203_vm1 = vcmask 1042432   ;;  %vm204_vm2 = vcmask 1046532   ;;  %s468_s1 = inlined_call_operand.vmem [shape: bf16[192,32], index: 1, kind: input, shape index: {}]   ;;  %s469_s0 = inlined_call_operand.vmem [shape: f32[1,24,192], index: 0, kind: input, shape index: {}]   ;;  %s470_s4 = inlined_call_operand.vmem [shape: f32[5,32], index: 4, kind: input, shape index: {}]   ;;  %s471_s2 = inlined_call_operand.vmem [shape: f32[1,32], index: 2, kind: input, shape index: {}]   ;;  %s472_s3 = inlined_call_operand.vmem [shape: f32[1,32], index: 3, kind: input, shape index: {}]   ;;  %s473_s5 = inlined_call_operand.vmem [shape: f32[1,48,32], index: 5, kind: output, shape index: {}]  }
   0x1   :  { %141 = vmatprep.subr.bf16.mxu0 %v314_v0  ;;  %276 = vmatprep.subr.bf16.mxu1 %v314_v0  ;;  %v301_v1 = vld [vmem:[%s468_s1] sm:$0xff]   ;;  %v302_v2 = vld [vmem:[%s468_s1 + $0x8] sm:$0xff]   ;;  %v303_v3 = vld [vmem:[%s468_s1 + $0x10] sm:$0xff]   ;;  %vm235_vm4 = vcmask 1040384   ;;  %vm242_vm5 = vcmask 1044480   ;;  %vm249_vm6 = vcmask 261120  }
   0x2   :  { %142 = vmatpush1.bf16.msra.mxu0 %v301_v1  ;;  %288 = vmatpush1.bf16.msra.mxu1 %v301_v1  ;;  %v304_v4 = vld [vmem:[%s468_s1 + $0x18] sm:$0xff]   ;;  %v22_v5 = vld [vmem:[%s469_s0 + $0x8] sm:$0xff]  ;;  %v305_v10 = vld [vmem:[%s468_s1 + $0x20] sm:$0xff]  }
   0x3   :  { %143 = vmatprep.subr.bf16.mxu0 %v314_v0  ;;  %277 = vmatprep.subr.bf16.mxu1 %v314_v0  ;;  %v24_v6 = vld [vmem:[%s469_s0 + $0x18] sm:$0xff]  ;;  %v26_v7 = vld [vmem:[%s469_s0 + $0x28] sm:$0xff]  ;;  %v307_v12 = vld [vmem:[%s468_s1 + $0x30] sm:$0xff]  }
   0x4   :  { %v28_v8 = vpack.c.bf16 %v24_v6, %v22_v5  ;;  %v30_v9 = vpack.c.bf16 %v26_v7, %v26_v7  ;;  %v306_v11 = vld [vmem:[%s468_s1 + $0x28] sm:$0xff]   ;;  %v308_v13 = vld [vmem:[%s468_s1 + $0x38] sm:$0xff]   ;;  %v309_v14 = vld [vmem:[%s468_s1 + $0x40] sm:$0xff]  }
   0x5   :  { %v310_v15 = vld [vmem:[%s468_s1 + $0x48] sm:$0xff]   ;;  %v311_v16 = vld [vmem:[%s468_s1 + $0x50] sm:$0xff]   ;;  %v312_v17 = vld [vmem:[%s468_s1 + $0x58] sm:$0xff]  }
   0x6   :  { %144 = vmatpush1.bf16.msra.mxu0 %v302_v2  ;;  %289 = vmatpush1.bf16.msra.mxu1 %v302_v2  ;;  %v21_v18 = vld [vmem:[%s469_s0] sm:$0xff]  ;;  %v23_v19 = vld [vmem:[%s469_s0 + $0x10] sm:$0xff]  ;;  %vm205_vm3 = vmor %vm203_vm1, %vm204_vm2 }
   0x7   :  { %145 = vmatprep.subr.bf16.mxu0 %v314_v0  ;;  %278 = vmatprep.subr.bf16.mxu1 %v314_v0  ;;  %v25_v20 = vld [vmem:[%s469_s0 + $0x20] sm:$0xff]  ;;  %v27_v21 = vpack.c.bf16 %v23_v19, %v21_v18 }
   0x8   :  { %273 = vmatprep.mubr.msk.bf16.mxu0 %vm134_vm0, %v28_v8  ;;  %274 = vmatprep.mubr.msk.bf16.mxu1 %vm134_vm0, %v30_v9  ;;  %v29_v22 = vpack.c.bf16 %v25_v20, %v25_v20  ;;  %v189_v23 = vld [vmem:[%s470_s4] sm:$0x1f] }
   0x9   :  { %v202_v24 = vcombine.high %v189_v23, %v189_v23  ;;  %v275_v25 = vrot.slane %v189_v23, 9  ;;  %v260_v27 = vld [vmem:[%s471_s2] ss:$0 sm:$0xff] }
   0xa   :  { %146 = vmatpush1.bf16.msra.mxu0 %v303_v3  ;;  %290 = vmatpush1.bf16.msra.mxu1 %v303_v3  ;;  %v190_v28 = vld [vmem:[%s472_s3] sm:$0x1] }
   0xb   :  { %147 = vmatprep.subr.bf16.mxu0 %v314_v0  ;;  %279 = vmatprep.subr.bf16.mxu1 %v314_v0  ;;  %v208_v26 = vrot.slane %v202_v24, 5  ;;  %v191_v36 = vadd.f32 %v190_v28, %v189_v23 }
   0xd   :  { %v209_v30 = vsel %vm205_vm3, %v275_v25, %v208_v26 }
   0xe   :  { %148 = vmatpush1.bf16.msra.mxu0 %v304_v4  ;;  %291 = vmatpush1.bf16.msra.mxu1 %v304_v4 }
   0xf   :  { %149 = vmatprep.subr.bf16.mxu0 %v314_v0  ;;  %280 = vmatprep.subr.bf16.mxu1 %v314_v0 }
  0x12   :  { %150 = vmatpush1.bf16.msra.mxu0 %v305_v10  ;;  %292 = vmatpush1.bf16.msra.mxu1 %v305_v10 }
  0x13   :  { %151 = vmatprep.subr.bf16.mxu0 %v314_v0  ;;  %281 = vmatprep.subr.bf16.mxu1 %v314_v0 }
  0x16   :  { %152 = vmatpush1.bf16.msra.mxu0 %v306_v11  ;;  %293 = vmatpush1.bf16.msra.mxu1 %v306_v11 }
  0x17   :  { %153 = vmatprep.subr.bf16.mxu0 %v314_v0  ;;  %282 = vmatprep.subr.bf16.mxu1 %v314_v0 }
  0x1a   :  { %154 = vmatpush1.bf16.msra.mxu0 %v307_v12  ;;  %294 = vmatpush1.bf16.msra.mxu1 %v307_v12 }
  0x1b   :  { %155 = vmatprep.subr.bf16.mxu0 %v314_v0  ;;  %283 = vmatprep.subr.bf16.mxu1 %v314_v0 }
  0x1e   :  { %156 = vmatpush1.bf16.msra.mxu0 %v308_v13  ;;  %295 = vmatpush1.bf16.msra.mxu1 %v308_v13 }
  0x1f   :  { %157 = vmatprep.subr.bf16.mxu0 %v314_v0  ;;  %284 = vmatprep.subr.bf16.mxu1 %v314_v0 }
  0x22   :  { %158 = vmatpush1.bf16.msra.mxu0 %v309_v14  ;;  %296 = vmatpush1.bf16.msra.mxu1 %v309_v14 }
  0x23   :  { %159 = vmatprep.subr.bf16.mxu0 %v314_v0  ;;  %285 = vmatprep.subr.bf16.mxu1 %v314_v0 }
  0x26   :  { %160 = vmatpush1.bf16.msra.mxu0 %v310_v15  ;;  %297 = vmatpush1.bf16.msra.mxu1 %v310_v15 }
  0x27   :  { %161 = vmatprep.subr.bf16.mxu0 %v314_v0  ;;  %286 = vmatprep.subr.bf16.mxu1 %v314_v0 }
  0x2a   :  { %162 = vmatpush1.bf16.msra.mxu0 %v311_v16  ;;  %298 = vmatpush1.bf16.msra.mxu1 %v311_v16 }
  0x2b   :  { %163 = vmatprep.subr.bf16.mxu0 %v314_v0  ;;  %287 = vmatprep.subr.bf16.mxu1 %v314_v0 }
  0x2e   :  { %164 = vmatpush1.bf16.msra.mxu0 %v312_v17  ;;  %299 = vmatpush1.bf16.msra.mxu1 %v312_v17 }
  0x31   :  { %174 = vmatmul.mubr.bf16.vlgmr.msra.gmra.mrb[0].mxu0 %v27_v21  ;;  %182 = vmatmul.mubr.bf16.vlgmr.msra.gmra.mrb[0].mxu1 %v29_v22 }
 0x104   :  { %v175_v29 = vpop.f32.mrb[0].mxu0  ;;  %v183_v31 = vpop.f32.mrb[0].mxu1 }
 0x105   :  { %v176_v32 = vadd.f32 %v260_v27, %v175_v29  ;;  %v184_v33 = vadd.f32 %v260_v27, %v183_v31  ;;  %v177_v34 = vpop.f32.mrb[1].mxu0  ;;  %v185_v35 = vpop.f32.mrb[1].mxu1 }
 0x106   :  { %v178_v37 = vpop.f32.mrb[2].mxu0  ;;  %v186_v38 = vpop.f32.mrb[2].mxu1 }
 0x107   :  { %v195_v39 = vcombine.high %v176_v32, %v176_v32  ;;  %v211_v40 = vadd.f32 %v209_v30, %v176_v32  ;;  %v197_v41 = vcombine.high %v184_v33, %v184_v33  ;;  %v215_v42 = vadd.f32 %v209_v30, %v184_v33  ;;  %v180_v43 = vpop.f32.mrb[3].mxu0  ;;  %v187_v44 = vpop.f32.mrb[3].mxu1 }
 0x108   :  { %v179_v45 = vadd.f32 %v260_v27, %v178_v37 }
 0x109   :  { %v212_v46 = vadd.f32 %v209_v30, %v195_v39  ;;  %v223_v47 = vrot.slane %v211_v40, 7  ;;  %v216_v48 = vadd.f32 %v209_v30, %v197_v41  ;;  %v227_v49 = vrot.slane %v215_v42, 7 }
 0x10a   :  { %v196_v50 = vcombine.high %v179_v45, %v179_v45  ;;  %v213_v51 = vadd.f32 %v209_v30, %v179_v45 }
 0x10b   :  { %v224_v52 = vrot.slane %v212_v46, 7  ;;  %v236_v53 = vsel %vm235_vm4, %v191_v36, %v223_v47  ;;  %v228_v54 = vrot.slane %v216_v48, 7  ;;  %v240_v55 = vsel %vm235_vm4, %v191_v36, %v227_v49 }
 0x10c   :  { %v243_v56 = vsel %vm242_vm5, %v236_v53, 0.0  ;;  %v247_v57 = vsel %vm242_vm5, %v240_v55, 0.0  ;;  %v214_v58 = vadd.f32 %v209_v30, %v196_v50  ;;  %v225_v59 = vrot.slane %v213_v51, 7 }
 0x10d   :  { %v237_v60 = vsel %vm235_vm4, %v191_v36, %v224_v52  ;;  %250 = vst.msk [vmem:[%s473_s5] sm:$0xff] %vm249_vm6, %v243_v56  ;;  %v241_v61 = vsel %vm235_vm4, %v191_v36, %v228_v54  ;;  %254 = vst.msk [vmem:[%s473_s5 + $0x20] sm:$0xff] %vm249_vm6, %v247_v57 }
 0x10e   :  { %v244_v62 = vsel %vm242_vm5, %v237_v60, 0.0  ;;  %v248_v63 = vsel %vm242_vm5, %v241_v61, 0.0  ;;  %v226_v0 = vrot.slane %v214_v58, 7  ;;  %v238_v1 = vsel %vm235_vm4, %v191_v36, %v225_v59 }
 0x10f   :  { %251 = vst.msk [vmem:[%s473_s5 + $0x8] sm:$0xff] %vm249_vm6, %v244_v62  ;;  %255 = vst.msk [vmem:[%s473_s5 + $0x28] sm:$0xff] %vm249_vm6, %v248_v63  ;;  %v245_v2 = vsel %vm242_vm5, %v238_v1, 0.0 }
 0x110   :  { %v239_v3 = vsel %vm235_vm4, %v191_v36, %v226_v0  ;;  %252 = vst.msk [vmem:[%s473_s5 + $0x10] sm:$0xff] %vm249_vm6, %v245_v2 }
 0x111   :  { %v246_v4 = vsel %vm242_vm5, %v239_v3, 0.0 }
 0x112   :  { %253 = vst.msk [vmem:[%s473_s5 + $0x18] sm:$0xff] %vm249_vm6, %v246_v4 }

// kernel: _lambda_.3
= control target key start
LH: loop header
LB: loop body
LE: loop exit
PB: predicated region body
PF: predicated region fallthrough
CT: control target
= control target key end

     0   :  { %s5480_s24 = smov 0   ;;  %s5482_s25 = smov 0   ;;  %s6395_s0 = inlined_call_operand.vmem [shape: f32[1,48,32], index: 0, kind: input, shape index: {}]   ;;  %s6396_s1 = inlined_call_operand.vmem [shape: f32[2,1,32], index: 1, kind: input, shape index: {}, may-alias: {1,7}]   ;;  %s6397_s2 = inlined_call_operand.vmem [shape: f32[2,1,32], index: 2, kind: input, shape index: {}, may-alias: {2,6,8,12}]   ;;  %s6398_s3 = inlined_call_operand.vmem [shape: bf16[2,32,96], index: 3, kind: input, shape index: {}]   ;;  %s6399_s4 = inlined_call_operand.vmem [shape: f32[2,1,96], index: 4, kind: input, shape index: {}]   ;;  %s6400_s5 = inlined_call_operand.vmem [shape: bf16[2,32,32], index: 5, kind: input, shape index: {}]   ;;  %s6401_s6 = inlined_call_operand.vmem [shape: f32[2,1,32], index: 6, kind: input, shape index: {}, may-alias: {2,6,8,12}]   ;;  %s6402_s7 = inlined_call_operand.vmem [shape: f32[2,1,32], index: 7, kind: input, shape index: {}, may-alias: {1,7}]   ;;  %s6403_s8 = inlined_call_operand.vmem [shape: f32[2,1,32], index: 8, kind: input, shape index: {}, may-alias: {2,6,8,12}]   ;;  %s6404_s9 = inlined_call_operand.vmem [shape: bf16[2,32,64], index: 9, kind: input, shape index: {}]   ;;  %s6405_s10 = inlined_call_operand.vmem [shape: f32[2,1,64], index: 10, kind: input, shape index: {}]   ;;  %s6406_s11 = inlined_call_operand.vmem [shape: bf16[2,64,32], index: 11, kind: input, shape index: {}]   ;;  %s6407_s12 = inlined_call_operand.vmem [shape: f32[2,1,32], index: 12, kind: input, shape index: {}, may-alias: {2,6,8,12}]   ;;  %s6408_s13 = inlined_call_operand.vmem [shape: f32[1,32], index: 13, kind: input, shape index: {}]   ;;  %s6409_s14 = inlined_call_operand.vmem [shape: f32[1,32], index: 14, kind: input, shape index: {}]   ;;  %s6410_s15 = inlined_call_operand.vmem [shape: bf16[32,5], index: 15, kind: input, shape index: {}]   ;;  %s6411_s16 = inlined_call_operand.vmem [shape: f32[1,5], index: 16, kind: input, shape index: {}]   ;;  %s6412_s17 = inlined_call_operand.vmem [shape: f32[1,6,5], index: 17, kind: output, shape index: {}]  }
   0x1   :  { %6416 = sst [smem:[#allocation6_spill]] %s6395_s0  ;;  %s5484_s26 = smov 0  }
   0x2   :  { %6417 = sst [smem:[#allocation7_spill]] %s6396_s1 }
   0x3   :  { %6418 = sst [smem:[#allocation8_spill]] %s6398_s3 }
   0x4   :  { %6419 = sst [smem:[#allocation9_spill]] %s6400_s5 }
   0x5   :  { %6420 = sst [smem:[#allocation10_spill]] %s6408_s13 }
   0x6   :  { %6421 = sst [smem:[#allocation11_spill]] %s6409_s14 }
   0x7   :  { %6422 = sst [smem:[#allocation12_spill]] %s6411_s16 }
   0x8   :  { %6423 = sst [smem:[#allocation13_spill]] %s6412_s17 }
   0x9 LB: > { %6424 = sst [smem:[#allocation3_spill]] %s5365_s25  ;;  %s36_s27 = sadd.s32 1, %s5365_s25  ;;  %s5369_s26 = sphi %s5484_s26, %s27_s26   ;;  %s5365_s25 = sphi %s5482_s25, %s6442_s25   ;;  %s5361_s24 = sphi %s5480_s24, %s6441_s24  }
   0xa   : > { %6425 = sst [smem:[#allocation4_spill]] %s5369_s26  ;;  %p4520_p0 = scmp.ge.s32.totalorder %s5369_s26, 1 }
   0xb   : > { %p37_p1 = scmp.ge.s32.totalorder %s36_s27, 2  ;;  %p603_p2 = scmp.lt.s32.totalorder %s5369_s26, 3 }
   0xd   : > { %s6444_s27 = smov (%p37_p1, %s36_s27), 0  ;;  %p604_p3 = pnand %p4520_p0, %p603_p2 }
   0xe   : > { %6426 = sst [smem:[#allocation5_spill]] %s6444_s27  ;;  %p703_p4 = scmp.lt.s32.totalorder (!%p604_p3), %s5361_s24, 1 }
   0xf   : > { %607 = sbr.rel (%p604_p3) target bundleno = 5059 (0x13c3), region = 88  ;;  %s6428_s3 = sld [smem:[#allocation8_spill]] (!%p604_p3) }
  0x10   : > { %s6429_s5 = sld [smem:[#allocation9_spill]] (!%p604_p3)  ;;  %p4529_p5 = scmp.ne.s32.totalorder (!%p604_p3), %s5361_s24, 0 }
  0x16   : > { %s5502_s28 = scalar_select %p703_p4, %s5361_s24, 1 }
  0x17   : > { %755 = sbr.rel (%p4529_p5) target bundleno = 33 (0x21), region = 92  ;;  %s6430_s29 = sld [smem:[#allocation6_spill]] (!%p4529_p5)  ;;  %vm762_vm0 = vcmask (!%p4529_p5), 261120  }
  0x18   : > { %s4618_s21 = sshll.u32 %s5502_s28, 4  ;;  %s727_s14 = scalar_lea.vmem %s6402_s7, %s5502_s28 }
  0x19   : > { %s5520_s25 = scalar_lea.vmem %s6428_s3, %s4618_s21  ;;  %s5525_s16 = scalar_lea.vmem %s6429_s5, %s4618_s21 }
  0x1a   : > { %s730_s27 = scalar_lea.vmem %s6403_s8, %s5502_s28  ;;  %s5542_s3 = scalar_lea.vmem %s6404_s9, %s4618_s21 }
  0x1b   : > { %s738_s5 = scalar_lea.vmem %s6405_s10, %s5502_s28  ;;  %s4621_s13 = sshll.u32 %s5502_s28, 5 }
  0x1c   : > { %s5552_s19 = scalar_lea.vmem %s6406_s11, %s4621_s13  ;;  %s746_s22 = scalar_lea.vmem %s6407_s12, %s5502_s28 }
  0x1d   : > { %v756_v0 = vld [vmem:[%s6430_s29] sm:$0xff] (!%p4529_p5)  ;;  %v757_v1 = vld [vmem:[%s6430_s29 + $0x8] sm:$0xff] (!%p4529_p5)  ;;  %v758_v2 = vld [vmem:[%s6430_s29 + $0x10] sm:$0xff] (!%p4529_p5) }
  0x1e   : > { %763 = vst.msk [vmem:[#allocation2] sm:$0xff] %vm762_vm0, %v756_v0  ;;  %764 = vst.msk [vmem:[#allocation2 + $0x8] sm:$0xff] %vm762_vm0, %v757_v1  ;;  %v759_v3 = vld [vmem:[%s6430_s29 + $0x18] sm:$0xff]  ;;  %v760_v4 = vld [vmem:[%s6430_s29 + $0x20] sm:$0xff] }
  0x1f   : > { %765 = vst.msk [vmem:[#allocation2 + $0x10] sm:$0xff] %vm762_vm0, %v758_v2  ;;  %v761_v5 = vld [vmem:[%s6430_s29 + $0x28] sm:$0xff]  ;;  %766 = vst.msk [vmem:[#allocation2 + $0x18] sm:$0xff] %vm762_vm0, %v759_v3 }
  0x20   : > { %767 = vst.msk [vmem:[#allocation2 + $0x20] sm:$0xff] %vm762_vm0, %v760_v4  ;;  %768 = vst.msk [vmem:[#allocation2 + $0x28] sm:$0xff] %vm762_vm0, %v761_v5 }
  0x21 PF: > { %vm777_vm1 = vcmask 261120   ;;  %v5195_v48 = vld [vmem:[%s5520_s25] sm:$0xff]   ;;  %v5371_v49 = vmov 0.0   ;;  %vm5372_vm2 = vmmov 0   ;;  %v5196_v50 = vld [vmem:[%s5520_s25 + $0x8] sm:$0xff]   ;;  %s6431_s17 = sld [smem:[#allocation7_spill]]  ;;  %s6433_s30 = scalar_lea.vmem %s6397_s2, %s5502_s28 }
  0x22   : > { %4743 = vmatprep.subr.bf16.mxu0 %v5371_v49  ;;  %4747 = vmatprep.mubr.msk.bf16.mxu0 %vm5372_vm2, %v5371_v49  ;;  %s6434_s23 = scalar_lea.vmem %s6399_s4, %s5502_s28  ;;  %s5373_s21 = smov 96   ;;  %vm986_vm3 = vcmask 64512   ;;  %vm1367_vm5 = vcmask 1043456   ;;  %vm3745_vm6 = vcmask 130048   ;;  %vm3752_vm7 = vcmask 195584  }
  0x23   : > { %4744 = vmatpush3.bf16.msra.mxu0 %v5195_v48  ;;  %4765 = vmatprep.subr.bf16.mxu1 %v5371_v49  ;;  %s5375_s25 = smov 64   ;;  %s5376_s0 = smov 88   ;;  %vm4149_vm8 = vcmask 523264  }
  0x24   : > { %4745 = vmatprep.subr.bf16.mxu0 %v5371_v49  ;;  %4767 = vmatprep.mubr.msk.bf16.mxu1 %vm5372_vm2, %v5371_v49  ;;  %s5379_s18 = smov 80   ;;  %s5380_s13 = smov 112  }
  0x25   : > { %s5382_s20 = smov 72   ;;  %s5383_s1 = smov 104  }
  0x26   : > { %v771_v7 = vld [vmem:[#allocation2 + $0x10] sm:$0xff]  ;;  %v772_v11 = vld [vmem:[#allocation2 + $0x18] sm:$0xff]  ;;  %p4608_p6 = scmp.ne.s32.totalorder %s5361_s24, 1 }
  0x27   : > { %v784_v10 = vsel %vm777_vm1, %v771_v7, 0.0  ;;  %v773_v12 = vld [vmem:[#allocation2 + $0x20] sm:$0xff]  ;;  %v774_v13 = vld [vmem:[#allocation2 + $0x28] sm:$0xff]  ;;  %v787_v15 = vsel %vm777_vm1, %v772_v11, 0.0  ;;  %4746 = vmatpush3.bf16.msra.mxu0 %v5196_v50  ;;  %s6432_s26 = scalar_lea.vmem %s6431_s17, %s5502_s28  ;;  %s5377_s17 = smov 120   ;;  %vm4237_vm9 = vcmask (!%p4608_p6), 259072  }
  0x28   : > { %v769_v6 = vld [vmem:[#allocation2] sm:$0xff]  ;;  %v770_v8 = vld [vmem:[#allocation2 + $0x8] sm:$0xff]  ;;  %785 = vadd.xlane.f32.xlu1 %v784_v10  ;;  %v790_v16 = vsel %vm777_vm1, %v773_v12, 0.0  ;;  %v793_v17 = vsel %vm777_vm1, %v774_v13, 0.0  ;;  %4759 = vmatprep.subr.bf16.mxu0 %v5371_v49  ;;  %vm5389_vm10 = vmmov (!%p4608_p6), 0   ;;  %vm4332_vm11 = vcmask (!%p4608_p6), 37888  }
  0x29   : > { %v778_v9 = vsel %vm777_vm1, %v769_v6, 0.0  ;;  %v781_v14 = vsel %vm777_vm1, %v770_v8, 0.0 }
  0x2a   : > { %779 = vadd.xlane.f32.xlu0 %v778_v9 }
  0x2c   : > { %788 = vadd.xlane.f32.xlu1 %v787_v15 }
  0x2e   : > { %782 = vadd.xlane.f32.xlu0 %v781_v14 }
  0x30   : > { %794 = vadd.xlane.f32.xlu1 %v793_v17 }
  0x32   : > { %791 = vadd.xlane.f32.xlu0 %v790_v16 }
  0xb5   : > { %v786_v19 = vpop.xlane.xlu1 %785 }
  0xb6   : > { %v799_v21 = vmul.f32 0.03125, %v786_v19 }
  0xb7   : > { %v780_v18 = vpop.xlane.xlu0 %779 }
  0xb8   : > { %v797_v20 = vmul.f32 0.03125, %v780_v18  ;;  %v5585_v23 = vsub.f32 %v771_v7, %v799_v21  ;;  %v4530_v7 = vld [vmem:[%s6432_s26] ss:$0 sm:$0xff]  ;;  %s5378_s26 = smov 56  }
  0xb9   : > { %v789_v25 = vpop.xlane.xlu1 %788 }
  0xba   : > { %v5583_v22 = vsub.f32 %v769_v6, %v797_v20  ;;  %v800_v27 = vmul.f32 0.03125, %v789_v25  ;;  %v811_v29 = vmul.f32 %v5585_v23, %v5585_v23 }
  0xbb   : > { %v783_v24 = vpop.xlane.xlu0 %782 }
  0xbc   : > { %v798_v26 = vmul.f32 0.03125, %v783_v24  ;;  %v809_v28 = vmul.f32 %v5583_v22, %v5583_v22  ;;  %v5593_v31 = vsub.f32 %v772_v11, %v800_v27  ;;  %v821_v35 = vsel %vm777_vm1, %v811_v29, 0.0 }
  0xbd   : > { %v795_v34 = vpop.xlane.xlu1 %794 }
  0xbe   : > { %v5591_v30 = vsub.f32 %v770_v8, %v798_v26  ;;  %v815_v32 = vsel %vm777_vm1, %v809_v28, 0.0  ;;  %v802_v37 = vmul.f32 0.03125, %v795_v34  ;;  %v812_v39 = vmul.f32 %v5593_v31, %v5593_v31  ;;  %v4532_v34 = vld [vmem:[%s6434_s23] ss:$0 sm:$0xff]  ;;  %s5384_s23 = smov 40  }
  0xbf   : > { %816 = vadd.xlane.f32.xlu0 %v815_v32  ;;  %v792_v33 = vpop.xlane.xlu0 %791 }
  0xc0   : > { %v801_v36 = vmul.f32 0.03125, %v792_v33  ;;  %v810_v38 = vmul.f32 %v5591_v30, %v5591_v30  ;;  %v5603_v41 = vsub.f32 %v774_v13, %v802_v37  ;;  %v824_v43 = vsel %vm777_vm1, %v812_v39, 0.0 }
  0xc2   : > { %v5601_v40 = vsub.f32 %v773_v12, %v801_v36  ;;  %v818_v42 = vsel %vm777_vm1, %v810_v38, 0.0  ;;  %v814_v45 = vmul.f32 %v5603_v41, %v5603_v41  ;;  %v4531_v12 = vld [vmem:[%s6433_s30] ss:$0 sm:$0xff]  ;;  %s5381_s30 = smov 48  }
  0xc3   : > { %822 = vadd.xlane.f32.xlu0 %v821_v35  ;;  %819 = vadd.xlane.f32.xlu1 %v818_v42 }
  0xc4   : > { %v813_v44 = vmul.f32 %v5601_v40, %v5601_v40  ;;  %v830_v47 = vsel %vm777_vm1, %v814_v45, 0.0 }
  0xc6   : > { %v827_v46 = vsel %vm777_vm1, %v813_v44, 0.0 }
  0xc7   : > { %825 = vadd.xlane.f32.xlu1 %v824_v43  ;;  %828 = vadd.xlane.f32.xlu0 %v827_v46 }
  0xcb   : > { %831 = vadd.xlane.f32.xlu1 %v830_v47 }
 0x14c   : > { %v817_v51 = vpop.xlane.xlu0 %816 }
 0x14d   : > { %v833_v52 = vmul.f32 0.03125, %v817_v51 }
 0x14f   : > { %v839_v53 = vadd.f32 1e-12, %v833_v52 }
 0x150   : > { %v820_v54 = vpop.xlane.xlu1 %819  ;;  %v823_v55 = vpop.xlane.xlu0 %822 }
 0x151   : > { %5205 = vrsqrt.f32 %v839_v53  ;;  %v834_v56 = vmul.f32 0.03125, %v820_v54  ;;  %v835_v57 = vmul.f32 0.03125, %v823_v55 }
 0x153   : > { %v840_v58 = vadd.f32 1e-12, %v834_v56  ;;  %v841_v59 = vadd.f32 1e-12, %v835_v57 }
 0x154   : > { %v826_v60 = vpop.xlane.xlu1 %825  ;;  %v829_v61 = vpop.xlane.xlu0 %828 }
 0x155   : > { %5207 = vrsqrt.f32 %v840_v58  ;;  %v836_v62 = vmul.f32 0.03125, %v826_v60  ;;  %v837_v0 = vmul.f32 0.03125, %v829_v61 }
 0x156   : > { %5209 = vrsqrt.f32 %v841_v59 }
 0x157   : > { %v842_v63 = vadd.f32 1e-12, %v836_v62  ;;  %v843_v4 = vadd.f32 1e-12, %v837_v0 }
 0x158   : > { %v832_v1 = vpop.xlane.xlu1 %831 }
 0x159   : > { %5211 = vrsqrt.f32 %v842_v63  ;;  %v838_v2 = vmul.f32 0.03125, %v832_v1 }
 0x15b   : > { %v5206_v3 = vpop.eup %5205  ;;  %v844_v5 = vadd.f32 1e-12, %v838_v2 }
 0x15c   : > { %v851_v6 = vmul.f32 %v5206_v3, %v5583_v22 }
 0x15d   : > { %5213 = vrsqrt.f32 %v844_v5 }
 0x15e   : > { %5215 = vrsqrt.f32 %v843_v4  ;;  %v863_v10 = vmul.f32 %v4530_v7, %v851_v6 }
 0x15f   : > { %v5208_v8 = vpop.eup %5207 }
 0x160   : > { %v852_v9 = vmul.f32 %v5208_v8, %v5591_v30  ;;  %v5210_v11 = vpop.eup %5209  ;;  %v875_v15 = vadd.f32 %v4531_v12, %v863_v10  ;;  %v973_v8 = vlaneseq }
 0x161   : > { %v853_v17 = vmul.f32 %v5210_v11, %v5585_v23  ;;  %v5374_v11 = vmov -1e+30  }
 0x162   : > { %v864_v13 = vmul.f32 %v4530_v7, %v852_v9  ;;  %v974_v9 = vand.u32 127, %v973_v8 }
 0x163   : > { %v5212_v14 = vpop.eup %5211  ;;  %v865_v22 = vmul.f32 %v4530_v7, %v853_v17 }
 0x164   : > { %v876_v16 = vadd.f32 %v4531_v12, %v864_v13  ;;  %v854_v18 = vmul.f32 %v5212_v14, %v5593_v31  ;;  %vm975_vm4 = vcmp.lt.s32.totalorder %v974_v9, 5 }
 0x165   : > { %v877_v27 = vadd.f32 %v4531_v12, %v865_v22 }
 0x166   : > { %v881_v19 = vpack.c.bf16 %v876_v16, %v875_v15  ;;  %v866_v20 = vmul.f32 %v4530_v7, %v854_v18 }
 0x167   : > { %v5214_v21 = vpop.eup %5213 }
 0x168   : > { %4748 = vmatmul.mubr.msk.bf16.vlgmr.msra.gmra.mrb[0].mxu0 %vm777_vm1, %v881_v19  ;;  %v5216_v24 = vpop.eup %5215  ;;  %v878_v25 = vadd.f32 %v4531_v12, %v866_v20  ;;  %v856_v26 = vmul.f32 %v5214_v21, %v5603_v41 }
 0x169   : > { %4751 = vmatprep.mubr.msk.bf16.mxu0 %vm5372_vm2, %v5371_v49  ;;  %v855_v28 = vmul.f32 %v5216_v24, %v5601_v40 }
 0x16a   : > { %v882_v23 = vpack.c.bf16 %v878_v25, %v877_v27  ;;  %v868_v29 = vmul.f32 %v4530_v7, %v856_v26 }
 0x16b   : > { %v867_v30 = vmul.f32 %v4530_v7, %v855_v28 }
 0x16c   : > { %v880_v31 = vadd.f32 %v4531_v12, %v868_v29 }
 0x16d   : > { %v879_v32 = vadd.f32 %v4531_v12, %v867_v30  ;;  %v5707_v12 = vsel %vm975_vm4, 0.0, %v5374_v11 }
 0x16f   : > { %v883_v33 = vpack.c.bf16 %v880_v31, %v879_v32 }
 0x170   : > { %4752 = vmatmul.mubr.msk.bf16.gmra.mrb[4].mxu0 %vm777_vm1, %v882_v23 }
 0x171   : > { %4755 = vmatprep.mubr.msk.bf16.mxu0 %vm5372_vm2, %v5371_v49 }
 0x178   : > { %4756 = vmatmul.mubr.msk.bf16.gmra.mrb[8].mxu0 %vm777_vm1, %v883_v33 }
 0x179   : > { %4761 = vmatprep.mubr.msk.bf16.mxu0 %vm5372_vm2, %v5371_v49 }
 0x23b   : > { %v950_v35 = vpop.f32.mrb[0].mxu0 }
 0x23c   : > { %v951_v36 = vadd.f32 %v4532_v34, %v950_v35  ;;  %v4749_v37 = vpop.f32.mrb[1].mxu0 }
 0x23d   : > { %v953_v38 = vpop.f32.mrb[2].mxu0 }
 0x23e   : > { %v5653_v39 = vpack.c.bf16 %v951_v36, %v951_v36  ;;  %v954_v40 = vadd.f32 %v4532_v34, %v953_v38  ;;  %v4750_v41 = vpop.f32.mrb[3].mxu0 }
 0x240   : > { %v5655_v42 = vpack.c.bf16 %v954_v40, %v954_v40  ;;  %984 = vrot.lane.b32.xlu0 %v5653_v39, %s5373_s21 }
 0x242   : > { %1034 = vrot.lane.b32.xlu1 %v5655_v42, %s5373_s21 }
 0x243   : > { %v958_v43 = vpop.f32.mrb[4].mxu0 }
 0x244   : > { %v959_v44 = vadd.f32 %v4532_v34, %v958_v43  ;;  %v4753_v45 = vpop.f32.mrb[5].mxu0 }
 0x245   : > { %v961_v46 = vpop.f32.mrb[6].mxu0 }
 0x246   : > { %v5659_v47 = vpack.c.bf16 %v959_v44, %v959_v44  ;;  %v962_v48 = vadd.f32 %v4532_v34, %v961_v46  ;;  %v4754_v50 = vpop.f32.mrb[7].mxu0 }
 0x248   : > { %1083 = vrot.lane.b32.xlu1 %v5659_v47, %s5373_s21  ;;  %v5662_v51 = vpack.c.bf16 %v962_v48, %v962_v48 }
 0x24b   : > { %v966_v52 = vpop.f32.mrb[8].mxu0 }
 0x24c   : > { %v967_v53 = vadd.f32 %v4532_v34, %v966_v52  ;;  %1132 = vrot.lane.b32.xlu1 %v5662_v51, %s5373_s21  ;;  %v4757_v54 = vpop.f32.mrb[9].mxu0 }
 0x24d   : > { %v969_v55 = vpop.f32.mrb[10].mxu0 }
 0x24e   : > { %v5665_v56 = vpack.c.bf16 %v967_v53, %v967_v53  ;;  %v970_v57 = vadd.f32 %v4532_v34, %v969_v55  ;;  %v4758_v58 = vpop.f32.mrb[11].mxu0 }
 0x250   : > { %v5667_v59 = vpack.c.bf16 %v970_v57, %v970_v57  ;;  %1181 = vrot.lane.b32.xlu0 %v5665_v56, %s5373_s21 }
 0x252   : > { %1230 = vrot.lane.b32.xlu1 %v5667_v59, %s5373_s21  ;;  %s5385_s21 = smov 16  }
 0x2b2   : > { %v985_v60 = vpop.permute.xlu0 %984 }
 0x2b3   : > { %v991_v61 = vsel %vm986_vm3, %v985_v60, 0 }
 0x2b4   : > { %v1035_v62 = vpop.permute.xlu1 %1034  ;;  %4760 = vmatpush3.bf16.xpose.msra.mxu0 %v991_v61 }
 0x2b5   : > { %v1040_v63 = vsel %vm986_vm3, %v1035_v62, 0  ;;  %4777 = vmatprep.subr.bf16.mxu0 %v5371_v49 }
 0x2b6   : > { %4766 = vmatpush3.bf16.xpose.msra.mxu1 %v1040_v63 }
 0x2b7   : > { %4771 = vmatprep.subr.bf16.mxu1 %v5371_v49 }
 0x2ba   : > { %v1084_v0 = vpop.permute.xlu1 %1083 }
 0x2bb   : > { %4762 = vmatmul.mubr.msk.bf16.vlgmr.msra.gmra.mrb[12].mxu0 %vm986_vm3, %v5653_v39  ;;  %v1089_v1 = vsel %vm986_vm3, %v1084_v0, 0 }
 0x2bc   : > { %4779 = vmatprep.mubr.msk.bf16.mxu0 %vm5372_vm2, %v5371_v49 }
 0x2bd   : > { %4768 = vmatmul.mubr.msk.bf16.vlgmr.msra.gmra.mrb[0].mxu1 %vm986_vm3, %v5655_v42 }
 0x2be   : > { %4772 = vmatpush3.bf16.xpose.msra.mxu1 %v1089_v1  ;;  %v1133_v2 = vpop.permute.xlu1 %1132  ;;  %4773 = vmatprep.mubr.msk.bf16.mxu1 %vm5372_vm2, %v5371_v49 }
 0x2bf   : > { %v1138_v3 = vsel %vm986_vm3, %v1133_v2, 0  ;;  %4783 = vmatprep.subr.bf16.mxu1 %v5371_v49 }
 0x2c0   : > { %4778 = vmatpush3.bf16.xpose.msra.mxu0 %v1138_v3 }
 0x2c1   : > { %4789 = vmatprep.subr.bf16.mxu0 %v5371_v49 }
 0x2c2   : > { %v1182_v4 = vpop.permute.xlu0 %1181 }
 0x2c3   : > { %v1187_v6 = vsel %vm986_vm3, %v1182_v4, 0 }
 0x2c4   : > { %v1231_v5 = vpop.permute.xlu1 %1230 }
 0x2c5   : > { %4774 = vmatmul.mubr.msk.bf16.vlgmr.msra.gmra.mrb[4].mxu1 %vm986_vm3, %v5659_v47  ;;  %v1236_v7 = vsel %vm986_vm3, %v1231_v5, 0 }
 0x2c6   : > { %4784 = vmatpush3.bf16.xpose.msra.mxu1 %v1187_v6  ;;  %4785 = vmatprep.mubr.msk.bf16.mxu1 %vm5372_vm2, %v5371_v49 }
 0x2c7   : > { %4780 = vmatmul.mubr.msk.bf16.vlgmr.msra.gmra.mrb[16].mxu0 %vm986_vm3, %v5662_v51  ;;  %4795 = vmatprep.subr.bf16.mxu1 %v5371_v49 }
 0x2c8   : > { %4790 = vmatpush3.bf16.xpose.msra.mxu0 %v1236_v7  ;;  %4791 = vmatprep.mubr.msk.bf16.mxu0 %vm5372_vm2, %v5371_v49 }
 0x2c9   : > { %4801 = vmatprep.subr.bf16.mxu0 %v5371_v49 }
 0x2cd   : > { %4786 = vmatmul.mubr.msk.bf16.vlgmr.msra.gmra.mrb[8].mxu1 %vm986_vm3, %v5665_v56 }
 0x2ce   : > { %4797 = vmatprep.mubr.msk.bf16.mxu1 %vm5372_vm2, %v5371_v49 }
 0x2cf   : > { %4792 = vmatmul.mubr.msk.bf16.vlgmr.msra.gmra.mrb[20].mxu0 %vm986_vm3, %v5667_v59 }
 0x2d0   : > { %4803 = vmatprep.mubr.msk.bf16.mxu0 %vm5372_vm2, %v5371_v49 }
 0x38e   : > { %v1027_v10 = vpop.f32.mrb[12].mxu0 }
 0x38f   : > { %v1278_v13 = vmul.f32 0.35355338, %v1027_v10  ;;  %v4763_v14 = vpop.f32.mrb[13].mxu0 }
 0x390   : > { %v1030_v15 = vpop.f32.mrb[14].mxu0  ;;  %v1076_v16 = vpop.f32.mrb[0].mxu1 }
 0x391   : > { %v1279_v17 = vmul.f32 0.35355338, %v1076_v16  ;;  %v4764_v18 = vpop.f32.mrb[15].mxu0  ;;  %v4769_v19 = vpop.f32.mrb[1].mxu1  ;;  %v1284_v20 = vadd.f32 %v1278_v13, %v5707_v12 }
 0x392   : > { %v1079_v21 = vpop.f32.mrb[2].mxu1 }
 0x393   : > { %v4770_v22 = vpop.f32.mrb[3].mxu1  ;;  %v1290_v24 = vsel %vm986_vm3, %v1284_v20, -inf  ;;  %v1285_v25 = vadd.f32 %v1279_v17, %v5707_v12 }
 0x394   : > { %1291 = vmax.xlane.f32.xlu0 %v1290_v24 }
 0x395   : > { %v1293_v26 = vsel %vm986_vm3, %v1285_v25, -inf }
 0x396   : > { %1294 = vmax.xlane.f32.xlu1 %v1293_v26 }
 0x398   : > { %v1125_v27 = vpop.f32.mrb[4].mxu1 }
 0x399   : > { %v1280_v28 = vmul.f32 0.35355338, %v1125_v27  ;;  %v4775_v23 = vpop.f32.mrb[5].mxu1 }
 0x39a   : > { %v1128_v29 = vpop.f32.mrb[6].mxu1  ;;  %v1174_v30 = vpop.f32.mrb[16].mxu0 }
 0x39b   : > { %v1281_v31 = vmul.f32 0.35355338, %v1174_v30  ;;  %v4776_v32 = vpop.f32.mrb[7].mxu1  ;;  %v4781_v33 = vpop.f32.mrb[17].mxu0  ;;  %v1286_v34 = vadd.f32 %v1280_v28, %v5707_v12 }
 0x39c   : > { %v1177_v35 = vpop.f32.mrb[18].mxu0 }
 0x39d   : > { %v4782_v36 = vpop.f32.mrb[19].mxu0  ;;  %v1296_v37 = vsel %vm986_vm3, %v1286_v34, -inf  ;;  %v1287_v38 = vadd.f32 %v1281_v31, %v5707_v12 }
 0x39e   : > { %1297 = vmax.xlane.f32.xlu0 %v1296_v37 }
 0x39f   : > { %v1299_v44 = vsel %vm986_vm3, %v1287_v38, -inf }
 0x3a0   : > { %v1223_v40 = vpop.f32.mrb[8].mxu1 }
 0x3a1   : > { %v1282_v41 = vmul.f32 0.35355338, %v1223_v40  ;;  %v4787_v43 = vpop.f32.mrb[9].mxu1 }
 0x3a2   : > { %1300 = vmax.xlane.f32.xlu0 %v1299_v44  ;;  %v1226_v45 = vpop.f32.mrb[10].mxu1  ;;  %v1272_v46 = vpop.f32.mrb[20].mxu0 }
 0x3a3   : > { %v4788_v48 = vpop.f32.mrb[11].mxu1  ;;  %v4793_v50 = vpop.f32.mrb[21].mxu0  ;;  %v1288_v52 = vadd.f32 %v1282_v41, %v5707_v12  ;;  %v1283_v57 = vmul.f32 0.35355338, %v1272_v46 }
 0x3a4   : > { %v1275_v53 = vpop.f32.mrb[22].mxu0 }
 0x3a5   : > { %v4794_v54 = vpop.f32.mrb[23].mxu0  ;;  %v1302_v55 = vsel %vm986_vm3, %v1288_v52, -inf  ;;  %v1289_v58 = vadd.f32 %v1283_v57, %v5707_v12 }
 0x3a6   : > { %1303 = vmax.xlane.f32.xlu0 %v1302_v55 }
 0x3a7   : > { %1411 = vrot.lane.b32.xlu1 %v5655_v42, %s5375_s25  ;;  %v1305_v60 = vsel %vm986_vm3, %v1289_v58, -inf }
 0x3ab   : > { %1459 = vrot.lane.b32.xlu1 %v5659_v47, %s5375_s25 }
 0x3af   : > { %1507 = vrot.lane.b32.xlu1 %v5662_v51, %s5375_s25 }
 0x3bc   : > { %1362 = vrot.lane.b32.xlu0 %v5653_v39, %s5375_s25 }
 0x3d3   : > { %1306 = vmax.xlane.f32.xlu1 %v1305_v60 }
 0x421   : > { %v1292_v61 = vpop.xlane.xlu0 %1291 }
 0x422   : > { %v1308_v62 = vsub.f32 %v1284_v20, %v1292_v61 }
 0x423   : > { %v1295_v63 = vpop.xlane.xlu1 %1294 }
 0x424   : > { %v1314_v0 = vmul.f32 1.442695, %v1308_v62  ;;  %v1309_v1 = vsub.f32 %v1285_v25, %v1295_v63 }
 0x426   : > { %5217 = vpow2.f32 %v1314_v0  ;;  %v1316_v2 = vmul.f32 1.442695, %v1309_v1 }
 0x427   : > { %v1412_v3 = vpop.permute.xlu1 %1411 }
 0x428   : > { %5219 = vpow2.f32 %v1316_v2  ;;  %v1417_v4 = vsel %vm1367_vm5, %v1412_v3, 0 }
 0x429   : > { %4802 = vmatpush3.bf16.msra.mxu0 %v1417_v4 }
 0x42a   : > { %4813 = vmatprep.subr.bf16.mxu0 %v5371_v49 }
 0x42b   : > { %v1298_v5 = vpop.xlane.xlu0 %1297  ;;  %v1460_v28 = vpop.permute.xlu1 %1459 }
 0x42c   : > { %v1310_v6 = vsub.f32 %v1286_v34, %v1298_v5  ;;  %v1465_v44 = vsel %vm1367_vm5, %v1460_v28, 0 }
 0x42e   : > { %v1318_v7 = vmul.f32 1.442695, %v1310_v6 }
 0x42f   : > { %v1301_v8 = vpop.xlane.xlu0 %1300  ;;  %v1508_v23 = vpop.permute.xlu1 %1507 }
 0x430   : > { %v5218_v9 = vpop.eup %5217  ;;  %5221 = vpow2.f32 %v1318_v7  ;;  %v1311_v19 = vsub.f32 %v1287_v38, %v1301_v8  ;;  %v1513_v46 = vsel %vm1367_vm5, %v1508_v23, 0 }
 0x431   : > { %v1326_v10 = vsel %vm986_vm3, %v5218_v9, 0.0 }
 0x432   : > { %v5220_v11 = vpop.eup %5219  ;;  %1327 = vadd.xlane.f32.xlu0 %v1326_v10  ;;  %v1320_v20 = vmul.f32 1.442695, %v1311_v19 }
 0x433   : > { %v1304_v13 = vpop.xlane.xlu0 %1303  ;;  %v1329_v14 = vsel %vm986_vm3, %v5220_v11, 0.0 }
 0x434   : > { %1330 = vadd.xlane.f32.xlu1 %v1329_v14  ;;  %5223 = vpow2.f32 %v1320_v20  ;;  %v1312_v21 = vsub.f32 %v1288_v52, %v1304_v13 }
 0x436   : > { %v1322_v22 = vmul.f32 1.442695, %v1312_v21 }
 0x437   : > { %v1363_v15 = vpop.permute.xlu0 %1362 }
 0x438   : > { %v1369_v16 = vsel %vm1367_vm5, %v1363_v15, 0  ;;  %5225 = vpow2.f32 %v1322_v22 }
 0x439   : > { %4796 = vmatpush3.bf16.msra.mxu1 %v1369_v16 }
 0x43a   : > { %v5734_v17 = vpop.eup %5221  ;;  %4807 = vmatprep.subr.bf16.mxu1 %v5371_v49 }
 0x43b   : > { %v1332_v18 = vsel %vm986_vm3, %v5734_v17, 0.0 }
 0x43c   : > { %1333 = vadd.xlane.f32.xlu0 %v1332_v18 }
 0x43e   : > { %v5743_v24 = vpop.eup %5223 }
 0x43f   : > { %v1335_v25 = vsel %vm986_vm3, %v5743_v24, 0.0 }
 0x442   : > { %v5747_v26 = vpop.eup %5225 }
 0x443   : > { %v1338_v27 = vsel %vm986_vm3, %v5747_v26, 0.0 }
 0x445   : > { %1603 = vrot.lane.b32.xlu1 %v5667_v59, %s5375_s25 }
 0x452   : > { %1555 = vrot.lane.b32.xlu0 %v5665_v56, %s5375_s25  ;;  %s5386_s25 = smov 8  }
 0x460   : > { %v1307_v29 = vpop.xlane.xlu1 %1306 }
 0x461   : > { %v1313_v30 = vsub.f32 %v1289_v58, %v1307_v29 }
 0x463   : > { %v1324_v31 = vmul.f32 1.442695, %v1313_v30 }
 0x465   : > { %5227 = vpow2.f32 %v1324_v31 }
 0x469   : > { %1336 = vadd.xlane.f32.xlu1 %v1335_v25 }
 0x46f   : > { %v5757_v32 = vpop.eup %5227 }
 0x470   : > { %v1341_v33 = vsel %vm986_vm3, %v5757_v32, 0.0 }
 0x471   : > { %1339 = vadd.xlane.f32.xlu0 %v1338_v27 }
 0x47a   : > { %1703 = vrot.lane.b32.xlu1 %v5655_v42, %s5376_s0 }
 0x487   : > { %1653 = vrot.lane.b32.xlu0 %v5653_v39, %s5376_s0 }
 0x48b   : > { %1651 = vrot.lane.b32.xlu0 %v5653_v39, %s5377_s17 }
 0x48f   : > { %1753 = vrot.lane.b32.xlu0 %v5659_v47, %s5376_s0 }
 0x493   : > { %1751 = vrot.lane.b32.xlu0 %v5659_v47, %s5377_s17 }
 0x497   : > { %1853 = vrot.lane.b32.xlu0 %v5665_v56, %s5376_s0 }
 0x49b   : > { %1851 = vrot.lane.b32.xlu0 %v5665_v56, %s5377_s17 }
 0x49e   : > { %1342 = vadd.xlane.f32.xlu1 %v1341_v33 }
 0x4af   : > { %1701 = vrot.lane.b32.xlu1 %v5655_v42, %s5377_s17 }
 0x4b3   : > { %1803 = vrot.lane.b32.xlu1 %v5662_v51, %s5376_s0 }
 0x4b7   : > { %1801 = vrot.lane.b32.xlu1 %v5662_v51, %s5377_s17 }
 0x4bb   : > { %1903 = vrot.lane.b32.xlu1 %v5667_v59, %s5376_s0  ;;  %s5387_s0 = smov 24  }
 0x4bf   : > { %1901 = vrot.lane.b32.xlu1 %v5667_v59, %s5377_s17  ;;  %v1328_v34 = vpop.xlane.xlu0 %1327 }
 0x4c0   : > { %5229 = vrcp.f32 %v1328_v34 }
 0x4c1   : > { %v1331_v35 = vpop.xlane.xlu1 %1330 }
 0x4c2   : > { %5231 = vrcp.f32 %v1331_v35 }
 0x4c5   : > { %v1604_v55 = vpop.permute.xlu1 %1603 }
 0x4c6   : > { %v1609_v0 = vsel %vm1367_vm5, %v1604_v55, 0 }
 0x4c9   : > { %v1334_v36 = vpop.xlane.xlu0 %1333 }
 0x4ca   : > { %v5230_v37 = vpop.eup %5229  ;;  %5233 = vrcp.f32 %v1334_v36 }
 0x4cb   : > { %v1345_v38 = vmul.f32 %v5230_v37, %v5218_v9 }
 0x4cc   : > { %v5232_v40 = vpop.eup %5231 }
 0x4cd   : > { %v1356_v41 = vpack.c.bf16 %v1345_v38, %v1345_v38  ;;  %v1347_v43 = vmul.f32 %v5232_v40, %v5220_v11  ;;  %v1556_v52 = vpop.permute.xlu0 %1555 }
 0x4ce   : > { %v1561_v54 = vsel %vm1367_vm5, %v1556_v52, 0 }
 0x4cf   : > { %4798 = vmatmul.mubr.msk.bf16.vlgmr.msra.gmra.mrb[12].mxu1 %vm986_vm3, %v1356_v41  ;;  %v1357_v45 = vpack.c.bf16 %v1347_v43, %v1347_v43 }
 0x4d0   : > { %4808 = vmatpush3.bf16.msra.mxu1 %v1465_v44  ;;  %4809 = vmatprep.mubr.msk.bf16.mxu1 %vm5372_vm2, %v5371_v49 }
 0x4d1   : > { %4804 = vmatmul.mubr.msk.bf16.vlgmr.msra.gmra.mrb[24].mxu0 %vm986_vm3, %v1357_v45  ;;  %4819 = vmatprep.subr.bf16.mxu1 %v5371_v49 }
 0x4d2   : > { %4814 = vmatpush3.bf16.msra.mxu0 %v1513_v46  ;;  %4815 = vmatprep.mubr.msk.bf16.mxu0 %vm5372_vm2, %v5371_v49 }
 0x4d3   : > { %4825 = vmatprep.subr.bf16.mxu0 %v5371_v49 }
 0x4d4   : > { %v5234_v48 = vpop.eup %5233 }
 0x4d5   : > { %v1349_v50 = vmul.f32 %v5234_v48, %v5734_v17 }
 0x4d7   : > { %v1358_v53 = vpack.c.bf16 %v1349_v50, %v1349_v50 }
 0x4d9   : > { %4810 = vmatmul.mubr.msk.bf16.vlgmr.msra.gmra.mrb[16].mxu1 %vm986_vm3, %v1358_v53 }
 0x4da   : > { %4820 = vmatpush3.bf16.msra.mxu1 %v1561_v54  ;;  %4821 = vmatprep.mubr.msk.bf16.mxu1 %vm5372_vm2, %v5371_v49 }
 0x4db   : > { %4831 = vmatprep.subr.bf16.mxu1 %v5371_v49 }
 0x4f6   : > { %v1337_v57 = vpop.xlane.xlu1 %1336 }
 0x4f7   : > { %5235 = vrcp.f32 %v1337_v57 }
 0x4fa   : > { %v1704_v13 = vpop.permute.xlu1 %1703 }
 0x4fb   : > { %v1709_v19 = vsel %vm986_vm3, %v1704_v13, 0 }
 0x4fe   : > { %v1340_v58 = vpop.xlane.xlu0 %1339 }
 0x4ff   : > { %5237 = vrcp.f32 %v1340_v58 }
 0x501   : > { %v5236_v60 = vpop.eup %5235 }
 0x502   : > { %v1351_v61 = vmul.f32 %v5236_v60, %v5743_v24  ;;  %v1654_v62 = vpop.permute.xlu0 %1653 }
 0x503   : > { %v1659_v5 = vsel %vm986_vm3, %v1654_v62, 0 }
 0x504   : > { %v1359_v63 = vpack.c.bf16 %v1351_v61, %v1351_v61 }
 0x506   : > { %4816 = vmatmul.mubr.msk.bf16.vlgmr.msra.gmra.mrb[28].mxu0 %vm986_vm3, %v1359_v63  ;;  %v1652_v2 = vpop.permute.xlu0 %1651 }
 0x507   : > { %4826 = vmatpush3.bf16.msra.mxu0 %v1609_v0  ;;  %4827 = vmatprep.mubr.msk.bf16.mxu0 %vm5372_vm2, %v5371_v49 }
 0x508   : > { %4837 = vmatprep.subr.bf16.mxu0 %v5371_v49 }
 0x509   : > { %v5238_v1 = vpop.eup %5237 }
 0x50a   : > { %v1353_v3 = vmul.f32 %v5238_v1, %v5747_v26  ;;  %v1754_v6 = vpop.permute.xlu0 %1753 }
 0x50b   : > { %v1759_v8 = vsel %vm986_vm3, %v1754_v6, 0 }
 0x50c   : > { %v1360_v4 = vpack.c.bf16 %v1353_v3, %v1353_v3 }
 0x50e   : > { %4822 = vmatmul.mubr.msk.bf16.vlgmr.msra.gmra.mrb[20].mxu1 %vm986_vm3, %v1360_v4  ;;  %v1752_v7 = vpop.permute.xlu0 %1751 }
 0x50f   : > { %4832 = vmatpush3.bf16.xpose.msra.mxu1 %v1659_v5  ;;  %4833 = vmatprep.mubr.msk.bf16.mxu1 %vm5372_vm2, %v5371_v49 }
 0x510   : > { %4843 = vmatprep.subr.bf16.mxu1 %v5371_v49 }
 0x512   : > { %v1854_v9 = vpop.permute.xlu0 %1853 }
 0x513   : > { %v1859_v10 = vsel %vm986_vm3, %v1854_v9, 0 }
 0x516   : > { %4834 = vmatmul.mubr.msk.bf16.vlgmr.msra.gmra.mrb[24].mxu1 %vm986_vm3, %v1652_v2  ;;  %v1852_v11 = vpop.permute.xlu0 %1851 }
 0x517   : > { %4844 = vmatpush3.bf16.xpose.msra.mxu1 %v1759_v8  ;;  %4845 = vmatprep.mubr.msk.bf16.mxu1 %vm5372_vm2, %v5371_v49 }
 0x518   : > { %4855 = vmatprep.subr.bf16.mxu1 %v5371_v49 }
 0x51e   : > { %4846 = vmatmul.mubr.msk.bf16.vlgmr.msra.gmra.mrb[28].mxu1 %vm986_vm3, %v1752_v7 }
 0x51f   : > { %4856 = vmatpush3.bf16.xpose.msra.mxu1 %v1859_v10  ;;  %4857 = vmatprep.mubr.msk.bf16.mxu1 %vm5372_vm2, %v5371_v49 }
 0x520   : > { %4867 = vmatprep.subr.bf16.mxu1 %v5371_v49 }
 0x526   : > { %4858 = vmatmul.mubr.msk.bf16.vlgmr.msra.gmra.mrb[32].mxu1 %vm986_vm3, %v1852_v11 }
 0x527   : > { %4869 = vmatprep.mubr.msk.bf16.mxu1 %vm5372_vm2, %v5371_v49 }
 0x52b   : > { %v1343_v14 = vpop.xlane.xlu1 %1342 }
 0x52c   : > { %5239 = vrcp.f32 %v1343_v14 }
 0x52f   : > { %v1702_v16 = vpop.permute.xlu1 %1701 }
 0x533   : > { %v1804_v20 = vpop.permute.xlu1 %1803 }
 0x534   : > { %v1809_v22 = vsel %vm986_vm3, %v1804_v20, 0 }
 0x536   : > { %v5240_v15 = vpop.eup %5239 }
 0x537   : > { %v1355_v17 = vmul.f32 %v5240_v15, %v5757_v32  ;;  %v1802_v21 = vpop.permute.xlu1 %1801 }
 0x539   : > { %v1361_v18 = vpack.c.bf16 %v1355_v17, %v1355_v17 }
 0x53b   : > { %4828 = vmatmul.mubr.msk.bf16.vlgmr.msra.gmra.mrb[32].mxu0 %vm986_vm3, %v1361_v18  ;;  %v1904_v24 = vpop.permute.xlu1 %1903 }
 0x53c   : > { %4838 = vmatpush3.bf16.xpose.msra.mxu0 %v1709_v19  ;;  %4839 = vmatprep.mubr.msk.bf16.mxu0 %vm5372_vm2, %v5371_v49  ;;  %v1909_v25 = vsel %vm986_vm3, %v1904_v24, 0 }
 0x53d   : > { %4849 = vmatprep.subr.bf16.mxu0 %v5371_v49 }
 0x53f   : > { %v1902_v26 = vpop.permute.xlu1 %1901 }
 0x543   : > { %4840 = vmatmul.mubr.msk.bf16.vlgmr.msra.gmra.mrb[36].mxu0 %vm986_vm3, %v1702_v16 }
 0x544   : > { %4850 = vmatpush3.bf16.xpose.msra.mxu0 %v1809_v22  ;;  %4851 = vmatprep.mubr.msk.bf16.mxu0 %vm5372_vm2, %v5371_v49 }
 0x545   : > { %4861 = vmatprep.subr.bf16.mxu0 %v5371_v49 }
 0x54b   : > { %4852 = vmatmul.mubr.msk.bf16.vlgmr.msra.gmra.mrb[40].mxu0 %vm986_vm3, %v1802_v21 }
 0x54c   : > { %4862 = vmatpush3.bf16.xpose.msra.mxu0 %v1909_v25  ;;  %4863 = vmatprep.mubr.msk.bf16.mxu0 %vm5372_vm2, %v5371_v49 }
 0x54d   : > { %4873 = vmatprep.subr.bf16.mxu0 %v5371_v49 }
 0x553   : > { %4864 = vmatmul.mubr.msk.bf16.vlgmr.msra.gmra.mrb[44].mxu0 %vm986_vm3, %v1902_v26 }
 0x554   : > { %4875 = vmatprep.mubr.msk.bf16.mxu0 %vm5372_vm2, %v5371_v49 }
 0x5a2   : > { %v5827_v27 = vpop.f32.mrb[12].mxu1 }
 0x5a3   : > { %v4799_v28 = vpop.f32.mrb[13].mxu1 }
 0x5a4   : > { %v1408_v23 = vpop.f32.mrb[14].mxu1  ;;  %v5829_v29 = vpop.f32.mrb[24].mxu0 }
 0x5a5   : > { %v4800_v30 = vpop.f32.mrb[15].mxu1  ;;  %v4805_v31 = vpop.f32.mrb[25].mxu0 }
 0x5a6   : > { %v1456_v32 = vpop.f32.mrb[26].mxu0 }
 0x5a7   : > { %v4806_v33 = vpop.f32.mrb[27].mxu0 }
 0x5ac   : > { %v5831_v34 = vpop.f32.mrb[16].mxu1 }
 0x5ad   : > { %v4811_v35 = vpop.f32.mrb[17].mxu1 }
 0x5ae   : > { %v1504_v36 = vpop.f32.mrb[18].mxu1 }
 0x5af   : > { %v4812_v37 = vpop.f32.mrb[19].mxu1 }
 0x5d9   : > { %v5833_v38 = vpop.f32.mrb[28].mxu0 }
 0x5da   : > { %v4817_v40 = vpop.f32.mrb[29].mxu0 }
 0x5db   : > { %v1552_v41 = vpop.f32.mrb[30].mxu0 }
 0x5dc   : > { %v4818_v43 = vpop.f32.mrb[31].mxu0 }
 0x5e1   : > { %v5835_v44 = vpop.f32.mrb[20].mxu1 }
 0x5e2   : > { %v4823_v45 = vpop.f32.mrb[21].mxu1 }
 0x5e3   : > { %v1600_v46 = vpop.f32.mrb[22].mxu1 }
 0x5e4   : > { %v4824_v48 = vpop.f32.mrb[23].mxu1 }
 0x5e9   : > { %v1695_v50 = vpop.f32.mrb[24].mxu1 }
 0x5ea   : > { %v1951_v52 = vmul.f32 0.35355338, %v1695_v50  ;;  %v4835_v53 = vpop.f32.mrb[25].mxu1 }
 0x5eb   : > { %v1698_v54 = vpop.f32.mrb[26].mxu1 }
 0x5ec   : > { %v4836_v55 = vpop.f32.mrb[27].mxu1  ;;  %v1957_v57 = vadd.f32 %v1951_v52, %v5707_v12 }
 0x5ee   : > { %v1963_v58 = vsel %vm986_vm3, %v1957_v57, -inf }
 0x5ef   : > { %1964 = vmax.xlane.f32.xlu0 %v1963_v58 }
 0x5f1   : > { %v1795_v60 = vpop.f32.mrb[28].mxu1 }
 0x5f2   : > { %v1953_v61 = vmul.f32 0.35355338, %v1795_v60  ;;  %v4847_v62 = vpop.f32.mrb[29].mxu1 }
 0x5f3   : > { %v1798_v63 = vpop.f32.mrb[30].mxu1 }
 0x5f4   : > { %v4848_v0 = vpop.f32.mrb[31].mxu1  ;;  %v1959_v1 = vadd.f32 %v1953_v61, %v5707_v12 }
 0x5f6   : > { %v1969_v2 = vsel %vm986_vm3, %v1959_v1, -inf }
 0x5f7   : > { %1970 = vmax.xlane.f32.xlu0 %v1969_v2 }
 0x5f9   : > { %v1895_v3 = vpop.f32.mrb[32].mxu1 }
 0x5fa   : > { %v4859_v4 = vpop.f32.mrb[33].mxu1  ;;  %v1955_v20 = vmul.f32 0.35355338, %v1895_v3 }
 0x5fb   : > { %v1898_v5 = vpop.f32.mrb[34].mxu1 }
 0x5fc   : > { %v4860_v6 = vpop.f32.mrb[35].mxu1  ;;  %v1961_v23 = vadd.f32 %v1955_v20, %v5707_v12 }
 0x5fe   : > { %v1975_v32 = vsel %vm986_vm3, %v1961_v23, -inf }
 0x60e   : > { %v5841_v7 = vpop.f32.mrb[32].mxu0 }
 0x60f   : > { %v4829_v8 = vpop.f32.mrb[33].mxu0 }
 0x610   : > { %v1648_v9 = vpop.f32.mrb[34].mxu0 }
 0x611   : > { %v4830_v10 = vpop.f32.mrb[35].mxu0 }
 0x616   : > { %v1745_v11 = vpop.f32.mrb[36].mxu0 }
 0x617   : > { %v1952_v13 = vmul.f32 0.35355338, %v1745_v11  ;;  %v4841_v14 = vpop.f32.mrb[37].mxu0 }
 0x618   : > { %v1748_v15 = vpop.f32.mrb[38].mxu0 }
 0x619   : > { %v4842_v16 = vpop.f32.mrb[39].mxu0  ;;  %v1958_v17 = vadd.f32 %v1952_v13, %v5707_v12 }
 0x61b   : > { %v1966_v18 = vsel %vm986_vm3, %v1958_v17, -inf }
 0x61c   : > { %1967 = vmax.xlane.f32.xlu1 %v1966_v18 }
 0x61e   : > { %v1845_v19 = vpop.f32.mrb[40].mxu0 }
 0x61f   : > { %v1954_v21 = vmul.f32 0.35355338, %v1845_v19  ;;  %v4853_v22 = vpop.f32.mrb[41].mxu0 }
 0x620   : > { %v1848_v24 = vpop.f32.mrb[42].mxu0 }
 0x621   : > { %v4854_v25 = vpop.f32.mrb[43].mxu0  ;;  %v1960_v26 = vadd.f32 %v1954_v21, %v5707_v12 }
 0x623   : > { %v1972_v28 = vsel %vm986_vm3, %v1960_v26, -inf }
 0x624   : > { %1973 = vmax.xlane.f32.xlu0 %v1972_v28 }
 0x626   : > { %v1945_v30 = vpop.f32.mrb[44].mxu0 }
 0x627   : > { %v4865_v31 = vpop.f32.mrb[45].mxu0  ;;  %v1956_v36 = vmul.f32 0.35355338, %v1945_v30 }
 0x628   : > { %v1948_v33 = vpop.f32.mrb[46].mxu0  ;;  %1976 = vmax.xlane.f32.xlu0 %v1975_v32 }
 0x629   : > { %v4866_v35 = vpop.f32.mrb[47].mxu0  ;;  %v1962_v37 = vadd.f32 %v1956_v36, %v5707_v12 }
 0x62b   : > { %v1978_v40 = vsel %vm986_vm3, %v1962_v37, -inf }
 0x62d   : > { %2083 = vrot.lane.b32.xlu1 %v5655_v42, %s5378_s26 }
 0x631   : > { %2131 = vrot.lane.b32.xlu1 %v5659_v47, %s5378_s26 }
 0x635   : > { %2179 = vrot.lane.b32.xlu1 %v5662_v51, %s5378_s26 }
 0x63e   : > { %2035 = vrot.lane.b32.xlu0 %v5653_v39, %s5378_s26 }
 0x659   : > { %1979 = vmax.xlane.f32.xlu1 %v1978_v40 }
 0x67c   : > { %v1965_v41 = vpop.xlane.xlu0 %1964 }
 0x67d   : > { %v1981_v43 = vsub.f32 %v1957_v57, %v1965_v41 }
 0x67f   : > { %v1987_v45 = vmul.f32 1.442695, %v1981_v43 }
 0x681   : > { %5241 = vpow2.f32 %v1987_v45 }
 0x684   : > { %v1971_v46 = vpop.xlane.xlu0 %1970 }
 0x685   : > { %v1983_v48 = vsub.f32 %v1959_v1, %v1971_v46 }
 0x687   : > { %v1991_v50 = vmul.f32 1.442695, %v1983_v48 }
 0x689   : > { %5243 = vpow2.f32 %v1991_v50 }
 0x68b   : > { %v5242_v52 = vpop.eup %5241 }
 0x68c   : > { %v1999_v53 = vsel %vm986_vm3, %v5242_v52, 0.0 }
 0x68d   : > { %2000 = vadd.xlane.f32.xlu0 %v1999_v53 }
 0x693   : > { %v5860_v54 = vpop.eup %5243 }
 0x694   : > { %v2005_v55 = vsel %vm986_vm3, %v5860_v54, 0.0 }
 0x695   : > { %2006 = vadd.xlane.f32.xlu0 %v2005_v55 }
 0x6a9   : > { %v1968_v58 = vpop.xlane.xlu1 %1967 }
 0x6aa   : > { %v1982_v60 = vsub.f32 %v1958_v17, %v1968_v58 }
 0x6ab   : > { %2227 = vrot.lane.b32.xlu0 %v5665_v56, %s5378_s26 }
 0x6ac   : > { %v1989_v57 = vmul.f32 1.442695, %v1982_v60 }
 0x6ad   : > { %v2084_v61 = vpop.permute.xlu1 %2083 }
 0x6ae   : > { %5245 = vpow2.f32 %v1989_v57  ;;  %v2089_v62 = vsel %vm1367_vm5, %v2084_v61, 0 }
 0x6af   : > { %4874 = vmatpush3.bf16.msra.mxu0 %v2089_v62 }
 0x6b0   : > { %4885 = vmatprep.subr.bf16.mxu0 %v5371_v49 }
 0x6b1   : > { %v1974_v63 = vpop.xlane.xlu0 %1973  ;;  %v2132_v15 = vpop.permute.xlu1 %2131 }
 0x6b2   : > { %v1984_v10 = vsub.f32 %v1960_v26, %v1974_v63 }
 0x6b4   : > { %v1993_v11 = vmul.f32 1.442695, %v1984_v10 }
 0x6b5   : > { %v1977_v0 = vpop.xlane.xlu0 %1976  ;;  %v2180_v16 = vpop.permute.xlu1 %2179 }
 0x6b6   : > { %v1985_v1 = vsub.f32 %v1961_v23, %v1977_v0  ;;  %v2137_v23 = vsel %vm1367_vm5, %v2132_v15, 0  ;;  %v2185_v43 = vsel %vm1367_vm5, %v2180_v16, 0 }
 0x6b8   : > { %v5868_v2 = vpop.eup %5245  ;;  %v1995_v3 = vmul.f32 1.442695, %v1985_v1 }
 0x6b9   : > { %v2036_v4 = vpop.permute.xlu0 %2035  ;;  %v2002_v5 = vsel %vm986_vm3, %v5868_v2, 0.0 }
 0x6ba   : > { %v2041_v6 = vsel %vm1367_vm5, %v2036_v4, 0  ;;  %2003 = vadd.xlane.f32.xlu1 %v2002_v5  ;;  %5247 = vpow2.f32 %v1995_v3 }
 0x6bb   : > { %4868 = vmatpush3.bf16.msra.mxu1 %v2041_v6  ;;  %5249 = vpow2.f32 %v1993_v11 }
 0x6bc   : > { %4879 = vmatprep.subr.bf16.mxu1 %v5371_v49 }
 0x6c4   : > { %v5874_v8 = vpop.eup %5247 }
 0x6c5   : > { %v2011_v9 = vsel %vm986_vm3, %v5874_v8, 0.0  ;;  %v5886_v13 = vpop.eup %5249 }
 0x6c6   : > { %v2008_v14 = vsel %vm986_vm3, %v5886_v13, 0.0 }
 0x6ca   : > { %2012 = vadd.xlane.f32.xlu0 %v2011_v9 }
 0x6cb   : > { %2275 = vrot.lane.b32.xlu1 %v5667_v59, %s5378_s26  ;;  %s6435_s26 = scalar_lea.vmem %s6401_s6, %s5502_s28 }
 0x6e0   : > { %2325 = vrot.lane.b32.xlu0 %v5653_v39, %s5379_s18 }
 0x6e4   : > { %2323 = vrot.lane.b32.xlu0 %v5653_v39, %s5380_s13 }
 0x6e6   : > { %v1980_v17 = vpop.xlane.xlu1 %1979 }
 0x6e7   : > { %v1986_v18 = vsub.f32 %v1962_v37, %v1980_v17 }
 0x6e8   : > { %2425 = vrot.lane.b32.xlu0 %v5659_v47, %s5379_s18 }
 0x6e9   : > { %v1997_v19 = vmul.f32 1.442695, %v1986_v18 }
 0x6eb   : > { %5251 = vpow2.f32 %v1997_v19 }
 0x6ec   : > { %2423 = vrot.lane.b32.xlu0 %v5659_v47, %s5380_s13 }
 0x6ef   : > { %2009 = vadd.xlane.f32.xlu1 %v2008_v14 }
 0x6f0   : > { %2525 = vrot.lane.b32.xlu0 %v5665_v56, %s5379_s18 }
 0x6f4   : > { %2523 = vrot.lane.b32.xlu0 %v5665_v56, %s5380_s13 }
 0x6f5   : > { %v5898_v21 = vpop.eup %5251 }
 0x6f6   : > { %v2014_v24 = vsel %vm986_vm3, %v5898_v21, 0.0 }
 0x700   : > { %2375 = vrot.lane.b32.xlu1 %v5655_v42, %s5379_s18 }
 0x71a   : > { %v2001_v20 = vpop.xlane.xlu0 %2000 }
 0x71b   : > { %5253 = vrcp.f32 %v2001_v20 }
 0x722   : > { %v2007_v22 = vpop.xlane.xlu0 %2006 }
 0x723   : > { %5255 = vrcp.f32 %v2007_v22 }
 0x724   : > { %2015 = vadd.xlane.f32.xlu1 %v2014_v24 }
 0x725   : > { %v5254_v25 = vpop.eup %5253 }
 0x726   : > { %v2018_v26 = vmul.f32 %v5254_v25, %v5242_v52  ;;  %v2228_v32 = vpop.permute.xlu0 %2227 }
 0x727   : > { %v2233_v35 = vsel %vm1367_vm5, %v2228_v32, 0 }
 0x728   : > { %v2029_v28 = vpack.c.bf16 %v2018_v26, %v2018_v26 }
 0x72a   : > { %4870 = vmatmul.mubr.msk.bf16.vlgmr.msra.gmra.mrb[36].mxu1 %vm986_vm3, %v2029_v28 }
 0x72b   : > { %4880 = vmatpush3.bf16.msra.mxu1 %v2137_v23  ;;  %4881 = vmatprep.mubr.msk.bf16.mxu1 %vm5372_vm2, %v5371_v49 }
 0x72c   : > { %4891 = vmatprep.subr.bf16.mxu1 %v5371_v49 }
 0x72d   : > { %v5256_v30 = vpop.eup %5255 }
 0x72e   : > { %v2022_v31 = vmul.f32 %v5256_v30, %v5860_v54 }
 0x730   : > { %v2031_v33 = vpack.c.bf16 %v2022_v31, %v2022_v31 }
 0x732   : > { %4882 = vmatmul.mubr.msk.bf16.vlgmr.msra.gmra.mrb[40].mxu1 %vm986_vm3, %v2031_v33 }
 0x733   : > { %4892 = vmatpush3.bf16.msra.mxu1 %v2233_v35  ;;  %4893 = vmatprep.mubr.msk.bf16.mxu1 %vm5372_vm2, %v5371_v49 }
 0x734   : > { %4903 = vmatprep.subr.bf16.mxu1 %v5371_v49 }
 0x735   : > { %2373 = vrot.lane.b32.xlu1 %v5655_v42, %s5380_s13 }
 0x739   : > { %2475 = vrot.lane.b32.xlu1 %v5662_v51, %s5379_s18 }
 0x73d   : > { %2473 = vrot.lane.b32.xlu1 %v5662_v51, %s5380_s13 }
 0x741   : > { %2575 = vrot.lane.b32.xlu1 %v5667_v59, %s5379_s18  ;;  %s6438_s18 = sld [smem:[#allocation12_spill]] (!%p4608_p6) }
 0x745   : > { %2573 = vrot.lane.b32.xlu1 %v5667_v59, %s5380_s13 }
 0x747   : > { %v2004_v36 = vpop.xlane.xlu1 %2003 }
 0x748   : > { %5257 = vrcp.f32 %v2004_v36 }
 0x74b   : > { %v2276_v62 = vpop.permute.xlu1 %2275 }
 0x74c   : > { %v2281_v4 = vsel %vm1367_vm5, %v2276_v62, 0 }
 0x752   : > { %v5258_v37 = vpop.eup %5257 }
 0x753   : > { %v2020_v40 = vmul.f32 %v5258_v37, %v5868_v2 }
 0x755   : > { %v2030_v41 = vpack.c.bf16 %v2020_v40, %v2020_v40 }
 0x757   : > { %4876 = vmatmul.mubr.msk.bf16.vlgmr.msra.gmra.mrb[48].mxu0 %vm986_vm3, %v2030_v41  ;;  %v2013_v45 = vpop.xlane.xlu0 %2012 }
 0x758   : > { %4886 = vmatpush3.bf16.msra.mxu0 %v2185_v43  ;;  %5259 = vrcp.f32 %v2013_v45  ;;  %4887 = vmatprep.mubr.msk.bf16.mxu0 %vm5372_vm2, %v5371_v49 }
 0x759   : > { %4897 = vmatprep.subr.bf16.mxu0 %v5371_v49 }
 0x75b   : > { %v2326_v46 = vpop.permute.xlu0 %2325 }
 0x75c   : > { %v2331_v54 = vsel %vm986_vm3, %v2326_v46, 0 }
 0x75f   : > { %v2324_v50 = vpop.permute.xlu0 %2323 }
 0x762   : > { %v5260_v48 = vpop.eup %5259 }
 0x763   : > { %v2026_v52 = vmul.f32 %v5260_v48, %v5874_v8  ;;  %v2426_v55 = vpop.permute.xlu0 %2425 }
 0x764   : > { %v2431_v60 = vsel %vm986_vm3, %v2426_v55, 0 }
 0x765   : > { %v2033_v53 = vpack.c.bf16 %v2026_v52, %v2026_v52 }
 0x767   : > { %4894 = vmatmul.mubr.msk.bf16.vlgmr.msra.gmra.mrb[44].mxu1 %vm986_vm3, %v2033_v53  ;;  %v2424_v58 = vpop.permute.xlu0 %2423 }
 0x768   : > { %4904 = vmatpush3.bf16.xpose.msra.mxu1 %v2331_v54  ;;  %4905 = vmatprep.mubr.msk.bf16.mxu1 %vm5372_vm2, %v5371_v49 }
 0x769   : > { %4915 = vmatprep.subr.bf16.mxu1 %v5371_v49 }
 0x76b   : > { %v2526_v57 = vpop.permute.xlu0 %2525 }
 0x76c   : > { %v2531_v61 = vsel %vm986_vm3, %v2526_v57, 0 }
 0x76f   : > { %4906 = vmatmul.mubr.msk.bf16.vlgmr.msra.gmra.mrb[48].mxu1 %vm986_vm3, %v2324_v50  ;;  %v2524_v0 = vpop.permute.xlu0 %2523 }
 0x770   : > { %4916 = vmatpush3.bf16.xpose.msra.mxu1 %v2431_v60  ;;  %4917 = vmatprep.mubr.msk.bf16.mxu1 %vm5372_vm2, %v5371_v49 }
 0x771   : > { %4927 = vmatprep.subr.bf16.mxu1 %v5371_v49 }
 0x777   : > { %4918 = vmatmul.mubr.msk.bf16.vlgmr.msra.gmra.mrb[52].mxu1 %vm986_vm3, %v2424_v58 }
 0x778   : > { %4928 = vmatpush3.bf16.xpose.msra.mxu1 %v2531_v61  ;;  %4929 = vmatprep.mubr.msk.bf16.mxu1 %vm5372_vm2, %v5371_v49 }
 0x779   : > { %4939 = vmatprep.subr.bf16.mxu1 %v5371_v49 }
 0x77c   : > { %v2010_v63 = vpop.xlane.xlu1 %2009 }
 0x77d   : > { %5261 = vrcp.f32 %v2010_v63 }
 0x77f   : > { %4930 = vmatmul.mubr.msk.bf16.vlgmr.msra.gmra.mrb[56].mxu1 %vm986_vm3, %v2524_v0 }
 0x780   : > { %4941 = vmatprep.mubr.msk.bf16.mxu1 %vm5372_vm2, %v5371_v49  ;;  %v2376_v5 = vpop.permute.xlu1 %2375 }
 0x787   : > { %v5262_v1 = vpop.eup %5261 }
 0x788   : > { %v2024_v2 = vmul.f32 %v5262_v1, %v5886_v13  ;;  %v2381_v13 = vsel %vm986_vm3, %v2376_v5, 0 }
 0x78a   : > { %v2032_v3 = vpack.c.bf16 %v2024_v2, %v2024_v2 }
 0x78c   : > { %4888 = vmatmul.mubr.msk.bf16.vlgmr.msra.gmra.mrb[52].mxu0 %vm986_vm3, %v2032_v3 }
 0x78d   : > { %4898 = vmatpush3.bf16.msra.mxu0 %v2281_v4  ;;  %4899 = vmatprep.mubr.msk.bf16.mxu0 %vm5372_vm2, %v5371_v49 }
 0x78e   : > { %4909 = vmatprep.subr.bf16.mxu0 %v5371_v49 }
 0x7b1   : > { %v2016_v6 = vpop.xlane.xlu1 %2015 }
 0x7b2   : > { %5263 = vrcp.f32 %v2016_v6 }
 0x7b5   : > { %v2374_v9 = vpop.permute.xlu1 %2373 }
 0x7b9   : > { %v2476_v14 = vpop.permute.xlu1 %2475 }
 0x7ba   : > { %v2481_v16 = vsel %vm986_vm3, %v2476_v14, 0 }
 0x7bc   : > { %v5264_v8 = vpop.eup %5263 }
 0x7bd   : > { %v2028_v10 = vmul.f32 %v5264_v8, %v5898_v21  ;;  %v2474_v15 = vpop.permute.xlu1 %2473 }
 0x7bf   : > { %v2034_v11 = vpack.c.bf16 %v2028_v10, %v2028_v10 }
 0x7c1   : > { %4900 = vmatmul.mubr.msk.bf16.vlgmr.msra.gmra.mrb[56].mxu0 %vm986_vm3, %v2034_v11  ;;  %v2576_v17 = vpop.permute.xlu1 %2575 }
 0x7c2   : > { %4910 = vmatpush3.bf16.xpose.msra.mxu0 %v2381_v13  ;;  %4911 = vmatprep.mubr.msk.bf16.mxu0 %vm5372_vm2, %v5371_v49  ;;  %v2581_v18 = vsel %vm986_vm3, %v2576_v17, 0 }
 0x7c3   : > { %4921 = vmatprep.subr.bf16.mxu0 %v5371_v49 }
 0x7c5   : > { %v2574_v19 = vpop.permute.xlu1 %2573 }
 0x7c9   : > { %4912 = vmatmul.mubr.msk.bf16.vlgmr.msra.gmra.mrb[60].mxu0 %vm986_vm3, %v2374_v9 }
 0x7ca   : > { %4922 = vmatpush3.bf16.xpose.msra.mxu0 %v2481_v16  ;;  %4923 = vmatprep.mubr.msk.bf16.mxu0 %vm5372_vm2, %v5371_v49 }
 0x7cb   : > { %4933 = vmatprep.subr.bf16.mxu0 %v5371_v49 }
 0x7d1   : > { %4924 = vmatmul.mubr.msk.bf16.vlgmr.msra.gmra.mrb[64].mxu0 %vm986_vm3, %v2474_v15 }
 0x7d2   : > { %4934 = vmatpush3.bf16.xpose.msra.mxu0 %v2581_v18  ;;  %4935 = vmatprep.mubr.msk.bf16.mxu0 %vm5372_vm2, %v5371_v49 }
 0x7d3   : > { %4945 = vmatprep.subr.bf16.mxu0 %v5371_v49 }
 0x7d9   : > { %4936 = vmatmul.mubr.msk.bf16.vlgmr.msra.gmra.mrb[68].mxu0 %vm986_vm3, %v2574_v19 }
 0x7da   : > { %4947 = vmatprep.mubr.msk.bf16.mxu0 %vm5372_vm2, %v5371_v49 }
 0x7fd   : > { %v5973_v20 = vpop.f32.mrb[36].mxu1 }
 0x7fe   : > { %v4871_v21 = vpop.f32.mrb[37].mxu1 }
 0x7ff   : > { %v2080_v22 = vpop.f32.mrb[38].mxu1 }
 0x800   : > { %v4872_v24 = vpop.f32.mrb[39].mxu1 }
 0x805   : > { %v5975_v25 = vpop.f32.mrb[40].mxu1 }
 0x806   : > { %v4883_v26 = vpop.f32.mrb[41].mxu1 }
 0x807   : > { %v2176_v28 = vpop.f32.mrb[42].mxu1 }
 0x808   : > { %v4884_v23 = vpop.f32.mrb[43].mxu1 }
 0x82a   : > { %v5977_v30 = vpop.f32.mrb[48].mxu0 }
 0x82b   : > { %v5150_v31 = vpack.i.bf16 %v5977_v30, %v5973_v20  ;;  %v4877_v32 = vpop.f32.mrb[49].mxu0 }
 0x82c   : > { %v2128_v33 = vpop.f32.mrb[50].mxu0 }
 0x82d   : > { %v4878_v35 = vpop.f32.mrb[51].mxu0 }
 0x83a   : > { %v5981_v36 = vpop.f32.mrb[44].mxu1 }
 0x83b   : > { %v4895_v37 = vpop.f32.mrb[45].mxu1 }
 0x83c   : > { %v2272_v40 = vpop.f32.mrb[46].mxu1 }
 0x83d   : > { %v4896_v41 = vpop.f32.mrb[47].mxu1 }
 0x842   : > { %v2367_v43 = vpop.f32.mrb[48].mxu1 }
 0x843   : > { %v2623_v45 = vmul.f32 0.35355338, %v2367_v43  ;;  %v4907_v46 = vpop.f32.mrb[49].mxu1 }
 0x844   : > { %v2370_v48 = vpop.f32.mrb[50].mxu1 }
 0x845   : > { %v4908_v50 = vpop.f32.mrb[51].mxu1  ;;  %v2629_v52 = vadd.f32 %v2623_v45, %v5707_v12 }
 0x847   : > { %v2635_v53 = vsel %vm986_vm3, %v2629_v52, -inf }
 0x848   : > { %2636 = vmax.xlane.f32.xlu0 %v2635_v53 }
 0x84a   : > { %v2467_v54 = vpop.f32.mrb[52].mxu1 }
 0x84b   : > { %v2625_v55 = vmul.f32 0.35355338, %v2467_v54  ;;  %v4919_v58 = vpop.f32.mrb[53].mxu1 }
 0x84c   : > { %v2470_v60 = vpop.f32.mrb[54].mxu1 }
 0x84d   : > { %v4920_v57 = vpop.f32.mrb[55].mxu1  ;;  %v2631_v61 = vadd.f32 %v2625_v55, %v5707_v12 }
 0x84f   : > { %v2641_v62 = vsel %vm986_vm3, %v2631_v61, -inf }
 0x850   : > { %2642 = vmax.xlane.f32.xlu0 %v2641_v62 }
 0x852   : > { %v2567_v63 = vpop.f32.mrb[56].mxu1 }
 0x853   : > { %v4931_v0 = vpop.f32.mrb[57].mxu1  ;;  %v2627_v26 = vmul.f32 0.35355338, %v2567_v63 }
 0x854   : > { %v2570_v1 = vpop.f32.mrb[58].mxu1 }
 0x855   : > { %v4932_v2 = vpop.f32.mrb[59].mxu1  ;;  %v2633_v40 = vadd.f32 %v2627_v26, %v5707_v12 }
 0x857   : > { %v2647_v45 = vsel %vm986_vm3, %v2633_v40, -inf }
 0x85f   : > { %v5987_v3 = vpop.f32.mrb[52].mxu0 }
 0x860   : > { %v5165_v4 = vpack.i.bf16 %v5987_v3, %v5975_v25  ;;  %v4889_v5 = vpop.f32.mrb[53].mxu0 }
 0x861   : > { %v2224_v6 = vpop.f32.mrb[54].mxu0 }
 0x862   : > { %v4890_v8 = vpop.f32.mrb[55].mxu0 }
 0x894   : > { %v5991_v9 = vpop.f32.mrb[56].mxu0 }
 0x895   : > { %v5180_v10 = vpack.i.bf16 %v5991_v9, %v5981_v36  ;;  %v4901_v11 = vpop.f32.mrb[57].mxu0 }
 0x896   : > { %v2320_v13 = vpop.f32.mrb[58].mxu0 }
 0x897   : > { %v4902_v14 = vpop.f32.mrb[59].mxu0 }
 0x89c   : > { %v2417_v15 = vpop.f32.mrb[60].mxu0 }
 0x89d   : > { %v2624_v16 = vmul.f32 0.35355338, %v2417_v15  ;;  %v4913_v17 = vpop.f32.mrb[61].mxu0 }
 0x89e   : > { %v2420_v18 = vpop.f32.mrb[62].mxu0 }
 0x89f   : > { %v4914_v19 = vpop.f32.mrb[63].mxu0  ;;  %v2630_v21 = vadd.f32 %v2624_v16, %v5707_v12 }
 0x8a1   : > { %v2638_v22 = vsel %vm986_vm3, %v2630_v21, -inf }
 0x8a2   : > { %2639 = vmax.xlane.f32.xlu1 %v2638_v22 }
 0x8a4   : > { %v2517_v24 = vpop.f32.mrb[64].mxu0 }
 0x8a5   : > { %v2626_v28 = vmul.f32 0.35355338, %v2517_v24  ;;  %v4925_v23 = vpop.f32.mrb[65].mxu0 }
 0x8a6   : > { %v2520_v32 = vpop.f32.mrb[66].mxu0 }
 0x8a7   : > { %v4926_v33 = vpop.f32.mrb[67].mxu0  ;;  %v2632_v35 = vadd.f32 %v2626_v28, %v5707_v12 }
 0x8a9   : > { %v2644_v37 = vsel %vm986_vm3, %v2632_v35, -inf }
 0x8aa   : > { %2645 = vmax.xlane.f32.xlu0 %v2644_v37 }
 0x8ac   : > { %v2617_v41 = vpop.f32.mrb[68].mxu0 }
 0x8ad   : > { %v4937_v43 = vpop.f32.mrb[69].mxu0  ;;  %v2628_v53 = vmul.f32 0.35355338, %v2617_v41 }
 0x8ae   : > { %v2620_v46 = vpop.f32.mrb[70].mxu0  ;;  %2648 = vmax.xlane.f32.xlu0 %v2647_v45 }
 0x8af   : > { %v4938_v48 = vpop.f32.mrb[71].mxu0  ;;  %v6010_v58 = vadd.f32 %v2628_v53, %v5707_v12 }
 0x8b1   : > { %v2650_v62 = vsel %vm986_vm3, %v6010_v58, -inf }
 0x8b3   : > { %2755 = vrot.lane.b32.xlu1 %v5655_v42, %s5381_s30 }
 0x8b7   : > { %2803 = vrot.lane.b32.xlu1 %v5659_v47, %s5381_s30 }
 0x8bb   : > { %2851 = vrot.lane.b32.xlu1 %v5662_v51, %s5381_s30 }
 0x8c4   : > { %2707 = vrot.lane.b32.xlu0 %v5653_v39, %s5381_s30 }
 0x8d5   : > { %v2637_v50 = vpop.xlane.xlu0 %2636 }
 0x8d6   : > { %v2653_v54 = vsub.f32 %v2629_v52, %v2637_v50 }
 0x8d8   : > { %v2659_v55 = vmul.f32 1.442695, %v2653_v54 }
 0x8da   : > { %5265 = vpow2.f32 %v2659_v55 }
 0x8dd   : > { %v2643_v60 = vpop.xlane.xlu0 %2642 }
 0x8de   : > { %v2655_v57 = vsub.f32 %v2631_v61, %v2643_v60 }
 0x8df   : > { %2651 = vmax.xlane.f32.xlu1 %v2650_v62 }
 0x8e0   : > { %v2663_v63 = vmul.f32 1.442695, %v2655_v57 }
 0x8e2   : > { %5267 = vpow2.f32 %v2663_v63 }
 0x8e4   : > { %v5266_v0 = vpop.eup %5265 }
 0x8e5   : > { %v2671_v1 = vsel %vm986_vm3, %v5266_v0, 0.0 }
 0x8e6   : > { %2672 = vadd.xlane.f32.xlu0 %v2671_v1 }
 0x8ec   : > { %v5268_v2 = vpop.eup %5267 }
 0x8ed   : > { %v2677_v52 = vsel %vm986_vm3, %v5268_v2, 0.0 }
 0x8ee   : > { %2678 = vadd.xlane.f32.xlu0 %v2677_v52 }
 0x904   : > { %2899 = vrot.lane.b32.xlu0 %v5665_v56, %s5381_s30 }
 0x92f   : > { %v2640_v5 = vpop.xlane.xlu1 %2639 }
 0x930   : > { %v2654_v6 = vsub.f32 %v2630_v21, %v2640_v5 }
 0x932   : > { %v2661_v61 = vmul.f32 1.442695, %v2654_v6 }
 0x933   : > { %v2756_v8 = vpop.permute.xlu1 %2755 }
 0x934   : > { %5269 = vpow2.f32 %v2661_v61  ;;  %v2761_v11 = vsel %vm1367_vm5, %v2756_v8, 0 }
 0x935   : > { %4946 = vmatpush3.bf16.msra.mxu0 %v2761_v11 }
 0x936   : > { %4957 = vmatprep.subr.bf16.mxu0 %v5371_v49 }
 0x937   : > { %v2646_v13 = vpop.xlane.xlu0 %2645  ;;  %v2804_v41 = vpop.permute.xlu1 %2803 }
 0x938   : > { %v2656_v26 = vsub.f32 %v2632_v35, %v2646_v13  ;;  %v2809_v45 = vsel %vm1367_vm5, %v2804_v41, 0 }
 0x93a   : > { %v2665_v28 = vmul.f32 1.442695, %v2656_v26 }
 0x93b   : > { %v2649_v14 = vpop.xlane.xlu0 %2648  ;;  %v2852_v55 = vpop.permute.xlu1 %2851 }
 0x93c   : > { %v2657_v15 = vsub.f32 %v2633_v40, %v2649_v14  ;;  %v2857_v6 = vsel %vm1367_vm5, %v2852_v55, 0 }
 0x93e   : > { %v6020_v16 = vpop.eup %5269  ;;  %v2667_v17 = vmul.f32 1.442695, %v2657_v15 }
 0x93f   : > { %v2708_v18 = vpop.permute.xlu0 %2707  ;;  %v2674_v19 = vsel %vm986_vm3, %v6020_v16, 0.0 }
 0x940   : > { %5271 = vpow2.f32 %v2667_v17  ;;  %v2713_v21 = vsel %vm1367_vm5, %v2708_v18, 0  ;;  %2675 = vadd.xlane.f32.xlu1 %v2674_v19 }
 0x941   : > { %4940 = vmatpush3.bf16.msra.mxu1 %v2713_v21  ;;  %5273 = vpow2.f32 %v2665_v28 }
 0x942   : > { %4951 = vmatprep.subr.bf16.mxu1 %v5371_v49 }
 0x94a   : > { %v6026_v22 = vpop.eup %5271 }
 0x94b   : > { %v2683_v24 = vsel %vm986_vm3, %v6026_v22, 0.0  ;;  %v6040_v23 = vpop.eup %5273 }
 0x94c   : > { %2684 = vadd.xlane.f32.xlu0 %v2683_v24  ;;  %v2680_v33 = vsel %vm986_vm3, %v6040_v23, 0.0 }
 0x951   : > { %2947 = vrot.lane.b32.xlu1 %v5667_v59, %s5381_s30  ;;  %s6439_s30 = sld [smem:[#allocation13_spill]] (!%p4608_p6) }
 0x962   : > { %2997 = vrot.lane.b32.xlu0 %v5653_v39, %s5382_s20 }
 0x966   : > { %2995 = vrot.lane.b32.xlu0 %v5653_v39, %s5383_s1 }
 0x96a   : > { %3097 = vrot.lane.b32.xlu0 %v5659_v47, %s5382_s20 }
 0x96c   : > { %v2652_v60 = vpop.xlane.xlu1 %2651 }
 0x96d   : > { %v2658_v57 = vsub.f32 %v6010_v58, %v2652_v60 }
 0x96e   : > { %3095 = vrot.lane.b32.xlu0 %v5659_v47, %s5383_s1 }
 0x96f   : > { %v2669_v62 = vmul.f32 1.442695, %v2658_v57 }
 0x972   : > { %3197 = vrot.lane.b32.xlu0 %v5665_v56, %s5382_s20 }
 0x973   : > { %v2673_v32 = vpop.xlane.xlu0 %2672 }
 0x974   : > { %5275 = vrcp.f32 %v2673_v32 }
 0x975   : > { %2681 = vadd.xlane.f32.xlu1 %v2680_v33 }
 0x976   : > { %3195 = vrot.lane.b32.xlu0 %v5665_v56, %s5383_s1 }
 0x97b   : > { %v2679_v35 = vpop.xlane.xlu0 %2678 }
 0x97c   : > { %5277 = vrcp.f32 %v2679_v35 }
 0x97d   : > { %5279 = vpow2.f32 %v2669_v62 }
 0x97e   : > { %v5276_v37 = vpop.eup %5275 }
 0x97f   : > { %v2690_v40 = vmul.f32 %v5276_v37, %v5266_v0  ;;  %v2900_v50 = vpop.permute.xlu0 %2899 }
 0x980   : > { %v2905_v54 = vsel %vm1367_vm5, %v2900_v50, 0 }
 0x981   : > { %v2701_v43 = vpack.c.bf16 %v2690_v40, %v2690_v40 }
 0x983   : > { %4942 = vmatmul.mubr.msk.bf16.vlgmr.msra.gmra.mrb[60].mxu1 %vm986_vm3, %v2701_v43 }
 0x984   : > { %4952 = vmatpush3.bf16.msra.mxu1 %v2809_v45  ;;  %4953 = vmatprep.mubr.msk.bf16.mxu1 %vm5372_vm2, %v5371_v49 }
 0x985   : > { %4963 = vmatprep.subr.bf16.mxu1 %v5371_v49 }
 0x986   : > { %v5278_v46 = vpop.eup %5277  ;;  %3047 = vrot.lane.b32.xlu1 %v5655_v42, %s5382_s20 }
 0x987   : > { %v2694_v48 = vmul.f32 %v5278_v46, %v5268_v2  ;;  %v5280_v63 = vpop.eup %5279 }
 0x988   : > { %v2686_v0 = vsel %vm986_vm3, %v5280_v63, 0.0 }
 0x989   : > { %v2703_v53 = vpack.c.bf16 %v2694_v48, %v2694_v48 }
 0x98b   : > { %4954 = vmatmul.mubr.msk.bf16.vlgmr.msra.gmra.mrb[64].mxu1 %vm986_vm3, %v2703_v53 }
 0x98c   : > { %4964 = vmatpush3.bf16.msra.mxu1 %v2905_v54  ;;  %4965 = vmatprep.mubr.msk.bf16.mxu1 %vm5372_vm2, %v5371_v49 }
 0x98d   : > { %4975 = vmatprep.subr.bf16.mxu1 %v5371_v49 }
 0x9aa   : > { %2687 = vadd.xlane.f32.xlu1 %v2686_v0 }
 0x9bb   : > { %3045 = vrot.lane.b32.xlu1 %v5655_v42, %s5383_s1 }
 0x9bf   : > { %3147 = vrot.lane.b32.xlu1 %v5662_v51, %s5382_s20 }
 0x9c3   : > { %3145 = vrot.lane.b32.xlu1 %v5662_v51, %s5383_s1 }
 0x9c7   : > { %3247 = vrot.lane.b32.xlu1 %v5667_v59, %s5382_s20 }
 0x9cb   : > { %3245 = vrot.lane.b32.xlu1 %v5667_v59, %s5383_s1 }
 0x9cd   : > { %v2676_v58 = vpop.xlane.xlu1 %2675 }
 0x9ce   : > { %5281 = vrcp.f32 %v2676_v58 }
 0x9d8   : > { %v5282_v1 = vpop.eup %5281 }
 0x9d9   : > { %v2692_v2 = vmul.f32 %v5282_v1, %v6020_v16  ;;  %v2685_v52 = vpop.xlane.xlu0 %2684 }
 0x9da   : > { %5283 = vrcp.f32 %v2685_v52 }
 0x9db   : > { %v2702_v5 = vpack.c.bf16 %v2692_v2, %v2692_v2 }
 0x9dd   : > { %4948 = vmatmul.mubr.msk.bf16.vlgmr.msra.gmra.mrb[72].mxu0 %vm986_vm3, %v2702_v5  ;;  %v2998_v61 = vpop.permute.xlu0 %2997 }
 0x9de   : > { %4958 = vmatpush3.bf16.msra.mxu0 %v2857_v6  ;;  %4959 = vmatprep.mubr.msk.bf16.mxu0 %vm5372_vm2, %v5371_v49  ;;  %v3003_v15 = vsel %vm986_vm3, %v2998_v61, 0 }
 0x9df   : > { %4969 = vmatprep.subr.bf16.mxu0 %v5371_v49 }
 0x9e1   : > { %v2996_v11 = vpop.permute.xlu0 %2995 }
 0x9e4   : > { %v5284_v8 = vpop.eup %5283 }
 0x9e5   : > { %v2698_v13 = vmul.f32 %v5284_v8, %v6026_v22  ;;  %v3098_v16 = vpop.permute.xlu0 %3097  ;;  %v2948_v22 = vpop.permute.xlu1 %2947 }
 0x9e6   : > { %v3103_v18 = vsel %vm986_vm3, %v3098_v16, 0  ;;  %v2953_v35 = vsel %vm1367_vm5, %v2948_v22, 0 }
 0x9e7   : > { %v2705_v14 = vpack.c.bf16 %v2698_v13, %v2698_v13 }
 0x9e9   : > { %4966 = vmatmul.mubr.msk.bf16.vlgmr.msra.gmra.mrb[68].mxu1 %vm986_vm3, %v2705_v14  ;;  %v3096_v17 = vpop.permute.xlu0 %3095 }
 0x9ea   : > { %4976 = vmatpush3.bf16.xpose.msra.mxu1 %v3003_v15  ;;  %4977 = vmatprep.mubr.msk.bf16.mxu1 %vm5372_vm2, %v5371_v49 }
 0x9eb   : > { %4987 = vmatprep.subr.bf16.mxu1 %v5371_v49 }
 0x9ed   : > { %v3198_v19 = vpop.permute.xlu0 %3197 }
 0x9ee   : > { %v3203_v21 = vsel %vm986_vm3, %v3198_v19, 0 }
 0x9f1   : > { %4978 = vmatmul.mubr.msk.bf16.vlgmr.msra.gmra.mrb[72].mxu1 %vm986_vm3, %v2996_v11  ;;  %v3196_v24 = vpop.permute.xlu0 %3195 }
 0x9f2   : > { %4988 = vmatpush3.bf16.xpose.msra.mxu1 %v3103_v18  ;;  %4989 = vmatprep.mubr.msk.bf16.mxu1 %vm5372_vm2, %v5371_v49 }
 0x9f3   : > { %4999 = vmatprep.subr.bf16.mxu1 %v5371_v49 }
 0x9f9   : > { %4990 = vmatmul.mubr.msk.bf16.vlgmr.msra.gmra.mrb[76].mxu1 %vm986_vm3, %v3096_v17 }
 0x9fa   : > { %5000 = vmatpush3.bf16.xpose.msra.mxu1 %v3203_v21  ;;  %5001 = vmatprep.mubr.msk.bf16.mxu1 %vm5372_vm2, %v5371_v49 }
 0x9fb   : > { %5011 = vmatprep.subr.bf16.mxu1 %v5371_v49 }
 0xa01   : > { %5002 = vmatmul.mubr.msk.bf16.vlgmr.msra.gmra.mrb[80].mxu1 %vm986_vm3, %v3196_v24 }
 0xa02   : > { %v2682_v26 = vpop.xlane.xlu1 %2681  ;;  %5013 = vmatprep.mubr.msk.bf16.mxu1 %vm5372_vm2, %v5371_v49 }
 0xa03   : > { %5285 = vrcp.f32 %v2682_v26 }
 0xa06   : > { %v3048_v37 = vpop.permute.xlu1 %3047 }
 0xa0d   : > { %v5286_v28 = vpop.eup %5285 }
 0xa0e   : > { %v2696_v32 = vmul.f32 %v5286_v28, %v6040_v23  ;;  %v3053_v23 = vsel %vm986_vm3, %v3048_v37, 0 }
 0xa10   : > { %v2704_v33 = vpack.c.bf16 %v2696_v32, %v2696_v32 }
 0xa12   : > { %4960 = vmatmul.mubr.msk.bf16.vlgmr.msra.gmra.mrb[76].mxu0 %vm986_vm3, %v2704_v33 }
 0xa13   : > { %4970 = vmatpush3.bf16.msra.mxu0 %v2953_v35  ;;  %4971 = vmatprep.mubr.msk.bf16.mxu0 %vm5372_vm2, %v5371_v49 }
 0xa14   : > { %4981 = vmatprep.subr.bf16.mxu0 %v5371_v49 }
 0xa37   : > { %v2688_v40 = vpop.xlane.xlu1 %2687 }
 0xa38   : > { %5287 = vrcp.f32 %v2688_v40 }
 0xa3b   : > { %v3046_v43 = vpop.permute.xlu1 %3045 }
 0xa3f   : > { %v3148_v48 = vpop.permute.xlu1 %3147 }
 0xa40   : > { %v3153_v53 = vsel %vm986_vm3, %v3148_v48, 0 }
 0xa42   : > { %v5288_v41 = vpop.eup %5287 }
 0xa43   : > { %v2700_v45 = vmul.f32 %v5288_v41, %v5280_v63  ;;  %v3146_v50 = vpop.permute.xlu1 %3145 }
 0xa45   : > { %v2706_v46 = vpack.c.bf16 %v2700_v45, %v2700_v45 }
 0xa47   : > { %4972 = vmatmul.mubr.msk.bf16.vlgmr.msra.gmra.mrb[80].mxu0 %vm986_vm3, %v2706_v46  ;;  %v3248_v54 = vpop.permute.xlu1 %3247 }
 0xa48   : > { %4982 = vmatpush3.bf16.xpose.msra.mxu0 %v3053_v23  ;;  %4983 = vmatprep.mubr.msk.bf16.mxu0 %vm5372_vm2, %v5371_v49  ;;  %v3253_v60 = vsel %vm986_vm3, %v3248_v54, 0 }
 0xa49   : > { %4993 = vmatprep.subr.bf16.mxu0 %v5371_v49 }
 0xa4b   : > { %v3246_v0 = vpop.permute.xlu1 %3245 }
 0xa4f   : > { %4984 = vmatmul.mubr.msk.bf16.vlgmr.msra.gmra.mrb[84].mxu0 %vm986_vm3, %v3046_v43 }
 0xa50   : > { %4994 = vmatpush3.bf16.xpose.msra.mxu0 %v3153_v53  ;;  %4995 = vmatprep.mubr.msk.bf16.mxu0 %vm5372_vm2, %v5371_v49 }
 0xa51   : > { %5005 = vmatprep.subr.bf16.mxu0 %v5371_v49 }
 0xa56   : > { %v6113_v55 = vpop.f32.mrb[60].mxu1 }
 0xa57   : > { %v4943_v57 = vpop.f32.mrb[61].mxu1  ;;  %4996 = vmatmul.mubr.msk.bf16.vlgmr.msra.gmra.mrb[88].mxu0 %vm986_vm3, %v3146_v50 }
 0xa58   : > { %5006 = vmatpush3.bf16.xpose.msra.mxu0 %v3253_v60  ;;  %v2752_v62 = vpop.f32.mrb[62].mxu1  ;;  %5007 = vmatprep.mubr.msk.bf16.mxu0 %vm5372_vm2, %v5371_v49 }
 0xa59   : > { %v4944_v63 = vpop.f32.mrb[63].mxu1  ;;  %5017 = vmatprep.subr.bf16.mxu0 %v5371_v49 }
 0xa5e   : > { %v6120_v58 = vpop.f32.mrb[64].mxu1 }
 0xa5f   : > { %v4955_v1 = vpop.f32.mrb[65].mxu1  ;;  %5008 = vmatmul.mubr.msk.bf16.vlgmr.msra.gmra.mrb[92].mxu0 %vm986_vm3, %v3246_v0 }
 0xa60   : > { %v2848_v2 = vpop.f32.mrb[66].mxu1  ;;  %5019 = vmatprep.mubr.msk.bf16.mxu0 %vm5372_vm2, %v5371_v49 }
 0xa61   : > { %v4956_v52 = vpop.f32.mrb[67].mxu1 }
 0xab0   : > { %v6125_v5 = vpop.f32.mrb[72].mxu0 }
 0xab1   : > { %v5155_v6 = vpack.i.bf16 %v6125_v5, %v6113_v55  ;;  %v4949_v61 = vpop.f32.mrb[73].mxu0 }
 0xab2   : > { %v2800_v8 = vpop.f32.mrb[74].mxu0 }
 0xab3   : > { %v4950_v11 = vpop.f32.mrb[75].mxu0 }
 0xabc   : > { %v6129_v13 = vpop.f32.mrb[68].mxu1 }
 0xabd   : > { %v4967_v14 = vpop.f32.mrb[69].mxu1 }
 0xabe   : > { %v2944_v15 = vpop.f32.mrb[70].mxu1 }
 0xabf   : > { %v4968_v16 = vpop.f32.mrb[71].mxu1 }
 0xac4   : > { %v3039_v17 = vpop.f32.mrb[72].mxu1 }
 0xac5   : > { %v3295_v18 = vmul.f32 0.35355338, %v3039_v17  ;;  %v4979_v19 = vpop.f32.mrb[73].mxu1 }
 0xac6   : > { %v3042_v21 = vpop.f32.mrb[74].mxu1 }
 0xac7   : > { %v3301_v22 = vadd.f32 %v3295_v18, %v5707_v12  ;;  %v4980_v24 = vpop.f32.mrb[75].mxu1 }
 0xac9   : > { %v3307_v26 = vsel %vm986_vm3, %v3301_v22, -inf }
 0xaca   : > { %3308 = vmax.xlane.f32.xlu0 %v3307_v26 }
 0xacc   : > { %v3139_v28 = vpop.f32.mrb[76].mxu1 }
 0xacd   : > { %v3297_v32 = vmul.f32 0.35355338, %v3139_v28  ;;  %v4991_v33 = vpop.f32.mrb[77].mxu1 }
 0xace   : > { %v3142_v35 = vpop.f32.mrb[78].mxu1 }
 0xacf   : > { %v3303_v37 = vadd.f32 %v3297_v32, %v5707_v12  ;;  %v4992_v40 = vpop.f32.mrb[79].mxu1 }
 0xad1   : > { %v3313_v41 = vsel %vm986_vm3, %v3303_v37, -inf }
 0xad2   : > { %3314 = vmax.xlane.f32.xlu0 %v3313_v41 }
 0xad4   : > { %v3239_v43 = vpop.f32.mrb[80].mxu1 }
 0xad5   : > { %v5003_v45 = vpop.f32.mrb[81].mxu1  ;;  %v3299_v17 = vmul.f32 0.35355338, %v3239_v43 }
 0xad6   : > { %v3242_v46 = vpop.f32.mrb[82].mxu1 }
 0xad7   : > { %v5004_v23 = vpop.f32.mrb[83].mxu1  ;;  %v3305_v28 = vadd.f32 %v3299_v17, %v5707_v12 }
 0xad9   : > { %v3319_v41 = vsel %vm986_vm3, %v3305_v28, -inf }
 0xae5   : > { %v6135_v48 = vpop.f32.mrb[76].mxu0 }
 0xae6   : > { %v5170_v50 = vpack.i.bf16 %v6135_v48, %v6120_v58  ;;  %v4961_v53 = vpop.f32.mrb[77].mxu0 }
 0xae7   : > { %v2896_v54 = vpop.f32.mrb[78].mxu0 }
 0xae8   : > { %v4962_v60 = vpop.f32.mrb[79].mxu0 }
 0xb1a   : > { %v6139_v57 = vpop.f32.mrb[80].mxu0 }
 0xb1b   : > { %v5185_v62 = vpack.i.bf16 %v6139_v57, %v6129_v13  ;;  %v4973_v63 = vpop.f32.mrb[81].mxu0 }
 0xb1c   : > { %v2992_v0 = vpop.f32.mrb[82].mxu0 }
 0xb1d   : > { %v4974_v1 = vpop.f32.mrb[83].mxu0 }
 0xb22   : > { %v3089_v2 = vpop.f32.mrb[84].mxu0 }
 0xb23   : > { %v3296_v52 = vmul.f32 0.35355338, %v3089_v2  ;;  %v4985_v61 = vpop.f32.mrb[85].mxu0 }
 0xb24   : > { %v3092_v8 = vpop.f32.mrb[86].mxu0 }
 0xb25   : > { %v3302_v11 = vadd.f32 %v3296_v52, %v5707_v12  ;;  %v4986_v14 = vpop.f32.mrb[87].mxu0 }
 0xb27   : > { %v3310_v15 = vsel %vm986_vm3, %v3302_v11, -inf }
 0xb28   : > { %3311 = vmax.xlane.f32.xlu1 %v3310_v15 }
 0xb2a   : > { %v3189_v16 = vpop.f32.mrb[88].mxu0 }
 0xb2b   : > { %v3298_v18 = vmul.f32 0.35355338, %v3189_v16  ;;  %v4997_v19 = vpop.f32.mrb[89].mxu0 }
 0xb2c   : > { %v3192_v21 = vpop.f32.mrb[90].mxu0 }
 0xb2d   : > { %v3304_v24 = vadd.f32 %v3298_v18, %v5707_v12  ;;  %v4998_v26 = vpop.f32.mrb[91].mxu0 }
 0xb2f   : > { %v3316_v32 = vsel %vm986_vm3, %v3304_v24, -inf }
 0xb30   : > { %3317 = vmax.xlane.f32.xlu0 %v3316_v32 }
 0xb32   : > { %v3289_v33 = vpop.f32.mrb[92].mxu0 }
 0xb33   : > { %v3300_v35 = vmul.f32 0.35355338, %v3289_v33  ;;  %v5009_v40 = vpop.f32.mrb[93].mxu0 }
 0xb34   : > { %v3292_v45 = vpop.f32.mrb[94].mxu0  ;;  %3320 = vmax.xlane.f32.xlu0 %v3319_v41 }
 0xb35   : > { %v3306_v43 = vadd.f32 %v3300_v35, %v5707_v12  ;;  %v5010_v46 = vpop.f32.mrb[95].mxu0 }
 0xb37   : > { %v3322_v23 = vsel %vm986_vm3, %v3306_v43, -inf }
 0xb38   : > { %3323 = vmax.xlane.f32.xlu1 %v3322_v23 }
 0xb49   : > { %3427 = vrot.lane.b32.xlu1 %v5655_v42, %s5384_s23 }
 0xb4d   : > { %3475 = vrot.lane.b32.xlu1 %v5659_v47, %s5384_s23 }
 0xb51   : > { %3523 = vrot.lane.b32.xlu1 %v5662_v51, %s5384_s23 }
 0xb57   : > { %v3309_v53 = vpop.xlane.xlu0 %3308 }
 0xb58   : > { %v3325_v54 = vsub.f32 %v3301_v22, %v3309_v53 }
 0xb5a   : > { %v3331_v60 = vmul.f32 1.442695, %v3325_v54 }
 0xb5c   : > { %5289 = vpow2.f32 %v3331_v60 }
 0xb5f   : > { %v3315_v0 = vpop.xlane.xlu0 %3314 }
 0xb60   : > { %v3327_v1 = vsub.f32 %v3303_v37, %v3315_v0 }
 0xb62   : > { %v3335_v42 = vmul.f32 1.442695, %v3327_v1 }
 0xb64   : > { %5291 = vpow2.f32 %v3335_v42 }
 0xb66   : > { %v5290_v63 = vpop.eup %5289 }
 0xb67   : > { %v3343_v12 = vsel %vm986_vm3, %v5290_v63, 0.0 }
 0xb68   : > { %3344 = vadd.xlane.f32.xlu0 %v3343_v12 }
 0xb6e   : > { %v5292_v2 = vpop.eup %5291 }
 0xb6f   : > { %v3349_v47 = vsel %vm986_vm3, %v5292_v2, 0.0 }
 0xb7e   : > { %3379 = vrot.lane.b32.xlu0 %v5653_v39, %s5384_s23 }
 0xb9d   : > { %3350 = vadd.xlane.f32.xlu0 %v3349_v47 }
 0xbb5   : > { %v3312_v51 = vpop.xlane.xlu1 %3311 }
 0xbb6   : > { %v3326_v52 = vsub.f32 %v3302_v11, %v3312_v51 }
 0xbb8   : > { %v3333_v22 = vmul.f32 1.442695, %v3326_v52 }
 0xbba   : > { %5293 = vpow2.f32 %v3333_v22 }
 0xbbd   : > { %v3318_v61 = vpop.xlane.xlu0 %3317 }
 0xbbe   : > { %v3328_v8 = vsub.f32 %v3304_v24, %v3318_v61 }
 0xbc0   : > { %v3337_v14 = vmul.f32 1.442695, %v3328_v8 }
 0xbc1   : > { %v3321_v15 = vpop.xlane.xlu0 %3320 }
 0xbc2   : > { %5295 = vpow2.f32 %v3337_v14  ;;  %v3329_v16 = vsub.f32 %v3305_v28, %v3321_v15 }
 0xbc4   : > { %v5294_v17 = vpop.eup %5293  ;;  %v3339_v39 = vmul.f32 1.442695, %v3329_v16 }
 0xbc5   : > { %v3324_v18 = vpop.xlane.xlu1 %3323  ;;  %v3346_v37 = vsel %vm986_vm3, %v5294_v17, 0.0 }
 0xbc6   : > { %5297 = vpow2.f32 %v3339_v39  ;;  %v3330_v19 = vsub.f32 %v3306_v43, %v3324_v18  ;;  %3347 = vadd.xlane.f32.xlu1 %v3346_v37 }
 0xbc8   : > { %v3341_v21 = vmul.f32 1.442695, %v3330_v19 }
 0xbc9   : > { %v3428_v26 = vpop.permute.xlu1 %3427 }
 0xbca   : > { %5299 = vpow2.f32 %v3341_v21  ;;  %v3433_v11 = vsel %vm1367_vm5, %v3428_v26, 0 }
 0xbcb   : > { %5018 = vmatpush3.bf16.msra.mxu0 %v3433_v11 }
 0xbcc   : > { %v5296_v32 = vpop.eup %5295  ;;  %5029 = vmatprep.subr.bf16.mxu0 %v5371_v49 }
 0xbcd   : > { %v3352_v24 = vsel %vm986_vm3, %v5296_v32, 0.0 }
 0xbce   : > { %3353 = vadd.xlane.f32.xlu1 %v3352_v24  ;;  %v5198_v24 = vld [vmem:[%s5525_s16 + $0x8] sm:$0xff]  }
 0xbd0   : > { %v5298_v28 = vpop.eup %5297 }
 0xbd1   : > { %v3355_v33 = vsel %vm986_vm3, %v5298_v28, 0.0 }
 0xbd2   : > { %3356 = vadd.xlane.f32.xlu0 %v3355_v33 }
 0xbd4   : > { %v6166_v35 = vpop.eup %5299 }
 0xbd5   : > { %v3358_v40 = vsel %vm986_vm3, %v6166_v35, 0.0 }
 0xbd6   : > { %3359 = vadd.xlane.f32.xlu1 %v3358_v40 }
 0xbe7   : > { %3619 = vrot.lane.b32.xlu1 %v5667_v59, %s5384_s23 }
 0xbe8   : > { %3571 = vrot.lane.b32.xlu0 %v5665_v56, %s5384_s23 }
 0xbeb   : > { %5156 = vrot.lane.b32.xlu1 %v5155_v6, %s5385_s21  ;;  %v3476_v6 = vpop.permute.xlu1 %3475 }
 0xbec   : > { %5151 = vrot.lane.b32.xlu0 %v5150_v31, %s5386_s25  ;;  %v3481_v20 = vsel %vm1367_vm5, %v3476_v6, 0 }
 0xbef   : > { %5166 = vrot.lane.b32.xlu1 %v5165_v4, %s5386_s25  ;;  %v3524_v4 = vpop.permute.xlu1 %3523 }
 0xbf5   : > { %v3345_v59 = vpop.xlane.xlu0 %3344 }
 0xbf6   : > { %5301 = vrcp.f32 %v3345_v59 }
 0xbf9   : > { %v3380_v56 = vpop.permute.xlu0 %3379 }
 0xbfa   : > { %v3385_v41 = vsel %vm1367_vm5, %v3380_v56, 0 }
 0xbfb   : > { %5012 = vmatpush3.bf16.msra.mxu1 %v3385_v41 }
 0xbfc   : > { %5023 = vmatprep.subr.bf16.mxu1 %v5371_v49 }
 0xc00   : > { %v5302_v55 = vpop.eup %5301 }
 0xc01   : > { %v3362_v5 = vmul.f32 %v5302_v55, %v5290_v63  ;;  %v3529_v63 = vsel %vm1367_vm5, %v3524_v4, 0 }
 0xc03   : > { %v3373_v45 = vpack.c.bf16 %v3362_v5, %v3362_v5 }
 0xc05   : > { %5014 = vmatmul.mubr.msk.bf16.vlgmr.msra.gmra.mrb[84].mxu1 %vm986_vm3, %v3373_v45 }
 0xc06   : > { %5024 = vmatpush3.bf16.msra.mxu1 %v3481_v20  ;;  %5025 = vmatprep.mubr.msk.bf16.mxu1 %vm5372_vm2, %v5371_v49 }
 0xc07   : > { %5035 = vmatprep.subr.bf16.mxu1 %v5371_v49 }
 0xc2a   : > { %v3351_v25 = vpop.xlane.xlu0 %3350 }
 0xc2b   : > { %5303 = vrcp.f32 %v3351_v25 }
 0xc35   : > { %v5304_v30 = vpop.eup %5303 }
 0xc36   : > { %v3366_v31 = vmul.f32 %v5304_v30, %v5292_v2 }
 0xc38   : > { %v3375_v3 = vpack.c.bf16 %v3366_v31, %v3366_v31 }
 0xc3a   : > { %5026 = vmatmul.mubr.msk.bf16.vlgmr.msra.gmra.mrb[88].mxu1 %vm986_vm3, %v3375_v3 }
 0xc3b   : > { %5037 = vmatprep.mubr.msk.bf16.mxu1 %vm5372_vm2, %v5371_v49 }
 0xc53   : > { %v3348_v43 = vpop.xlane.xlu1 %3347 }
 0xc54   : > { %5305 = vrcp.f32 %v3348_v43 }
 0xc5b   : > { %v3354_v46 = vpop.xlane.xlu1 %3353 }
 0xc5c   : > { %5307 = vrcp.f32 %v3354_v46 }
 0xc5e   : > { %v5306_v23 = vpop.eup %5305 }
 0xc5f   : > { %v3364_v53 = vmul.f32 %v5306_v23, %v5294_v17  ;;  %v3357_v54 = vpop.xlane.xlu0 %3356  ;;  %v5197_v17 = vld [vmem:[%s5525_s16] sm:$0xff]   ;;  %s6437_s16 = sld [smem:[#allocation11_spill]] (!%p4608_p6) }
 0xc60   : > { %5309 = vrcp.f32 %v3357_v54 }
 0xc61   : > { %v3374_v60 = vpack.c.bf16 %v3364_v53, %v3364_v53 }
 0xc63   : > { %5020 = vmatmul.mubr.msk.bf16.vlgmr.msra.gmra.mrb[96].mxu0 %vm986_vm3, %v3374_v60  ;;  %v3360_v12 = vpop.xlane.xlu1 %3359  ;;  %v3572_v0 = vpop.permute.xlu0 %3571 }
 0xc64   : > { %5030 = vmatpush3.bf16.msra.mxu0 %v3529_v63  ;;  %5311 = vrcp.f32 %v3360_v12  ;;  %v3577_v1 = vsel %vm1367_vm5, %v3572_v0, 0  ;;  %5031 = vmatprep.mubr.msk.bf16.mxu0 %vm5372_vm2, %v5371_v49 }
 0xc65   : > { %5036 = vmatpush3.bf16.msra.mxu1 %v3577_v1  ;;  %5041 = vmatprep.subr.bf16.mxu0 %v5371_v49 }
 0xc66   : > { %v5308_v42 = vpop.eup %5307  ;;  %5047 = vmatprep.subr.bf16.mxu1 %v5371_v49 }
 0xc67   : > { %v3368_v2 = vmul.f32 %v5308_v42, %v5296_v32  ;;  %v3620_v47 = vpop.permute.xlu1 %3619  ;;  %v5152_v4 = vpop.permute.xlu0 %5151 }
 0xc68   : > { %v3625_v61 = vsel %vm1367_vm5, %v3620_v47, 0  ;;  %v5154_v36 = vunpack.i.h.bf16 %v5152_v4  ;;  %v5153_v9 = vunpack.i.l.bf16 %v5152_v4 }
 0xc69   : > { %v3376_v51 = vpack.c.bf16 %v3368_v2, %v3368_v2 }
 0xc6a   : > { %v5310_v52 = vpop.eup %5309  ;;  %v3740_v13 = vsel %vm986_vm3, %v5829_v29, %v5154_v36  ;;  %v3739_v57 = vsel %vm986_vm3, %v5827_v27, %v5153_v9  ;;  %v5339_v36 = vld [vmem:[#allocation2 + $0x10] sm:$0xff] }
 0xc6b   : > { %v3370_v22 = vmul.f32 %v5310_v52, %v5298_v28  ;;  %5032 = vmatmul.mubr.msk.bf16.vlgmr.msra.gmra.mrb[100].mxu0 %vm986_vm3, %v3376_v51  ;;  %v5157_v43 = vpop.permute.xlu1 %5156 }
 0xc6c   : > { %5042 = vmatpush3.bf16.msra.mxu0 %v3625_v61  ;;  %5043 = vmatprep.mubr.msk.bf16.mxu0 %vm5372_vm2, %v5371_v49  ;;  %v5158_v46 = vunpack.i.l.bf16 %v5157_v43 }
 0xc6d   : > { %v3377_v8 = vpack.c.bf16 %v3370_v22, %v3370_v22  ;;  %5063 = vmatprep.subr.bf16.mxu0 %v5371_v49 }
 0xc6e   : > { %v5312_v14 = vpop.eup %5311  ;;  %v3746_v54 = vsel %vm3745_vm6, %v3739_v57, %v5158_v46 }
 0xc6f   : > { %v3372_v15 = vmul.f32 %v5312_v14, %v6166_v35  ;;  %5038 = vmatmul.mubr.msk.bf16.vlgmr.msra.gmra.mrb[92].mxu1 %vm986_vm3, %v3377_v8  ;;  %v5167_v63 = vpop.permute.xlu1 %5166 }
 0xc70   : > { %5051 = vmatprep.mubr.msk.bf16.mxu1 %vm5372_vm2, %v5371_v49  ;;  %5048 = vmatpush3.bf16.msra.mxu1 %v5197_v17  ;;  %v5169_v2 = vunpack.i.h.bf16 %v5167_v63  ;;  %v5168_v47 = vunpack.i.l.bf16 %v5167_v63 }
 0xc71   : > { %v3378_v16 = vpack.c.bf16 %v3372_v15, %v3372_v15  ;;  %5049 = vmatprep.subr.bf16.mxu1 %v5371_v49 }
 0xc72   : > { %v3742_v52 = vsel %vm986_vm3, %v5833_v38, %v5169_v2  ;;  %v3741_v22 = vsel %vm986_vm3, %v5831_v34, %v5168_v47  ;;  %v5342_v2 = vld [vmem:[#allocation2 + $0x28] sm:$0xff] }
 0xc73   : > { %5044 = vmatmul.mubr.msk.bf16.vlgmr.msra.gmra.mrb[104].mxu0 %vm986_vm3, %v3378_v16 }
 0xc74   : > { %5067 = vmatprep.mubr.msk.bf16.mxu0 %vm5372_vm2, %v5371_v49  ;;  %5050 = vmatpush3.bf16.msra.mxu1 %v5198_v24 }
 0xc75   : > { %5079 = vmatprep.subr.bf16.mxu1 %v5371_v49 }
 0xcd8   : > { %v3421_v39 = vpop.f32.mrb[84].mxu1 }
 0xcd9   : > { %v5015_v18 = vpop.f32.mrb[85].mxu1 }
 0xcda   : > { %v3424_v37 = vpop.f32.mrb[86].mxu1 }
 0xcdb   : > { %v5016_v19 = vpop.f32.mrb[87].mxu1 }
 0xd0d   : > { %v3517_v21 = vpop.f32.mrb[88].mxu1 }
 0xd0e   : > { %v5027_v26 = vpop.f32.mrb[89].mxu1 }
 0xd0f   : > { %v3520_v11 = vpop.f32.mrb[90].mxu1 }
 0xd10   : > { %v5028_v32 = vpop.f32.mrb[91].mxu1 }
 0xd36   : > { %v3469_v28 = vpop.f32.mrb[96].mxu0 }
 0xd37   : > { %v5160_v33 = vpack.i.bf16 %v3469_v28, %v3421_v39  ;;  %v5021_v35 = vpop.f32.mrb[97].mxu0 }
 0xd38   : > { %v3472_v40 = vpop.f32.mrb[98].mxu0 }
 0xd39   : > { %v5022_v59 = vpop.f32.mrb[99].mxu0  ;;  %5161 = vrot.lane.b32.xlu0 %v5160_v33, %s5387_s0 }
 0xd3d   : > { %5171 = vrot.lane.b32.xlu0 %v5170_v50, %s5385_s21 }
 0xd3e   : > { %v3565_v56 = vpop.f32.mrb[100].mxu0 }
 0xd3f   : > { %v5175_v41 = vpack.i.bf16 %v3565_v56, %v3517_v21  ;;  %v5033_v55 = vpop.f32.mrb[101].mxu0 }
 0xd40   : > { %v3568_v5 = vpop.f32.mrb[102].mxu0 }
 0xd41   : > { %v5034_v6 = vpop.f32.mrb[103].mxu0  ;;  %5181 = vrot.lane.b32.xlu0 %v5180_v10, %s5386_s25  ;;  %5176 = vrot.lane.b32.xlu1 %v5175_v41, %s5387_s0  ;;  %v5159_v10 = vunpack.i.h.bf16 %v5157_v43 }
 0xd42   : > { %v3613_v45 = vpop.f32.mrb[92].mxu1  ;;  %v5337_v6 = vld [vmem:[#allocation2] sm:$0xff] }
 0xd43   : > { %v5039_v20 = vpop.f32.mrb[93].mxu1  ;;  %v3747_v60 = vsel %vm3745_vm6, %v3740_v13, %v5159_v10 }
 0xd44   : > { %v3616_v25 = vpop.f32.mrb[94].mxu1 }
 0xd45   : > { %5186 = vrot.lane.b32.xlu1 %v5185_v62, %s5385_s21  ;;  %v5040_v58 = vpop.f32.mrb[95].mxu1  ;;  %s6436_s21 = sld [smem:[#allocation10_spill]] (!%p4608_p6) }
 0xd46   : > { %v3661_v48 = vpop.f32.mrb[104].mxu0  ;;  %v5338_v58 = vld [vmem:[#allocation2 + $0x8] sm:$0xff] }
 0xd47   : > { %v5190_v50 = vpack.i.bf16 %v3661_v48, %v3613_v45  ;;  %v5045_v30 = vpop.f32.mrb[105].mxu0 }
 0xd48   : > { %v3664_v31 = vpop.f32.mrb[106].mxu0 }
 0xd49   : > { %v5046_v3 = vpop.f32.mrb[107].mxu0  ;;  %5191 = vrot.lane.b32.xlu0 %v5190_v50, %s5387_s0 }
 0xdab   : > { %v5162_v23 = vpop.permute.xlu0 %5161 }
 0xdac   : > { %v5164_v62 = vunpack.i.h.bf16 %v5162_v23  ;;  %v5163_v53 = vunpack.i.l.bf16 %v5162_v23  ;;  %v5340_v23 = vld [vmem:[#allocation2 + $0x18] sm:$0xff] }
 0xdae   : > { %v3753_v12 = vsel %vm3752_vm7, %v3746_v54, %v5163_v53  ;;  %v3754_v0 = vsel %vm3752_vm7, %v3747_v60, %v5164_v62 }
 0xdaf   : > { %v3759_v1 = vpack.c.bf16 %v3754_v0, %v3753_v12  ;;  %v5172_v42 = vpop.permute.xlu0 %5171  ;;  %v5341_v12 = vld [vmem:[#allocation2 + $0x20] sm:$0xff] }
 0xdb0   : > { %v5174_v51 = vunpack.i.h.bf16 %v5172_v42  ;;  %v5173_v29 = vunpack.i.l.bf16 %v5172_v42 }
 0xdb1   : > { %5052 = vmatmul.mubr.msk.bf16.vlgmr.msra.gmra.mrb[96].mxu1 %vm777_vm1, %v3759_v1 }
 0xdb2   : > { %5055 = vmatprep.mubr.msk.bf16.mxu1 %vm5372_vm2, %v5371_v49  ;;  %v3749_v14 = vsel %vm3745_vm6, %v3742_v52, %v5174_v51  ;;  %v3748_v15 = vsel %vm3745_vm6, %v3741_v22, %v5173_v29 }
 0xdb3   : > { %v5177_v27 = vpop.permute.xlu1 %5176  ;;  %v5182_v16 = vpop.permute.xlu0 %5181 }
 0xdb4   : > { %v5179_v61 = vunpack.i.h.bf16 %v5177_v27  ;;  %v5178_v8 = vunpack.i.l.bf16 %v5177_v27  ;;  %v5184_v19 = vunpack.i.h.bf16 %v5182_v16  ;;  %v5183_v21 = vunpack.i.l.bf16 %v5182_v16 }
 0xdb6   : > { %v3755_v17 = vsel %vm3752_vm7, %v3748_v15, %v5178_v8  ;;  %v3756_v39 = vsel %vm3752_vm7, %v3749_v14, %v5179_v61  ;;  %v3744_v11 = vsel %vm986_vm3, %v5841_v7, %v5184_v19  ;;  %v3743_v32 = vsel %vm986_vm3, %v5835_v44, %v5183_v21  ;;  %v4586_v44 = vld [vmem:[%s6435_s26] ss:$0 sm:$0xff] }
 0xdb7   : > { %v3760_v18 = vpack.c.bf16 %v3756_v39, %v3755_v17  ;;  %v5187_v37 = vpop.permute.xlu1 %5186 }
 0xdb8   : > { %v5189_v26 = vunpack.i.h.bf16 %v5187_v37  ;;  %v5188_v38 = vunpack.i.l.bf16 %v5187_v37 }
 0xdb9   : > { %5056 = vmatmul.mubr.msk.bf16.gmra.mrb[100].mxu1 %vm777_vm1, %v3760_v18 }
 0xdba   : > { %5059 = vmatprep.mubr.msk.bf16.mxu1 %vm5372_vm2, %v5371_v49  ;;  %v3750_v33 = vsel %vm3745_vm6, %v3743_v32, %v5188_v38  ;;  %v3751_v35 = vsel %vm3745_vm6, %v3744_v11, %v5189_v26 }
 0xdbb   : > { %v5192_v34 = vpop.permute.xlu0 %5191 }
 0xdbc   : > { %v5194_v24 = vunpack.i.h.bf16 %v5192_v34  ;;  %v5193_v28 = vunpack.i.l.bf16 %v5192_v34 }
 0xdbe   : > { %v3757_v40 = vsel %vm3752_vm7, %v3750_v33, %v5193_v28  ;;  %v3758_v59 = vsel %vm3752_vm7, %v3751_v35, %v5194_v24 }
 0xdbf   : > { %v3761_v56 = vpack.c.bf16 %v3758_v59, %v3757_v40 }
 0xdc1   : > { %5060 = vmatmul.mubr.msk.bf16.gmra.mrb[104].mxu1 %vm777_vm1, %v3761_v56 }
 0xdc2   : > { %5087 = vmatprep.mubr.msk.bf16.mxu1 %vm5372_vm2, %v5371_v49 }
 0xe84   : > { %v3828_v7 = vpop.f32.mrb[96].mxu1 }
 0xe85   : > { %v3829_v41 = vadd.f32 %v4586_v44, %v3828_v7  ;;  %v5053_v55 = vpop.f32.mrb[97].mxu1 }
 0xe86   : > { %v3831_v5 = vpop.f32.mrb[98].mxu1 }
 0xe87   : > { %v6269_v45 = vadd.f32 %v5337_v6, %v3829_v41  ;;  %v3832_v20 = vadd.f32 %v4586_v44, %v3831_v5  ;;  %v5054_v25 = vpop.f32.mrb[99].mxu1  ;;  %v5199_v5 = vld [vmem:[%s5542_s3] sm:$0xff]   ;;  %v5200_v6 = vld [vmem:[%s5542_s3 + $0x8] sm:$0xff]  }
 0xe88   : > { %5064 = vmatpush3.bf16.msra.mxu0 %v5199_v5 }
 0xe89   : > { %v6271_v48 = vadd.f32 %v5338_v58, %v3832_v20  ;;  %v3859_v50 = vsel %vm777_vm1, %v6269_v45, 0.0  ;;  %5065 = vmatprep.subr.bf16.mxu0 %v5371_v49 }
 0xe8a   : > { %3860 = vadd.xlane.f32.xlu1 %v3859_v50 }
 0xe8b   : > { %v3862_v30 = vsel %vm777_vm1, %v6271_v48, 0.0 }
 0xe8c   : > { %3863 = vadd.xlane.f32.xlu0 %v3862_v30  ;;  %v3836_v31 = vpop.f32.mrb[100].mxu1  ;;  %5066 = vmatpush3.bf16.msra.mxu0 %v5200_v6 }
 0xe8d   : > { %v3837_v3 = vadd.f32 %v4586_v44, %v3836_v31  ;;  %v5057_v4 = vpop.f32.mrb[101].mxu1 }
 0xe8e   : > { %v3839_v43 = vpop.f32.mrb[102].mxu1 }
 0xe8f   : > { %v6277_v9 = vadd.f32 %v5339_v36, %v3837_v3  ;;  %v3840_v10 = vadd.f32 %v4586_v44, %v3839_v43  ;;  %v5058_v46 = vpop.f32.mrb[103].mxu1 }
 0xe91   : > { %v6279_v13 = vadd.f32 %v5340_v23, %v3840_v10  ;;  %v3865_v57 = vsel %vm777_vm1, %v6277_v9, 0.0  ;;  %v4592_v23 = vld [vmem:[%s727_s14] ss:$0 sm:$0xff] }
 0xe92   : > { %3866 = vadd.xlane.f32.xlu0 %v3865_v57 }
 0xe93   : > { %v3868_v60 = vsel %vm777_vm1, %v6279_v13, 0.0 }
 0xe94   : > { %v3844_v62 = vpop.f32.mrb[104].mxu1 }
 0xe95   : > { %v3845_v53 = vadd.f32 %v4586_v44, %v3844_v62  ;;  %v5061_v54 = vpop.f32.mrb[105].mxu1 }
 0xe96   : > { %3869 = vadd.xlane.f32.xlu0 %v3868_v60  ;;  %v3847_v63 = vpop.f32.mrb[106].mxu1 }
 0xe97   : > { %v6285_v0 = vadd.f32 %v5341_v12, %v3845_v53  ;;  %v3848_v1 = vadd.f32 %v4586_v44, %v3847_v63  ;;  %v5062_v42 = vpop.f32.mrb[107].mxu1 }
 0xe99   : > { %v6287_v47 = vadd.f32 %v5342_v2, %v3848_v1  ;;  %v3871_v51 = vsel %vm777_vm1, %v6285_v0, 0.0 }
 0xe9a   : > { %3872 = vadd.xlane.f32.xlu1 %v3871_v51  ;;  %v4593_v51 = vld [vmem:[%s730_s27] ss:$0 sm:$0xff] }
 0xe9b   : > { %v3874_v29 = vsel %vm777_vm1, %v6287_v47, 0.0 }
 0xe9c   : > { %3875 = vadd.xlane.f32.xlu0 %v3874_v29 }
 0xf17   : > { %v3861_v27 = vpop.xlane.xlu1 %3860 }
 0xf18   : > { %v3877_v52 = vmul.f32 0.03125, %v3861_v27 }
 0xf19   : > { %v3864_v22 = vpop.xlane.xlu0 %3863 }
 0xf1a   : > { %v3883_v61 = vsub.f32 %v6269_v45, %v3877_v52  ;;  %v3878_v8 = vmul.f32 0.03125, %v3864_v22 }
 0xf1c   : > { %v3884_v14 = vsub.f32 %v6271_v48, %v3878_v8  ;;  %v3889_v15 = vmul.f32 %v3883_v61, %v3883_v61 }
 0xf1e   : > { %v3895_v16 = vsel %vm777_vm1, %v3889_v15, 0.0  ;;  %v3890_v17 = vmul.f32 %v3884_v14, %v3884_v14 }
 0xf1f   : > { %v3867_v39 = vpop.xlane.xlu0 %3866  ;;  %3896 = vadd.xlane.f32.xlu1 %v3895_v16 }
 0xf20   : > { %v3879_v18 = vmul.f32 0.03125, %v3867_v39  ;;  %v3898_v37 = vsel %vm777_vm1, %v3890_v17, 0.0 }
 0xf21   : > { %3899 = vadd.xlane.f32.xlu0 %v3898_v37 }
 0xf22   : > { %v3885_v19 = vsub.f32 %v6277_v9, %v3879_v18 }
 0xf23   : > { %v3870_v21 = vpop.xlane.xlu0 %3869 }
 0xf24   : > { %v3880_v26 = vmul.f32 0.03125, %v3870_v21  ;;  %v3891_v38 = vmul.f32 %v3885_v19, %v3885_v19 }
 0xf26   : > { %v6299_v34 = vsub.f32 %v6279_v13, %v3880_v26  ;;  %v3901_v11 = vsel %vm777_vm1, %v3891_v38, 0.0 }
 0xf27   : > { %3902 = vadd.xlane.f32.xlu1 %v3901_v11  ;;  %v3873_v32 = vpop.xlane.xlu1 %3872 }
 0xf28   : > { %v3881_v24 = vmul.f32 0.03125, %v3873_v32  ;;  %v3892_v28 = vmul.f32 %v6299_v34, %v6299_v34 }
 0xf29   : > { %v3876_v33 = vpop.xlane.xlu0 %3875 }
 0xf2a   : > { %v3887_v35 = vsub.f32 %v6285_v0, %v3881_v24  ;;  %v3882_v40 = vmul.f32 0.03125, %v3876_v33  ;;  %v3904_v59 = vsel %vm777_vm1, %v3892_v28, 0.0 }
 0xf2b   : > { %3905 = vadd.xlane.f32.xlu0 %v3904_v59  ;;  %v5203_v59 = vld [vmem:[%s5552_s19 + $0x10] sm:$0xff]  }
 0xf2c   : > { %v3888_v56 = vsub.f32 %v6287_v47, %v3882_v40  ;;  %v3893_v44 = vmul.f32 %v3887_v35, %v3887_v35  ;;  %v5202_v40 = vld [vmem:[%s5552_s19 + $0x8] sm:$0xff]  }
 0xf2e   : > { %v3907_v7 = vsel %vm777_vm1, %v3893_v44, 0.0  ;;  %v3894_v41 = vmul.f32 %v3888_v56, %v3888_v56  ;;  %v4594_v44 = vld [vmem:[%s738_s5] ss:$0 sm:$0xff] }
 0xf2f   : > { %3908 = vadd.xlane.f32.xlu1 %v3907_v7 }
 0xf30   : > { %v3910_v55 = vsel %vm777_vm1, %v3894_v41, 0.0 }
 0xf31   : > { %3911 = vadd.xlane.f32.xlu0 %v3910_v55 }
 0xfac   : > { %v3897_v20 = vpop.xlane.xlu1 %3896 }
 0xfad   : > { %v3913_v25 = vmul.f32 0.03125, %v3897_v20 }
 0xfae   : > { %v3900_v58 = vpop.xlane.xlu0 %3899 }
 0xfaf   : > { %v3919_v50 = vadd.f32 1e-12, %v3913_v25  ;;  %v3914_v30 = vmul.f32 0.03125, %v3900_v58 }
 0xfb1   : > { %5313 = vrsqrt.f32 %v3919_v50  ;;  %v3920_v31 = vadd.f32 1e-12, %v3914_v30 }
 0xfb3   : > { %5315 = vrsqrt.f32 %v3920_v31 }
 0xfb4   : > { %v3903_v3 = vpop.xlane.xlu1 %3902 }
 0xfb5   : > { %v3915_v4 = vmul.f32 0.03125, %v3903_v3 }
 0xfb7   : > { %v3921_v43 = vadd.f32 1e-12, %v3915_v4 }
 0xfb8   : > { %v3906_v36 = vpop.xlane.xlu0 %3905 }
 0xfb9   : > { %5317 = vrsqrt.f32 %v3921_v43  ;;  %v3916_v10 = vmul.f32 0.03125, %v3906_v36 }
 0xfbb   : > { %v5314_v46 = vpop.eup %5313  ;;  %v3922_v57 = vadd.f32 1e-12, %v3916_v10 }
 0xfbc   : > { %v3931_v62 = vmul.f32 %v5314_v46, %v3883_v61  ;;  %v3909_v53 = vpop.xlane.xlu1 %3908 }
 0xfbd   : > { %v5316_v54 = vpop.eup %5315  ;;  %5319 = vrsqrt.f32 %v3922_v57  ;;  %v3917_v60 = vmul.f32 0.03125, %v3909_v53 }
 0xfbe   : > { %v3943_v63 = vmul.f32 %v4592_v23, %v3931_v62  ;;  %v3932_v12 = vmul.f32 %v5316_v54, %v3884_v14  ;;  %v3912_v1 = vpop.xlane.xlu0 %3911 }
 0xfbf   : > { %v3923_v42 = vadd.f32 1e-12, %v3917_v60  ;;  %v3918_v2 = vmul.f32 0.03125, %v3912_v1 }
 0xfc0   : > { %v3944_v29 = vmul.f32 %v4592_v23, %v3932_v12  ;;  %v3955_v52 = vadd.f32 %v4593_v51, %v3943_v63 }
 0xfc1   : > { %5321 = vrsqrt.f32 %v3923_v42  ;;  %v3924_v27 = vadd.f32 1e-12, %v3918_v2 }
 0xfc2   : > { %v3956_v22 = vadd.f32 %v4593_v51, %v3944_v29 }
 0xfc3   : > { %v5318_v61 = vpop.eup %5317  ;;  %5323 = vrsqrt.f32 %v3924_v27 }
 0xfc4   : > { %v3933_v8 = vmul.f32 %v5318_v61, %v3885_v19  ;;  %v3961_v15 = vpack.c.bf16 %v3956_v22, %v3955_v52 }
 0xfc6   : > { %5068 = vmatmul.mubr.msk.bf16.vlgmr.msra.gmra.mrb[108].mxu0 %vm777_vm1, %v3961_v15  ;;  %v3945_v17 = vmul.f32 %v4592_v23, %v3933_v8 }
 0xfc7   : > { %v5320_v14 = vpop.eup %5319  ;;  %5071 = vmatprep.mubr.msk.bf16.mxu0 %vm5372_vm2, %v5371_v49 }
 0xfc8   : > { %v3934_v16 = vmul.f32 %v5320_v14, %v6299_v34  ;;  %v3957_v21 = vadd.f32 %v4593_v51, %v3945_v17 }
 0xfca   : > { %v3946_v39 = vmul.f32 %v4592_v23, %v3934_v16 }
 0xfcb   : > { %v5322_v18 = vpop.eup %5321 }
 0xfcc   : > { %v3935_v37 = vmul.f32 %v5322_v18, %v3887_v35  ;;  %v3958_v26 = vadd.f32 %v4593_v51, %v3946_v39  ;;  %v5201_v35 = vld [vmem:[%s5552_s19] sm:$0xff]  }
 0xfcd   : > { %v5324_v38 = vpop.eup %5323  ;;  %5080 = vmatpush3.bf16.msra.mxu1 %v5201_v35 }
 0xfce   : > { %v3936_v11 = vmul.f32 %v5324_v38, %v3888_v56  ;;  %v3962_v19 = vpack.c.bf16 %v3958_v26, %v3957_v21  ;;  %v3947_v32 = vmul.f32 %v4592_v23, %v3935_v37  ;;  %5081 = vmatprep.subr.bf16.mxu1 %v5371_v49  ;;  %v5204_v56 = vld [vmem:[%s5552_s19 + $0x18] sm:$0xff]  }
 0xfd0   : > { %5072 = vmatmul.mubr.msk.bf16.gmra.mrb[112].mxu0 %vm777_vm1, %v3962_v19  ;;  %v3948_v24 = vmul.f32 %v4592_v23, %v3936_v11  ;;  %v3959_v28 = vadd.f32 %v4593_v51, %v3947_v32 }
 0xfd1   : > { %5075 = vmatprep.mubr.msk.bf16.mxu0 %vm5372_vm2, %v5371_v49  ;;  %5082 = vmatpush3.bf16.msra.mxu1 %v5202_v40 }
 0xfd2   : > { %v3960_v34 = vadd.f32 %v4593_v51, %v3948_v24  ;;  %5083 = vmatprep.subr.bf16.mxu1 %v5371_v49 }
 0xfd4   : > { %v3963_v33 = vpack.c.bf16 %v3960_v34, %v3959_v28 }
 0xfd5   : > { %5084 = vmatpush3.bf16.msra.mxu1 %v5203_v59 }
 0xfd6   : > { %5085 = vmatprep.subr.bf16.mxu1 %v5371_v49 }
 0xfd8   : > { %5076 = vmatmul.mubr.msk.bf16.gmra.mrb[116].mxu0 %vm777_vm1, %v3963_v33 }
 0xfd9   : > { %5086 = vmatpush3.bf16.msra.mxu1 %v5204_v56 }
0x1099   : > { %v4030_v7 = vpop.f32.mrb[108].mxu0 }
0x109a   : > { %v4031_v41 = vadd.f32 %v4594_v44, %v4030_v7  ;;  %v5069_v55 = vpop.f32.mrb[109].mxu0 }
0x109b   : > { %v4033_v5 = vpop.f32.mrb[110].mxu0 }
0x109c   : > { %v4053_v6 = vmul.f32 %v4031_v41, %v4031_v41  ;;  %v4034_v20 = vadd.f32 %v4594_v44, %v4033_v5  ;;  %v5070_v25 = vpop.f32.mrb[111].mxu0 }
0x109e   : > { %v4059_v58 = vmul.f32 %v4053_v6, %v4031_v41  ;;  %v4054_v50 = vmul.f32 %v4034_v20, %v4034_v20 }
0x10a0   : > { %v4065_v30 = vmul.f32 0.044715, %v4059_v58  ;;  %v4060_v31 = vmul.f32 %v4054_v50, %v4034_v20 }
0x10a2   : > { %v4071_v3 = vadd.f32 %v4065_v30, %v4031_v41  ;;  %v4066_v4 = vmul.f32 0.044715, %v4060_v31 }
0x10a3   : > { %v4038_v43 = vpop.f32.mrb[112].mxu0 }
0x10a4   : > { %v4077_v36 = vmul.f32 0.7978846, %v4071_v3  ;;  %v4072_v10 = vadd.f32 %v4066_v4, %v4034_v20  ;;  %v4039_v46 = vadd.f32 %v4594_v44, %v4038_v43  ;;  %v5073_v23 = vpop.f32.mrb[113].mxu0 }
0x10a5   : > { %v4041_v57 = vpop.f32.mrb[114].mxu0 }
0x10a6   : > { %5325 = vtanh.f32 %v4077_v36  ;;  %v4078_v62 = vmul.f32 0.7978846, %v4072_v10  ;;  %v4055_v53 = vmul.f32 %v4039_v46, %v4039_v46  ;;  %v4042_v54 = vadd.f32 %v4594_v44, %v4041_v57  ;;  %v5074_v60 = vpop.f32.mrb[115].mxu0 }
0x10a8   : > { %5327 = vtanh.f32 %v4078_v62  ;;  %v4061_v63 = vmul.f32 %v4055_v53, %v4039_v46  ;;  %v4056_v12 = vmul.f32 %v4042_v54, %v4042_v54 }
0x10aa   : > { %v4067_v1 = vmul.f32 0.044715, %v4061_v63  ;;  %v4062_v42 = vmul.f32 %v4056_v12, %v4042_v54 }
0x10ab   : > { %v4046_v2 = vpop.f32.mrb[116].mxu0 }
0x10ac   : > { %v4073_v51 = vadd.f32 %v4067_v1, %v4039_v46  ;;  %v4068_v29 = vmul.f32 0.044715, %v4062_v42  ;;  %v4047_v27 = vadd.f32 %v4594_v44, %v4046_v2  ;;  %v5077_v52 = vpop.f32.mrb[117].mxu0 }
0x10ad   : > { %v4049_v22 = vpop.f32.mrb[118].mxu0 }
0x10ae   : > { %v4079_v61 = vmul.f32 0.7978846, %v4073_v51  ;;  %v4074_v8 = vadd.f32 %v4068_v29, %v4042_v54  ;;  %v4057_v15 = vmul.f32 %v4047_v27, %v4047_v27  ;;  %v4050_v14 = vadd.f32 %v4594_v44, %v4049_v22  ;;  %v5078_v16 = vpop.f32.mrb[119].mxu0 }
0x10b0   : > { %v5326_v17 = vpop.eup %5325  ;;  %5329 = vtanh.f32 %v4079_v61  ;;  %v4080_v39 = vmul.f32 0.7978846, %v4074_v8  ;;  %v4063_v18 = vmul.f32 %v4057_v15, %v4047_v27  ;;  %v4058_v37 = vmul.f32 %v4050_v14, %v4050_v14 }
0x10b1   : > { %v4089_v21 = vadd.f32 1.0, %v5326_v17 }
0x10b2   : > { %v5328_v26 = vpop.eup %5327  ;;  %5331 = vtanh.f32 %v4080_v39  ;;  %v4069_v38 = vmul.f32 0.044715, %v4063_v18  ;;  %v4064_v11 = vmul.f32 %v4058_v37, %v4050_v14 }
0x10b3   : > { %v4095_v19 = vmul.f32 0.5, %v4089_v21  ;;  %v4090_v32 = vadd.f32 1.0, %v5328_v26 }
0x10b4   : > { %v4075_v24 = vadd.f32 %v4069_v38, %v4047_v27  ;;  %v4070_v34 = vmul.f32 0.044715, %v4064_v11 }
0x10b5   : > { %v4096_v28 = vmul.f32 0.5, %v4090_v32  ;;  %v4101_v40 = vmul.f32 %v4095_v19, %v4031_v41  ;;  %v5388_v19 = vmov (!%p4608_p6), 0.0   ;;  %v5344_v32 = vld [vmem:[%s6410_s15 + $0x8] sm:$0xff] (!%p4608_p6)  }
0x10b6   : > { %v4081_v33 = vmul.f32 0.7978846, %v4075_v24  ;;  %v4076_v35 = vadd.f32 %v4070_v34, %v4050_v14  ;;  %5099 = vmatprep.subr.bf16.mxu0 (!%p4608_p6), %v5388_v19  ;;  %5103 = vmatprep.mubr.msk.bf16.mxu0 (!%p4608_p6), %vm5389_vm10, %v5388_v19 }
0x10b7   : > { %v4102_v59 = vmul.f32 %v4096_v28, %v4034_v20 }
0x10b8   : > { %5333 = vtanh.f32 %v4081_v33  ;;  %v4082_v56 = vmul.f32 0.7978846, %v4076_v35  ;;  %v4609_v35 = vld [vmem:[%s6436_s21] ss:$0 sm:$0xff] (!%p4608_p6) }
0x10b9   : > { %v4107_v44 = vpack.c.bf16 %v4102_v59, %v4101_v40  ;;  %v4610_v59 = vld [vmem:[%s6437_s16] ss:$0 sm:$0xff] (!%p4608_p6) }
0x10ba   : > { %v5330_v7 = vpop.eup %5329  ;;  %5335 = vtanh.f32 %v4082_v56 }
0x10bb   : > { %v4091_v55 = vadd.f32 1.0, %v5330_v7  ;;  %5088 = vmatmul.mubr.msk.bf16.vlgmr.msra.gmra.mrb[108].mxu1 %vm4149_vm8, %v4107_v44 }
0x10bc   : > { %v5332_v5 = vpop.eup %5331  ;;  %5091 = vmatprep.mubr.msk.bf16.mxu1 %vm5372_vm2, %v5371_v49 }
0x10bd   : > { %v4097_v6 = vmul.f32 0.5, %v4091_v55  ;;  %v4092_v25 = vadd.f32 1.0, %v5332_v5  ;;  %v4611_v55 = vld [vmem:[%s6438_s18] ss:$0 sm:$0xff] (!%p4608_p6) }
0x10bf   : > { %v4098_v58 = vmul.f32 0.5, %v4092_v25  ;;  %v4103_v50 = vmul.f32 %v4097_v6, %v4039_v46  ;;  %v4600_v46 = vld [vmem:[%s746_s22] ss:$0 sm:$0xff] }
0x10c1   : > { %v4104_v41 = vmul.f32 %v4098_v58, %v4042_v54 }
0x10c2   : > { %v5334_v20 = vpop.eup %5333 }
0x10c3   : > { %v4093_v30 = vadd.f32 1.0, %v5334_v20  ;;  %v4108_v31 = vpack.c.bf16 %v4104_v41, %v4103_v50 }
0x10c4   : > { %v5336_v3 = vpop.eup %5335 }
0x10c5   : > { %v4099_v4 = vmul.f32 0.5, %v4093_v30  ;;  %v4094_v43 = vadd.f32 1.0, %v5336_v3  ;;  %5092 = vmatmul.mubr.msk.bf16.gmra.mrb[112].mxu1 %vm4149_vm8, %v4108_v31 }
0x10c6   : > { %5095 = vmatprep.mubr.msk.bf16.mxu1 %vm5372_vm2, %v5371_v49 }
0x10c7   : > { %v4100_v36 = vmul.f32 0.5, %v4094_v43  ;;  %v4105_v10 = vmul.f32 %v4099_v4, %v4047_v27 }
0x10c9   : > { %v4106_v23 = vmul.f32 %v4100_v36, %v4050_v14 }
0x10cb   : > { %v4109_v57 = vpack.c.bf16 %v4106_v23, %v4105_v10 }
0x10cd   : > { %5096 = vmatmul.mubr.msk.bf16.gmra.mrb[116].mxu1 %vm4149_vm8, %v4109_v57 }
0x118e   : > { %v4193_v62 = vpop.f32.mrb[108].mxu1 }
0x118f   : > { %v4194_v53 = vadd.f32 %v4600_v46, %v4193_v62  ;;  %v5089_v54 = vpop.f32.mrb[109].mxu1 }
0x1190   : > { %v4196_v60 = vpop.f32.mrb[110].mxu1 }
0x1191   : > { %v4216_v63 = vadd.f32 %v4194_v53, %v6269_v45  ;;  %v4197_v12 = vadd.f32 %v4600_v46, %v4196_v60  ;;  %v5090_v1 = vpop.f32.mrb[111].mxu1 }
0x1193   : > { %4222 = vst.msk [vmem:[#allocation2] sm:$0xff] %vm777_vm1, %v4216_v63  ;;  %v4217_v49 = vadd.f32 %v4197_v12, %v6271_v48 }
0x1195   : > { %4223 = vst.msk [vmem:[#allocation2 + $0x8] sm:$0xff] %vm777_vm1, %v4217_v49 }
0x1198   : > { %v4201_v42 = vpop.f32.mrb[112].mxu1 }
0x1199   : > { %v4202_v2 = vadd.f32 %v4600_v46, %v4201_v42  ;;  %v5093_v51 = vpop.f32.mrb[113].mxu1 }
0x119a   : > { %v4204_v29 = vpop.f32.mrb[114].mxu1 }
0x119b   : > { %v4218_v27 = vadd.f32 %v4202_v2, %v6277_v9  ;;  %v4205_v52 = vadd.f32 %v4600_v46, %v4204_v29  ;;  %v5094_v22 = vpop.f32.mrb[115].mxu1 }
0x119d   : > { %4224 = vst.msk [vmem:[#allocation2 + $0x10] sm:$0xff] %vm777_vm1, %v4218_v27  ;;  %v4219_v45 = vadd.f32 %v4205_v52, %v6279_v13 }
0x119f   : > { %4225 = vst.msk [vmem:[#allocation2 + $0x18] sm:$0xff] %vm777_vm1, %v4219_v45 }
0x11a0   : > { %v4209_v61 = vpop.f32.mrb[116].mxu1 }
0x11a1   : > { %v4210_v8 = vadd.f32 %v4600_v46, %v4209_v61  ;;  %v5097_v15 = vpop.f32.mrb[117].mxu1  ;;  %4231 = sbr.rel (%p4608_p6) target bundleno = 5059 (0x13c3), region = 96 }
0x11a2   : > { %v4212_v48 = vpop.f32.mrb[118].mxu1 }
0x11a3   : > { %v4220_v14 = vadd.f32 %v4210_v8, %v6285_v0  ;;  %v4213_v16 = vadd.f32 %v4600_v46, %v4212_v48  ;;  %v5098_v17 = vpop.f32.mrb[119].mxu1 }
0x11a5   : > { %4226 = vst.msk [vmem:[#allocation2 + $0x20] sm:$0xff] %vm777_vm1, %v4220_v14  ;;  %v4221_v9 = vadd.f32 %v4213_v16, %v6287_v47  ;;  %v5343_v47 = vld [vmem:[%s6410_s15] sm:$0xff] (!%p4608_p6)  }
0x11a6   : > { %v4232_v13 = vld [vmem:[#allocation2] ss:$8 sm:$0xf] (!%p4608_p6)  ;;  %5100 = vmatpush3.bf16.msra.mxu0 (!%p4608_p6), %v5343_v47 }
0x11a7   : > { %4227 = vst.msk [vmem:[#allocation2 + $0x28] sm:$0xff] %vm777_vm1, %v4221_v9  ;;  %5101 = vmatprep.subr.bf16.mxu0 (!%p4608_p6), %v5388_v19 }
0x11aa   : > { %5102 = vmatpush3.bf16.msra.mxu0 %v5344_v32 }
0x11ae   : > { %v4233_v39 = vld [vmem:[#allocation2] ss:$8 sm:$0x30] }
0x11af   : > { %v4234_v18 = vor.u32 %v4233_v39, %v4232_v13 }
0x11b1   : > { %v4238_v37 = vsel %vm4237_vm9, %v4234_v18, 0.0 }
0x11b2   : > { %4239 = vadd.xlane.f32.xlu0 %v4238_v37 }
0x123f   : > { %v4240_v21 = vpop.xlane.xlu0 %4239 }
0x1240   : > { %v4241_v26 = vmul.f32 0.03125, %v4240_v21 }
0x1242   : > { %v4242_v0 = vsub.f32 %v4234_v18, %v4241_v26 }
0x1244   : > { %v4243_v38 = vmul.f32 %v4242_v0, %v4242_v0 }
0x1246   : > { %v4244_v11 = vsel %vm4237_vm9, %v4243_v38, 0.0 }
0x1247   : > { %4245 = vadd.xlane.f32.xlu0 %v4244_v11 }
0x12d4   : > { %v4246_v24 = vpop.xlane.xlu0 %4245 }
0x12d5   : > { %v4247_v34 = vmul.f32 0.03125, %v4246_v24 }
0x12d7   : > { %v4248_v28 = vadd.f32 1e-12, %v4247_v34 }
0x12d9   : > { %5345 = vrsqrt.f32 %v4248_v28 }
0x12e3   : > { %v5346_v33 = vpop.eup %5345 }
0x12e4   : > { %v4250_v40 = vmul.f32 %v5346_v33, %v4242_v0 }
0x12e6   : > { %v4257_v56 = vmul.f32 %v4609_v35, %v4250_v40 }
0x12e8   : > { %v4264_v44 = vadd.f32 %v4610_v59, %v4257_v56 }
0x12ea   : > { %v4265_v7 = vpack.c.bf16 %v4264_v44, %v4264_v44 }
0x12ec   : > { %5104 = vmatmul.mubr.msk.bf16.vlgmr.msra.gmra.mrb[0].mxu0 %vm777_vm1, %v4265_v7 }
0x13bf   : > { %v4326_v5 = vpop.f32.mrb[0].mxu0 }
0x13c0   : > { %v4327_v6 = vadd.f32 %v4611_v55, %v4326_v5  ;;  %v5105_v25 = vpop.f32.mrb[1].mxu0 }
0x13c1   : > { %v4329_v58 = vpop.f32.mrb[2].mxu0 }
0x13c2   : > { %4333 = vst.msk [vmem:[%s6439_s30] sm:$0x3f] %vm4332_vm11, %v4327_v6  ;;  %v5106_v50 = vpop.f32.mrb[3].mxu0 }
0x13c3 PF: > { %s6440_s14 = sld [smem:[#allocation4_spill]]  ;;  %s6441_s24 = sld [smem:[#allocation3_spill]] }
0x13c4   : > { %s6442_s25 = sld [smem:[#allocation5_spill]] }
0x13c9   : > { %s27_s26 = sadd.s32 1, %s6440_s14  }
0x13ca   : > { %p24_p7 = scmp.ge.s32.totalorder %s27_s26, 4  }
0x13cc   :  { %26 = sbr.rel (!%p24_p7) target bundleno = 9 (0x9), region = 162 }

</bundles_post_ra>
